<compile_context>
chip_gen: v6e
topology: v6e:2x2x1
jax: 0.10.0
libtpu: 0.0.40
codegen_flags: <defaults>
</compile_context>

<pallas_src>
import functools

import jax
import jax.numpy as jnp
from jax import lax
from jax.experimental import pallas as pl
from jax.experimental.pallas import tpu as pltpu

DILATION_POWERS = (2, 5, 6, 7, 8, 9)          # fixed by ResnetStackBlock.__init__
DILATIONS = tuple(2 ** p for p in DILATION_POWERS)
BN_EPS = 1e-5


# ----------------------------- Pallas kernel --------------------------------
def _resnet_stack_kernel(x_ref, mask_ref, w_in_ref, b_in_ref,
                         cw_ref, aff_ref, w_out_ref, b_out_ref,
                         out_ref, tap_ref, *, hidden, seq_len, dilations):
    H, L = hidden, seq_len
    Wt = x_ref.shape[-1]                       # batch_tile * seq_len (lane width)
    f32 = jnp.float32
    cdt = tap_ref.dtype                        # matmul operand dtype (bf16)

    def dot(a, b):
        return jnp.dot(a, b, preferred_element_type=f32)

    def celu(v):                               # CELU(alpha=1)
        # exp(min(v,0)) - 1 instead of expm1: expm1 lowering is not universally
        # available in Pallas/Mosaic; the accuracy delta near 0 is orders of
        # magnitude below this kernel's bf16-operand error budget.
        return jnp.maximum(v, 0.0) + jnp.exp(jnp.minimum(v, 0.0)) - 1.0

    # Conv1d(C_in -> H, k=1): one channel matmul over every lane of this tile.
    h = dot(w_in_ref[...], x_ref[...]) + b_in_ref[...]           # (H, Wt) f32

    for bi, d in enumerate(dilations):         # 6 DilationResBlock1D, unrolled
        res = h
        if d < L:
            m = mask_ref[bi]                   # (2, Wt) 0/1 — loaded ONCE per block
            m_r, m_l = m[0:1, :], m[1:2, :]    # shift-right / shift-left validity
        else:
            # dilation >= segment length: both neighbour taps fall entirely in the
            # conv zero padding -> zero those thirds of the tap slab once per block.
            zeros = jnp.zeros((H, Wt), cdt)
            tap_ref[pl.ds(0, H), :] = zeros
            tap_ref[pl.ds(2 * H, H), :] = zeros

        for j in range(2):                     # layer1, layer2
            l = 2 * bi + j
            # Assemble the (3H, Wt) operand directly in VMEM scratch:
            #   rows [0,H)   -> x[t-d]  (tap 0)
            #   rows [H,2H)  -> x[t]    (tap 1)
            #   rows [2H,3H) -> x[t+d]  (tap 2)
            tap_ref[pl.ds(H, H), :] = h.astype(cdt)
            if d < L:
                tap_ref[pl.ds(0, H), :] = (
                    pltpu.roll(h, d, axis=1) * m_r).astype(cdt)
                tap_ref[pl.ds(2 * H, H), :] = (
                    pltpu.roll(h, Wt - d, axis=1) * m_l).astype(cdt)
            a = aff_ref[l]                     # (H, 3): [conv_b | bn_scale | bn_shift]
            # Fused 3-tap conv as a single (H,3H)x(3H,Wt) MXU matmul -> bias -> CELU.
            y = celu(dot(cw_ref[l], tap_ref[...]) + a[:, 0:1])
            h = y * a[:, 1:2] + a[:, 2:3]      # folded eval-mode BatchNorm
        h = h + res                            # residual connection

    # Conv1d(H -> 1, k=1): lane-dense (1, Wt) store.
    out_ref[...] = dot(w_out_ref[...], h) + b_out_ref[...]


# ------------------------------- wrapper -------------------------------------
def resnet_stack_block(x, p, *, block_batch=1, compute_dtype=jnp.bfloat16):
    B, C_in, L = x.shape
    H = p["w_in"].shape[0]
    n_blocks = len(DILATIONS)
    n_layers = 2 * n_blocks

    # Batch tile: each grid step processes Bt whole batch segments (segments are
    # independent, so no halo is needed).  Fall back to one tile if the lane
    # width would violate the 128-lane divisibility rule.
    Bt = block_batch if (block_batch > 0 and B % block_batch == 0) else B
    if (Bt * L) % 128 != 0:
        Bt = B
    Wt = Bt * L
    grid = (B // Bt,)

    # Lane-batched layout: (C, B*L) with the batch folded into the lane axis.
    x2d = jnp.transpose(x, (1, 0, 2)).reshape(C_in, B * L).astype(jnp.float32)

    # Per-dilation segment-boundary masks (host-precomputed f32 0/1):
    #   row 0: t_local >= d      (shift-right tap valid)
    #   row 1: t_local <  L - d  (shift-left  tap valid)
    t = jnp.arange(L, dtype=jnp.int32)
    masks = jnp.stack(
        [jnp.stack([(t >= d).astype(jnp.float32),
                    (t < L - d).astype(jnp.float32)]) for d in DILATIONS])
    masks = jnp.tile(masks, (1, 1, Bt))                              # (6, 2, Wt)

    # Fused conv weights: (12, H, H, 3) -> (12, H, 3H), tap-major columns (bf16).
    cw_fused = jnp.concatenate([p["conv_w"][..., k] for k in range(3)],
                               axis=2).astype(compute_dtype)

    # conv bias + folded eval-mode BatchNorm packed into one (12, H, 3) slab.
    bn_scale = p["bn_gamma"] / jnp.sqrt(p["bn_var"] + BN_EPS)
    bn_shift = p["bn_beta"] - p["bn_mean"] * bn_scale
    aff = jnp.stack([p["conv_b"], bn_scale, bn_shift], axis=-1).astype(jnp.float32)

    kernel = functools.partial(_resnet_stack_kernel, hidden=H, seq_len=L,
                               dilations=DILATIONS)

    # Explicit VMEM budget (v7x: 64 MiB physical / 32 MiB default scoped).
    itm = jnp.dtype(compute_dtype).itemsize
    est = (2 * C_in * Wt * 4                     # x block (double-buffered)
           + 2 * Wt * 4                          # out block (double-buffered)
           + 3 * H * Wt * itm                    # tap scratch
           + n_layers * H * 3 * H * itm          # fused conv weights
           + n_layers * H * 128 * 4              # aff slab (lane-padded 3 -> 128)
           + n_blocks * 2 * Wt * 4               # masks
           + (H * C_in + 2 * H * 128 + 128) * 4  # 1x1 weights/biases (lane-padded)
           + 10 * H * Wt * 4)                    # live f32 activation temporaries
    vmem_limit = int(min(60 * 2 ** 20, max(32 * 2 ** 20, 2 * est)))

    out2d = pl.pallas_call(
        kernel,
        out_shape=jax.ShapeDtypeStruct((1, B * L), jnp.float32),
        grid=grid,
        in_specs=[
            pl.BlockSpec((C_in, Wt), lambda b: (0, b)),               # x (batch-tiled)
            pl.BlockSpec((n_blocks, 2, Wt), lambda b: (0, 0, 0)),     # masks (pinned)
            pl.BlockSpec((H, C_in), lambda b: (0, 0)),                # w_in
            pl.BlockSpec((H, 1), lambda b: (0, 0)),                   # b_in
            pl.BlockSpec((n_layers, H, 3 * H), lambda b: (0, 0, 0)),  # fused conv w
            pl.BlockSpec((n_layers, H, 3), lambda b: (0, 0, 0)),      # bias/BN slab
            pl.BlockSpec((1, H), lambda b: (0, 0)),                   # w_out
            pl.BlockSpec((1, 1), lambda b: (0, 0)),                   # b_out
        ],
        out_specs=pl.BlockSpec((1, Wt), lambda b: (0, b)),
        scratch_shapes=[pltpu.VMEM((3 * H, Wt), compute_dtype)],
        compiler_params=pltpu.CompilerParams(
            dimension_semantics=("parallel",),
            vmem_limit_bytes=vmem_limit),
    )(x2d, masks, p["w_in"].astype(jnp.float32), p["b_in"].reshape(H, 1),
      cw_fused, aff, p["w_out"].astype(jnp.float32), p["b_out"].reshape(1, 1))

    return out2d.reshape(1, B, L).transpose(1, 0, 2)                 # (B, 1, L)


# -------------------------- pure-JAX reference --------------------------------
def resnet_stack_block_ref(x, p):
    hp = lax.Precision.HIGHEST

    def conv1x1(v, w, b):
        return jnp.einsum("oc,bcl->bol", w, v, precision=hp) + b[None, :, None]

    def dilated_conv3(v, w, b, d):
        L = v.shape[-1]
        vp = jnp.pad(v, ((0, 0), (0, 0), (d, d)))
        y = b[None, :, None]
        for k in range(3):
            y = y + jnp.einsum("oc,bcl->bol", w[:, :, k],
                               vp[:, :, k * d:k * d + L], precision=hp)
        return y

    h = conv1x1(x, p["w_in"], p["b_in"])
    for bi, d in enumerate(DILATIONS):
        res = h
        for j in range(2):
            l = 2 * bi + j
            y = jax.nn.celu(dilated_conv3(h, p["conv_w"][l], p["conv_b"][l], d),
                            alpha=1.0)
            inv = p["bn_gamma"][l] / jnp.sqrt(p["bn_var"][l] + BN_EPS)
            h = ((y - p["bn_mean"][l][None, :, None]) * inv[None, :, None]
                 + p["bn_beta"][l][None, :, None])
        h = h + res
    return conv1x1(h, p["w_out"], p["b_out"])


# ----------------------------- param init -------------------------------------
def init_params(key, input_size, hidden_size):
    H = hidden_size
    n_layers = 2 * len(DILATIONS)
    ks = jax.random.split(key, 10)

    def u(k, shape, scale):
        return jax.random.uniform(k, shape, jnp.float32, -scale, scale)

    return dict(
        w_in=u(ks[0], (H, input_size), 1.0 / float(input_size) ** 0.5),
        b_in=u(ks[1], (H,), 0.1),
        conv_w=u(ks[2], (n_layers, H, H, 3), 1.0 / float(3 * H) ** 0.5),
        conv_b=u(ks[3], (n_layers, H), 0.1),
        bn_gamma=1.0 + 0.1 * jax.random.normal(ks[4], (n_layers, H), jnp.float32),
        bn_beta=0.1 * jax.random.normal(ks[5], (n_layers, H), jnp.float32),
        bn_mean=0.1 * jax.random.normal(ks[6], (n_layers, H), jnp.float32),
        bn_var=jax.random.uniform(ks[7], (n_layers, H), jnp.float32, 0.5, 1.5),
        w_out=u(ks[8], (1, H), 1.0 / float(H) ** 0.5),
        b_out=u(ks[9], (1,), 0.1),
    )


if __name__ == "__main__":
    B, C_IN, HIDDEN, L = 2, 4, 32, 256

    key = jax.random.PRNGKey(0)
    kx, kp = jax.random.split(key)
    x = jax.random.normal(kx, (B, C_IN, L), jnp.float32)
    params = init_params(kp, C_IN, HIDDEN)

    out = jax.block_until_ready(resnet_stack_block(x, params))
    ref = jax.block_until_ready(resnet_stack_block_ref(x, params))

    assert out.shape == (B, 1, L), out.shape
    max_err = float(jnp.max(jnp.abs(out - ref)))
    # bf16 MXU operands (f32 accumulation) across 13 chained conv layers vs. the
    # f32 HIGHEST-precision reference: expected deviation ~1e-2, so a 5e-2
    # tolerance is meaningful (structural bugs produce O(0.1-1) errors).
    assert jnp.allclose(out, ref, rtol=5e-2, atol=5e-2), max_err
    print("KERNEL_OK")
</pallas_src>

<mosaic_0001>
module attributes {stable_mosaic.version = 11 : i64} {
  func.func @_resnet_stack_kernel(%arg0: i32, %arg1: memref<4x256xf32, #tpu.memory_space<vmem>>, %arg2: memref<6x2x256xf32, #tpu.memory_space<vmem>>, %arg3: memref<32x4xf32, #tpu.memory_space<vmem>>, %arg4: memref<32x1xf32, #tpu.memory_space<vmem>>, %arg5: memref<12x32x96xbf16, #tpu.memory_space<vmem>>, %arg6: memref<12x32x3xf32, #tpu.memory_space<vmem>>, %arg7: memref<1x32xf32, #tpu.memory_space<vmem>>, %arg8: memref<1x1xf32, #tpu.memory_space<vmem>>, %arg9: memref<1x256xf32, #tpu.memory_space<vmem>>, %arg10: memref<96x256xbf16, #tpu.memory_space<vmem>>) attributes {dimension_semantics = [#tpu.dimension_semantics<parallel>], iteration_bounds = array<i64: 2>, scalar_prefetch = 0 : i64, scratch_operands = 1 : i64, tpu.core_type = #tpu.core_type<tc>, window_params = [{transform_indices = @transform_0, window_bounds = array<i64: 4, 256>}, {pipeline_mode = #tpu.pipeline_mode<synchronous>, transform_indices = @transform_1, window_bounds = array<i64: 6, 2, 256>}, {pipeline_mode = #tpu.pipeline_mode<synchronous>, transform_indices = @transform_2, window_bounds = array<i64: 32, 4>}, {pipeline_mode = #tpu.pipeline_mode<synchronous>, transform_indices = @transform_3, window_bounds = array<i64: 32, 1>}, {pipeline_mode = #tpu.pipeline_mode<synchronous>, transform_indices = @transform_4, window_bounds = array<i64: 12, 32, 96>}, {pipeline_mode = #tpu.pipeline_mode<synchronous>, transform_indices = @transform_5, window_bounds = array<i64: 12, 32, 3>}, {pipeline_mode = #tpu.pipeline_mode<synchronous>, transform_indices = @transform_6, window_bounds = array<i64: 1, 32>}, {pipeline_mode = #tpu.pipeline_mode<synchronous>, transform_indices = @transform_7, window_bounds = array<i64: 1, 1>}, {transform_indices = @transform_8, window_bounds = array<i64: 1, 256>}]} {
    %c0 = arith.constant 0 : index
    %c0_0 = arith.constant 0 : index
    %0 = vector.load %arg3[%c0, %c0_0] : memref<32x4xf32, #tpu.memory_space<vmem>>, vector<32x4xf32>
    %c0_1 = arith.constant 0 : index
    %c0_2 = arith.constant 0 : index
    %1 = vector.load %arg1[%c0_1, %c0_2] : memref<4x256xf32, #tpu.memory_space<vmem>>, vector<4x256xf32>
    %cst = arith.constant dense<0.000000e+00> : vector<32x256xf32>
    %2 = tpu.matmul %0, %1, %cst {dimension_numbers = #tpu.dot_dimension_numbers<[1], [0], [0], [1], [0, 0, 1, 1], [], []>} : vector<32x4xf32>, vector<4x256xf32>, vector<32x256xf32> -> vector<32x256xf32>
    %c0_3 = arith.constant 0 : index
    %c0_4 = arith.constant 0 : index
    %3 = vector.load %arg4[%c0_3, %c0_4] : memref<32x1xf32, #tpu.memory_space<vmem>>, vector<32x1xf32>
    %4 = vector.broadcast %3 : vector<32x1xf32> to vector<32x256xf32>
    %5 = arith.addf %2, %4 : vector<32x256xf32>
    %c0_5 = arith.constant 0 : index
    %c0_6 = arith.constant 0 : index
    %c0_7 = arith.constant 0 : index
    %6 = vector.load %arg2[%c0_5, %c0_6, %c0_7] : memref<6x2x256xf32, #tpu.memory_space<vmem>>, vector<1x2x256xf32>
    %7 = vector.shape_cast %6 : vector<1x2x256xf32> to vector<2x256xf32>
    %8 = vector.extract_strided_slice %7 {offsets = [0, 0], sizes = [1, 256], strides = [1, 1]} : vector<2x256xf32> to vector<1x256xf32>
    %9 = vector.extract_strided_slice %7 {offsets = [1, 0], sizes = [1, 256], strides = [1, 1]} : vector<2x256xf32> to vector<1x256xf32>
    %10 = arith.truncf %5 : vector<32x256xf32> to vector<32x256xbf16>
    %c32 = arith.constant 32 : index
    %c0_8 = arith.constant 0 : index
    %11 = vector.load %arg10[%c32, %c0_8] : memref<96x256xbf16, #tpu.memory_space<vmem>>, vector<32x256xbf16>
    tpu.vector_store %arg10[%c32, %c0_8], %10 {strides = array<i32>} : memref<96x256xbf16, #tpu.memory_space<vmem>>, vector<32x256xbf16>,
    %c4_i32 = arith.constant 4 : i32
    %12 = tpu.dynamic_rotate %5 by %c4_i32 dim 1 : vector<32x256xf32>, i32 -> vector<32x256xf32>
    %13 = vector.broadcast %8 : vector<1x256xf32> to vector<32x256xf32>
    %14 = arith.mulf %12, %13 : vector<32x256xf32>
    %15 = arith.truncf %14 : vector<32x256xf32> to vector<32x256xbf16>
    %c0_9 = arith.constant 0 : index
    %c0_10 = arith.constant 0 : index
    %16 = vector.load %arg10[%c0_9, %c0_10] : memref<96x256xbf16, #tpu.memory_space<vmem>>, vector<32x256xbf16>
    tpu.vector_store %arg10[%c0_9, %c0_10], %15 {strides = array<i32>} : memref<96x256xbf16, #tpu.memory_space<vmem>>, vector<32x256xbf16>,
    %c252_i32 = arith.constant 252 : i32
    %17 = tpu.dynamic_rotate %5 by %c252_i32 dim 1 : vector<32x256xf32>, i32 -> vector<32x256xf32>
    %18 = vector.broadcast %9 : vector<1x256xf32> to vector<32x256xf32>
    %19 = arith.mulf %17, %18 : vector<32x256xf32>
    %20 = arith.truncf %19 : vector<32x256xf32> to vector<32x256xbf16>
    %c64 = arith.constant 64 : index
    %c0_11 = arith.constant 0 : index
    %21 = vector.load %arg10[%c64, %c0_11] : memref<96x256xbf16, #tpu.memory_space<vmem>>, vector<32x256xbf16>
    tpu.vector_store %arg10[%c64, %c0_11], %20 {strides = array<i32>} : memref<96x256xbf16, #tpu.memory_space<vmem>>, vector<32x256xbf16>,
    %c0_12 = arith.constant 0 : index
    %c0_13 = arith.constant 0 : index
    %c0_14 = arith.constant 0 : index
    %22 = vector.load %arg6[%c0_12, %c0_13, %c0_14] : memref<12x32x3xf32, #tpu.memory_space<vmem>>, vector<1x32x3xf32>
    %23 = vector.shape_cast %22 : vector<1x32x3xf32> to vector<32x3xf32>
    %c0_15 = arith.constant 0 : index
    %c0_16 = arith.constant 0 : index
    %c0_17 = arith.constant 0 : index
    %24 = vector.load %arg5[%c0_15, %c0_16, %c0_17] : memref<12x32x96xbf16, #tpu.memory_space<vmem>>, vector<1x32x96xbf16>
    %25 = vector.shape_cast %24 : vector<1x32x96xbf16> to vector<32x96xbf16>
    %c0_18 = arith.constant 0 : index
    %c0_19 = arith.constant 0 : index
    %26 = vector.load %arg10[%c0_18, %c0_19] : memref<96x256xbf16, #tpu.memory_space<vmem>>, vector<96x256xbf16>
    %cst_20 = arith.constant dense<0.000000e+00> : vector<32x256xf32>
    %27 = tpu.matmul %25, %26, %cst_20 {dimension_numbers = #tpu.dot_dimension_numbers<[1], [0], [0], [1], [0, 0, 1, 1], [], []>} : vector<32x96xbf16>, vector<96x256xbf16>, vector<32x256xf32> -> vector<32x256xf32>
    %28 = vector.extract_strided_slice %23 {offsets = [0, 0], sizes = [32, 1], strides = [1, 1]} : vector<32x3xf32> to vector<32x1xf32>
    %29 = vector.broadcast %28 : vector<32x1xf32> to vector<32x256xf32>
    %30 = arith.addf %27, %29 : vector<32x256xf32>
    %cst_21 = arith.constant 0.000000e+00 : f32
    %31 = vector.broadcast %cst_21 : f32 to vector<32x256xf32>
    %32 = arith.maximumf %30, %31 : vector<32x256xf32>
    %cst_22 = arith.constant 0.000000e+00 : f32
    %33 = vector.broadcast %cst_22 : f32 to vector<32x256xf32>
    %34 = arith.minimumf %30, %33 : vector<32x256xf32>
    %35 = math.exp %34 : vector<32x256xf32>
    %36 = arith.addf %32, %35 : vector<32x256xf32>
    %cst_23 = arith.constant 1.000000e+00 : f32
    %37 = vector.broadcast %cst_23 : f32 to vector<32x256xf32>
    %38 = arith.subf %36, %37 : vector<32x256xf32>
    %39 = vector.extract_strided_slice %23 {offsets = [0, 1], sizes = [32, 1], strides = [1, 1]} : vector<32x3xf32> to vector<32x1xf32>
    %40 = vector.broadcast %39 : vector<32x1xf32> to vector<32x256xf32>
    %41 = arith.mulf %38, %40 : vector<32x256xf32>
    %42 = vector.extract_strided_slice %23 {offsets = [0, 2], sizes = [32, 1], strides = [1, 1]} : vector<32x3xf32> to vector<32x1xf32>
    %43 = vector.broadcast %42 : vector<32x1xf32> to vector<32x256xf32>
    %44 = arith.addf %41, %43 : vector<32x256xf32>
    %45 = arith.truncf %44 : vector<32x256xf32> to vector<32x256xbf16>
    %c32_24 = arith.constant 32 : index
    %c0_25 = arith.constant 0 : index
    %46 = vector.load %arg10[%c32_24, %c0_25] : memref<96x256xbf16, #tpu.memory_space<vmem>>, vector<32x256xbf16>
    tpu.vector_store %arg10[%c32_24, %c0_25], %45 {strides = array<i32>} : memref<96x256xbf16, #tpu.memory_space<vmem>>, vector<32x256xbf16>,
    %c4_i32_26 = arith.constant 4 : i32
    %47 = tpu.dynamic_rotate %44 by %c4_i32_26 dim 1 : vector<32x256xf32>, i32 -> vector<32x256xf32>
    %48 = vector.broadcast %8 : vector<1x256xf32> to vector<32x256xf32>
    %49 = arith.mulf %47, %48 : vector<32x256xf32>
    %50 = arith.truncf %49 : vector<32x256xf32> to vector<32x256xbf16>
    %c0_27 = arith.constant 0 : index
    %c0_28 = arith.constant 0 : index
    %51 = vector.load %arg10[%c0_27, %c0_28] : memref<96x256xbf16, #tpu.memory_space<vmem>>, vector<32x256xbf16>
    tpu.vector_store %arg10[%c0_27, %c0_28], %50 {strides = array<i32>} : memref<96x256xbf16, #tpu.memory_space<vmem>>, vector<32x256xbf16>,
    %c252_i32_29 = arith.constant 252 : i32
    %52 = tpu.dynamic_rotate %44 by %c252_i32_29 dim 1 : vector<32x256xf32>, i32 -> vector<32x256xf32>
    %53 = vector.broadcast %9 : vector<1x256xf32> to vector<32x256xf32>
    %54 = arith.mulf %52, %53 : vector<32x256xf32>
    %55 = arith.truncf %54 : vector<32x256xf32> to vector<32x256xbf16>
    %c64_30 = arith.constant 64 : index
    %c0_31 = arith.constant 0 : index
    %56 = vector.load %arg10[%c64_30, %c0_31] : memref<96x256xbf16, #tpu.memory_space<vmem>>, vector<32x256xbf16>
    tpu.vector_store %arg10[%c64_30, %c0_31], %55 {strides = array<i32>} : memref<96x256xbf16, #tpu.memory_space<vmem>>, vector<32x256xbf16>,
    %c1 = arith.constant 1 : index
    %c0_32 = arith.constant 0 : index
    %c0_33 = arith.constant 0 : index
    %57 = vector.load %arg6[%c1, %c0_32, %c0_33] : memref<12x32x3xf32, #tpu.memory_space<vmem>>, vector<1x32x3xf32>
    %58 = vector.shape_cast %57 : vector<1x32x3xf32> to vector<32x3xf32>
    %c1_34 = arith.constant 1 : index
    %c0_35 = arith.constant 0 : index
    %c0_36 = arith.constant 0 : index
    %59 = vector.load %arg5[%c1_34, %c0_35, %c0_36] : memref<12x32x96xbf16, #tpu.memory_space<vmem>>, vector<1x32x96xbf16>
    %60 = vector.shape_cast %59 : vector<1x32x96xbf16> to vector<32x96xbf16>
    %c0_37 = arith.constant 0 : index
    %c0_38 = arith.constant 0 : index
    %61 = vector.load %arg10[%c0_37, %c0_38] : memref<96x256xbf16, #tpu.memory_space<vmem>>, vector<96x256xbf16>
    %cst_39 = arith.constant dense<0.000000e+00> : vector<32x256xf32>
    %62 = tpu.matmul %60, %61, %cst_39 {dimension_numbers = #tpu.dot_dimension_numbers<[1], [0], [0], [1], [0, 0, 1, 1], [], []>} : vector<32x96xbf16>, vector<96x256xbf16>, vector<32x256xf32> -> vector<32x256xf32>
    %63 = vector.extract_strided_slice %58 {offsets = [0, 0], sizes = [32, 1], strides = [1, 1]} : vector<32x3xf32> to vector<32x1xf32>
    %64 = vector.broadcast %63 : vector<32x1xf32> to vector<32x256xf32>
    %65 = arith.addf %62, %64 : vector<32x256xf32>
    %cst_40 = arith.constant 0.000000e+00 : f32
    %66 = vector.broadcast %cst_40 : f32 to vector<32x256xf32>
    %67 = arith.maximumf %65, %66 : vector<32x256xf32>
    %cst_41 = arith.constant 0.000000e+00 : f32
    %68 = vector.broadcast %cst_41 : f32 to vector<32x256xf32>
    %69 = arith.minimumf %65, %68 : vector<32x256xf32>
    %70 = math.exp %69 : vector<32x256xf32>
    %71 = arith.addf %67, %70 : vector<32x256xf32>
    %cst_42 = arith.constant 1.000000e+00 : f32
    %72 = vector.broadcast %cst_42 : f32 to vector<32x256xf32>
    %73 = arith.subf %71, %72 : vector<32x256xf32>
    %74 = vector.extract_strided_slice %58 {offsets = [0, 1], sizes = [32, 1], strides = [1, 1]} : vector<32x3xf32> to vector<32x1xf32>
    %75 = vector.broadcast %74 : vector<32x1xf32> to vector<32x256xf32>
    %76 = arith.mulf %73, %75 : vector<32x256xf32>
    %77 = vector.extract_strided_slice %58 {offsets = [0, 2], sizes = [32, 1], strides = [1, 1]} : vector<32x3xf32> to vector<32x1xf32>
    %78 = vector.broadcast %77 : vector<32x1xf32> to vector<32x256xf32>
    %79 = arith.addf %76, %78 : vector<32x256xf32>
    %80 = arith.addf %79, %5 : vector<32x256xf32>
    %c1_43 = arith.constant 1 : index
    %c0_44 = arith.constant 0 : index
    %c0_45 = arith.constant 0 : index
    %81 = vector.load %arg2[%c1_43, %c0_44, %c0_45] : memref<6x2x256xf32, #tpu.memory_space<vmem>>, vector<1x2x256xf32>
    %82 = vector.shape_cast %81 : vector<1x2x256xf32> to vector<2x256xf32>
    %83 = vector.extract_strided_slice %82 {offsets = [0, 0], sizes = [1, 256], strides = [1, 1]} : vector<2x256xf32> to vector<1x256xf32>
    %84 = vector.extract_strided_slice %82 {offsets = [1, 0], sizes = [1, 256], strides = [1, 1]} : vector<2x256xf32> to vector<1x256xf32>
    %85 = arith.truncf %80 : vector<32x256xf32> to vector<32x256xbf16>
    %c32_46 = arith.constant 32 : index
    %c0_47 = arith.constant 0 : index
    %86 = vector.load %arg10[%c32_46, %c0_47] : memref<96x256xbf16, #tpu.memory_space<vmem>>, vector<32x256xbf16>
    tpu.vector_store %arg10[%c32_46, %c0_47], %85 {strides = array<i32>} : memref<96x256xbf16, #tpu.memory_space<vmem>>, vector<32x256xbf16>,
    %c32_i32 = arith.constant 32 : i32
    %87 = tpu.dynamic_rotate %80 by %c32_i32 dim 1 : vector<32x256xf32>, i32 -> vector<32x256xf32>
    %88 = vector.broadcast %83 : vector<1x256xf32> to vector<32x256xf32>
    %89 = arith.mulf %87, %88 : vector<32x256xf32>
    %90 = arith.truncf %89 : vector<32x256xf32> to vector<32x256xbf16>
    %c0_48 = arith.constant 0 : index
    %c0_49 = arith.constant 0 : index
    %91 = vector.load %arg10[%c0_48, %c0_49] : memref<96x256xbf16, #tpu.memory_space<vmem>>, vector<32x256xbf16>
    tpu.vector_store %arg10[%c0_48, %c0_49], %90 {strides = array<i32>} : memref<96x256xbf16, #tpu.memory_space<vmem>>, vector<32x256xbf16>,
    %c224_i32 = arith.constant 224 : i32
    %92 = tpu.dynamic_rotate %80 by %c224_i32 dim 1 : vector<32x256xf32>, i32 -> vector<32x256xf32>
    %93 = vector.broadcast %84 : vector<1x256xf32> to vector<32x256xf32>
    %94 = arith.mulf %92, %93 : vector<32x256xf32>
    %95 = arith.truncf %94 : vector<32x256xf32> to vector<32x256xbf16>
    %c64_50 = arith.constant 64 : index
    %c0_51 = arith.constant 0 : index
    %96 = vector.load %arg10[%c64_50, %c0_51] : memref<96x256xbf16, #tpu.memory_space<vmem>>, vector<32x256xbf16>
    tpu.vector_store %arg10[%c64_50, %c0_51], %95 {strides = array<i32>} : memref<96x256xbf16, #tpu.memory_space<vmem>>, vector<32x256xbf16>,
    %c2 = arith.constant 2 : index
    %c0_52 = arith.constant 0 : index
    %c0_53 = arith.constant 0 : index
    %97 = vector.load %arg6[%c2, %c0_52, %c0_53] : memref<12x32x3xf32, #tpu.memory_space<vmem>>, vector<1x32x3xf32>
    %98 = vector.shape_cast %97 : vector<1x32x3xf32> to vector<32x3xf32>
    %c2_54 = arith.constant 2 : index
    %c0_55 = arith.constant 0 : index
    %c0_56 = arith.constant 0 : index
    %99 = vector.load %arg5[%c2_54, %c0_55, %c0_56] : memref<12x32x96xbf16, #tpu.memory_space<vmem>>, vector<1x32x96xbf16>
    %100 = vector.shape_cast %99 : vector<1x32x96xbf16> to vector<32x96xbf16>
    %c0_57 = arith.constant 0 : index
    %c0_58 = arith.constant 0 : index
    %101 = vector.load %arg10[%c0_57, %c0_58] : memref<96x256xbf16, #tpu.memory_space<vmem>>, vector<96x256xbf16>
    %cst_59 = arith.constant dense<0.000000e+00> : vector<32x256xf32>
    %102 = tpu.matmul %100, %101, %cst_59 {dimension_numbers = #tpu.dot_dimension_numbers<[1], [0], [0], [1], [0, 0, 1, 1], [], []>} : vector<32x96xbf16>, vector<96x256xbf16>, vector<32x256xf32> -> vector<32x256xf32>
    %103 = vector.extract_strided_slice %98 {offsets = [0, 0], sizes = [32, 1], strides = [1, 1]} : vector<32x3xf32> to vector<32x1xf32>
    %104 = vector.broadcast %103 : vector<32x1xf32> to vector<32x256xf32>
    %105 = arith.addf %102, %104 : vector<32x256xf32>
    %cst_60 = arith.constant 0.000000e+00 : f32
    %106 = vector.broadcast %cst_60 : f32 to vector<32x256xf32>
    %107 = arith.maximumf %105, %106 : vector<32x256xf32>
    %cst_61 = arith.constant 0.000000e+00 : f32
    %108 = vector.broadcast %cst_61 : f32 to vector<32x256xf32>
    %109 = arith.minimumf %105, %108 : vector<32x256xf32>
    %110 = math.exp %109 : vector<32x256xf32>
    %111 = arith.addf %107, %110 : vector<32x256xf32>
    %cst_62 = arith.constant 1.000000e+00 : f32
    %112 = vector.broadcast %cst_62 : f32 to vector<32x256xf32>
    %113 = arith.subf %111, %112 : vector<32x256xf32>
    %114 = vector.extract_strided_slice %98 {offsets = [0, 1], sizes = [32, 1], strides = [1, 1]} : vector<32x3xf32> to vector<32x1xf32>
    %115 = vector.broadcast %114 : vector<32x1xf32> to vector<32x256xf32>
    %116 = arith.mulf %113, %115 : vector<32x256xf32>
    %117 = vector.extract_strided_slice %98 {offsets = [0, 2], sizes = [32, 1], strides = [1, 1]} : vector<32x3xf32> to vector<32x1xf32>
    %118 = vector.broadcast %117 : vector<32x1xf32> to vector<32x256xf32>
    %119 = arith.addf %116, %118 : vector<32x256xf32>
    %120 = arith.truncf %119 : vector<32x256xf32> to vector<32x256xbf16>
    %c32_63 = arith.constant 32 : index
    %c0_64 = arith.constant 0 : index
    %121 = vector.load %arg10[%c32_63, %c0_64] : memref<96x256xbf16, #tpu.memory_space<vmem>>, vector<32x256xbf16>
    tpu.vector_store %arg10[%c32_63, %c0_64], %120 {strides = array<i32>} : memref<96x256xbf16, #tpu.memory_space<vmem>>, vector<32x256xbf16>,
    %c32_i32_65 = arith.constant 32 : i32
    %122 = tpu.dynamic_rotate %119 by %c32_i32_65 dim 1 : vector<32x256xf32>, i32 -> vector<32x256xf32>
    %123 = vector.broadcast %83 : vector<1x256xf32> to vector<32x256xf32>
    %124 = arith.mulf %122, %123 : vector<32x256xf32>
    %125 = arith.truncf %124 : vector<32x256xf32> to vector<32x256xbf16>
    %c0_66 = arith.constant 0 : index
    %c0_67 = arith.constant 0 : index
    %126 = vector.load %arg10[%c0_66, %c0_67] : memref<96x256xbf16, #tpu.memory_space<vmem>>, vector<32x256xbf16>
    tpu.vector_store %arg10[%c0_66, %c0_67], %125 {strides = array<i32>} : memref<96x256xbf16, #tpu.memory_space<vmem>>, vector<32x256xbf16>,
    %c224_i32_68 = arith.constant 224 : i32
    %127 = tpu.dynamic_rotate %119 by %c224_i32_68 dim 1 : vector<32x256xf32>, i32 -> vector<32x256xf32>
    %128 = vector.broadcast %84 : vector<1x256xf32> to vector<32x256xf32>
    %129 = arith.mulf %127, %128 : vector<32x256xf32>
    %130 = arith.truncf %129 : vector<32x256xf32> to vector<32x256xbf16>
    %c64_69 = arith.constant 64 : index
    %c0_70 = arith.constant 0 : index
    %131 = vector.load %arg10[%c64_69, %c0_70] : memref<96x256xbf16, #tpu.memory_space<vmem>>, vector<32x256xbf16>
    tpu.vector_store %arg10[%c64_69, %c0_70], %130 {strides = array<i32>} : memref<96x256xbf16, #tpu.memory_space<vmem>>, vector<32x256xbf16>,
    %c3 = arith.constant 3 : index
    %c0_71 = arith.constant 0 : index
    %c0_72 = arith.constant 0 : index
    %132 = vector.load %arg6[%c3, %c0_71, %c0_72] : memref<12x32x3xf32, #tpu.memory_space<vmem>>, vector<1x32x3xf32>
    %133 = vector.shape_cast %132 : vector<1x32x3xf32> to vector<32x3xf32>
    %c3_73 = arith.constant 3 : index
    %c0_74 = arith.constant 0 : index
    %c0_75 = arith.constant 0 : index
    %134 = vector.load %arg5[%c3_73, %c0_74, %c0_75] : memref<12x32x96xbf16, #tpu.memory_space<vmem>>, vector<1x32x96xbf16>
    %135 = vector.shape_cast %134 : vector<1x32x96xbf16> to vector<32x96xbf16>
    %c0_76 = arith.constant 0 : index
    %c0_77 = arith.constant 0 : index
    %136 = vector.load %arg10[%c0_76, %c0_77] : memref<96x256xbf16, #tpu.memory_space<vmem>>, vector<96x256xbf16>
    %cst_78 = arith.constant dense<0.000000e+00> : vector<32x256xf32>
    %137 = tpu.matmul %135, %136, %cst_78 {dimension_numbers = #tpu.dot_dimension_numbers<[1], [0], [0], [1], [0, 0, 1, 1], [], []>} : vector<32x96xbf16>, vector<96x256xbf16>, vector<32x256xf32> -> vector<32x256xf32>
    %138 = vector.extract_strided_slice %133 {offsets = [0, 0], sizes = [32, 1], strides = [1, 1]} : vector<32x3xf32> to vector<32x1xf32>
    %139 = vector.broadcast %138 : vector<32x1xf32> to vector<32x256xf32>
    %140 = arith.addf %137, %139 : vector<32x256xf32>
    %cst_79 = arith.constant 0.000000e+00 : f32
    %141 = vector.broadcast %cst_79 : f32 to vector<32x256xf32>
    %142 = arith.maximumf %140, %141 : vector<32x256xf32>
    %cst_80 = arith.constant 0.000000e+00 : f32
    %143 = vector.broadcast %cst_80 : f32 to vector<32x256xf32>
    %144 = arith.minimumf %140, %143 : vector<32x256xf32>
    %145 = math.exp %144 : vector<32x256xf32>
    %146 = arith.addf %142, %145 : vector<32x256xf32>
    %cst_81 = arith.constant 1.000000e+00 : f32
    %147 = vector.broadcast %cst_81 : f32 to vector<32x256xf32>
    %148 = arith.subf %146, %147 : vector<32x256xf32>
    %149 = vector.extract_strided_slice %133 {offsets = [0, 1], sizes = [32, 1], strides = [1, 1]} : vector<32x3xf32> to vector<32x1xf32>
    %150 = vector.broadcast %149 : vector<32x1xf32> to vector<32x256xf32>
    %151 = arith.mulf %148, %150 : vector<32x256xf32>
    %152 = vector.extract_strided_slice %133 {offsets = [0, 2], sizes = [32, 1], strides = [1, 1]} : vector<32x3xf32> to vector<32x1xf32>
    %153 = vector.broadcast %152 : vector<32x1xf32> to vector<32x256xf32>
    %154 = arith.addf %151, %153 : vector<32x256xf32>
    %155 = arith.addf %154, %80 : vector<32x256xf32>
    %c2_82 = arith.constant 2 : index
    %c0_83 = arith.constant 0 : index
    %c0_84 = arith.constant 0 : index
    %156 = vector.load %arg2[%c2_82, %c0_83, %c0_84] : memref<6x2x256xf32, #tpu.memory_space<vmem>>, vector<1x2x256xf32>
    %157 = vector.shape_cast %156 : vector<1x2x256xf32> to vector<2x256xf32>
    %158 = vector.extract_strided_slice %157 {offsets = [0, 0], sizes = [1, 256], strides = [1, 1]} : vector<2x256xf32> to vector<1x256xf32>
    %159 = vector.extract_strided_slice %157 {offsets = [1, 0], sizes = [1, 256], strides = [1, 1]} : vector<2x256xf32> to vector<1x256xf32>
    %160 = arith.truncf %155 : vector<32x256xf32> to vector<32x256xbf16>
    %c32_85 = arith.constant 32 : index
    %c0_86 = arith.constant 0 : index
    %161 = vector.load %arg10[%c32_85, %c0_86] : memref<96x256xbf16, #tpu.memory_space<vmem>>, vector<32x256xbf16>
    tpu.vector_store %arg10[%c32_85, %c0_86], %160 {strides = array<i32>} : memref<96x256xbf16, #tpu.memory_space<vmem>>, vector<32x256xbf16>,
    %c64_i32 = arith.constant 64 : i32
    %162 = tpu.dynamic_rotate %155 by %c64_i32 dim 1 : vector<32x256xf32>, i32 -> vector<32x256xf32>
    %163 = vector.broadcast %158 : vector<1x256xf32> to vector<32x256xf32>
    %164 = arith.mulf %162, %163 : vector<32x256xf32>
    %165 = arith.truncf %164 : vector<32x256xf32> to vector<32x256xbf16>
    %c0_87 = arith.constant 0 : index
    %c0_88 = arith.constant 0 : index
    %166 = vector.load %arg10[%c0_87, %c0_88] : memref<96x256xbf16, #tpu.memory_space<vmem>>, vector<32x256xbf16>
    tpu.vector_store %arg10[%c0_87, %c0_88], %165 {strides = array<i32>} : memref<96x256xbf16, #tpu.memory_space<vmem>>, vector<32x256xbf16>,
    %c192_i32 = arith.constant 192 : i32
    %167 = tpu.dynamic_rotate %155 by %c192_i32 dim 1 : vector<32x256xf32>, i32 -> vector<32x256xf32>
    %168 = vector.broadcast %159 : vector<1x256xf32> to vector<32x256xf32>
    %169 = arith.mulf %167, %168 : vector<32x256xf32>
    %170 = arith.truncf %169 : vector<32x256xf32> to vector<32x256xbf16>
    %c64_89 = arith.constant 64 : index
    %c0_90 = arith.constant 0 : index
    %171 = vector.load %arg10[%c64_89, %c0_90] : memref<96x256xbf16, #tpu.memory_space<vmem>>, vector<32x256xbf16>
    tpu.vector_store %arg10[%c64_89, %c0_90], %170 {strides = array<i32>} : memref<96x256xbf16, #tpu.memory_space<vmem>>, vector<32x256xbf16>,
    %c4 = arith.constant 4 : index
    %c0_91 = arith.constant 0 : index
    %c0_92 = arith.constant 0 : index
    %172 = vector.load %arg6[%c4, %c0_91, %c0_92] : memref<12x32x3xf32, #tpu.memory_space<vmem>>, vector<1x32x3xf32>
    %173 = vector.shape_cast %172 : vector<1x32x3xf32> to vector<32x3xf32>
    %c4_93 = arith.constant 4 : index
    %c0_94 = arith.constant 0 : index
    %c0_95 = arith.constant 0 : index
    %174 = vector.load %arg5[%c4_93, %c0_94, %c0_95] : memref<12x32x96xbf16, #tpu.memory_space<vmem>>, vector<1x32x96xbf16>
    %175 = vector.shape_cast %174 : vector<1x32x96xbf16> to vector<32x96xbf16>
    %c0_96 = arith.constant 0 : index
    %c0_97 = arith.constant 0 : index
    %176 = vector.load %arg10[%c0_96, %c0_97] : memref<96x256xbf16, #tpu.memory_space<vmem>>, vector<96x256xbf16>
    %cst_98 = arith.constant dense<0.000000e+00> : vector<32x256xf32>
    %177 = tpu.matmul %175, %176, %cst_98 {dimension_numbers = #tpu.dot_dimension_numbers<[1], [0], [0], [1], [0, 0, 1, 1], [], []>} : vector<32x96xbf16>, vector<96x256xbf16>, vector<32x256xf32> -> vector<32x256xf32>
    %178 = vector.extract_strided_slice %173 {offsets = [0, 0], sizes = [32, 1], strides = [1, 1]} : vector<32x3xf32> to vector<32x1xf32>
    %179 = vector.broadcast %178 : vector<32x1xf32> to vector<32x256xf32>
    %180 = arith.addf %177, %179 : vector<32x256xf32>
    %cst_99 = arith.constant 0.000000e+00 : f32
    %181 = vector.broadcast %cst_99 : f32 to vector<32x256xf32>
    %182 = arith.maximumf %180, %181 : vector<32x256xf32>
    %cst_100 = arith.constant 0.000000e+00 : f32
    %183 = vector.broadcast %cst_100 : f32 to vector<32x256xf32>
    %184 = arith.minimumf %180, %183 : vector<32x256xf32>
    %185 = math.exp %184 : vector<32x256xf32>
    %186 = arith.addf %182, %185 : vector<32x256xf32>
    %cst_101 = arith.constant 1.000000e+00 : f32
    %187 = vector.broadcast %cst_101 : f32 to vector<32x256xf32>
    %188 = arith.subf %186, %187 : vector<32x256xf32>
    %189 = vector.extract_strided_slice %173 {offsets = [0, 1], sizes = [32, 1], strides = [1, 1]} : vector<32x3xf32> to vector<32x1xf32>
    %190 = vector.broadcast %189 : vector<32x1xf32> to vector<32x256xf32>
    %191 = arith.mulf %188, %190 : vector<32x256xf32>
    %192 = vector.extract_strided_slice %173 {offsets = [0, 2], sizes = [32, 1], strides = [1, 1]} : vector<32x3xf32> to vector<32x1xf32>
    %193 = vector.broadcast %192 : vector<32x1xf32> to vector<32x256xf32>
    %194 = arith.addf %191, %193 : vector<32x256xf32>
    %195 = arith.truncf %194 : vector<32x256xf32> to vector<32x256xbf16>
    %c32_102 = arith.constant 32 : index
    %c0_103 = arith.constant 0 : index
    %196 = vector.load %arg10[%c32_102, %c0_103] : memref<96x256xbf16, #tpu.memory_space<vmem>>, vector<32x256xbf16>
    tpu.vector_store %arg10[%c32_102, %c0_103], %195 {strides = array<i32>} : memref<96x256xbf16, #tpu.memory_space<vmem>>, vector<32x256xbf16>,
    %c64_i32_104 = arith.constant 64 : i32
    %197 = tpu.dynamic_rotate %194 by %c64_i32_104 dim 1 : vector<32x256xf32>, i32 -> vector<32x256xf32>
    %198 = vector.broadcast %158 : vector<1x256xf32> to vector<32x256xf32>
    %199 = arith.mulf %197, %198 : vector<32x256xf32>
    %200 = arith.truncf %199 : vector<32x256xf32> to vector<32x256xbf16>
    %c0_105 = arith.constant 0 : index
    %c0_106 = arith.constant 0 : index
    %201 = vector.load %arg10[%c0_105, %c0_106] : memref<96x256xbf16, #tpu.memory_space<vmem>>, vector<32x256xbf16>
    tpu.vector_store %arg10[%c0_105, %c0_106], %200 {strides = array<i32>} : memref<96x256xbf16, #tpu.memory_space<vmem>>, vector<32x256xbf16>,
    %c192_i32_107 = arith.constant 192 : i32
    %202 = tpu.dynamic_rotate %194 by %c192_i32_107 dim 1 : vector<32x256xf32>, i32 -> vector<32x256xf32>
    %203 = vector.broadcast %159 : vector<1x256xf32> to vector<32x256xf32>
    %204 = arith.mulf %202, %203 : vector<32x256xf32>
    %205 = arith.truncf %204 : vector<32x256xf32> to vector<32x256xbf16>
    %c64_108 = arith.constant 64 : index
    %c0_109 = arith.constant 0 : index
    %206 = vector.load %arg10[%c64_108, %c0_109] : memref<96x256xbf16, #tpu.memory_space<vmem>>, vector<32x256xbf16>
    tpu.vector_store %arg10[%c64_108, %c0_109], %205 {strides = array<i32>} : memref<96x256xbf16, #tpu.memory_space<vmem>>, vector<32x256xbf16>,
    %c5 = arith.constant 5 : index
    %c0_110 = arith.constant 0 : index
    %c0_111 = arith.constant 0 : index
    %207 = vector.load %arg6[%c5, %c0_110, %c0_111] : memref<12x32x3xf32, #tpu.memory_space<vmem>>, vector<1x32x3xf32>
    %208 = vector.shape_cast %207 : vector<1x32x3xf32> to vector<32x3xf32>
    %c5_112 = arith.constant 5 : index
    %c0_113 = arith.constant 0 : index
    %c0_114 = arith.constant 0 : index
    %209 = vector.load %arg5[%c5_112, %c0_113, %c0_114] : memref<12x32x96xbf16, #tpu.memory_space<vmem>>, vector<1x32x96xbf16>
    %210 = vector.shape_cast %209 : vector<1x32x96xbf16> to vector<32x96xbf16>
    %c0_115 = arith.constant 0 : index
    %c0_116 = arith.constant 0 : index
    %211 = vector.load %arg10[%c0_115, %c0_116] : memref<96x256xbf16, #tpu.memory_space<vmem>>, vector<96x256xbf16>
    %cst_117 = arith.constant dense<0.000000e+00> : vector<32x256xf32>
    %212 = tpu.matmul %210, %211, %cst_117 {dimension_numbers = #tpu.dot_dimension_numbers<[1], [0], [0], [1], [0, 0, 1, 1], [], []>} : vector<32x96xbf16>, vector<96x256xbf16>, vector<32x256xf32> -> vector<32x256xf32>
    %213 = vector.extract_strided_slice %208 {offsets = [0, 0], sizes = [32, 1], strides = [1, 1]} : vector<32x3xf32> to vector<32x1xf32>
    %214 = vector.broadcast %213 : vector<32x1xf32> to vector<32x256xf32>
    %215 = arith.addf %212, %214 : vector<32x256xf32>
    %cst_118 = arith.constant 0.000000e+00 : f32
    %216 = vector.broadcast %cst_118 : f32 to vector<32x256xf32>
    %217 = arith.maximumf %215, %216 : vector<32x256xf32>
    %cst_119 = arith.constant 0.000000e+00 : f32
    %218 = vector.broadcast %cst_119 : f32 to vector<32x256xf32>
    %219 = arith.minimumf %215, %218 : vector<32x256xf32>
    %220 = math.exp %219 : vector<32x256xf32>
    %221 = arith.addf %217, %220 : vector<32x256xf32>
    %cst_120 = arith.constant 1.000000e+00 : f32
    %222 = vector.broadcast %cst_120 : f32 to vector<32x256xf32>
    %223 = arith.subf %221, %222 : vector<32x256xf32>
    %224 = vector.extract_strided_slice %208 {offsets = [0, 1], sizes = [32, 1], strides = [1, 1]} : vector<32x3xf32> to vector<32x1xf32>
    %225 = vector.broadcast %224 : vector<32x1xf32> to vector<32x256xf32>
    %226 = arith.mulf %223, %225 : vector<32x256xf32>
    %227 = vector.extract_strided_slice %208 {offsets = [0, 2], sizes = [32, 1], strides = [1, 1]} : vector<32x3xf32> to vector<32x1xf32>
    %228 = vector.broadcast %227 : vector<32x1xf32> to vector<32x256xf32>
    %229 = arith.addf %226, %228 : vector<32x256xf32>
    %230 = arith.addf %229, %155 : vector<32x256xf32>
    %c3_121 = arith.constant 3 : index
    %c0_122 = arith.constant 0 : index
    %c0_123 = arith.constant 0 : index
    %231 = vector.load %arg2[%c3_121, %c0_122, %c0_123] : memref<6x2x256xf32, #tpu.memory_space<vmem>>, vector<1x2x256xf32>
    %232 = vector.shape_cast %231 : vector<1x2x256xf32> to vector<2x256xf32>
    %233 = vector.extract_strided_slice %232 {offsets = [0, 0], sizes = [1, 256], strides = [1, 1]} : vector<2x256xf32> to vector<1x256xf32>
    %234 = vector.extract_strided_slice %232 {offsets = [1, 0], sizes = [1, 256], strides = [1, 1]} : vector<2x256xf32> to vector<1x256xf32>
    %235 = arith.truncf %230 : vector<32x256xf32> to vector<32x256xbf16>
    %c32_124 = arith.constant 32 : index
    %c0_125 = arith.constant 0 : index
    %236 = vector.load %arg10[%c32_124, %c0_125] : memref<96x256xbf16, #tpu.memory_space<vmem>>, vector<32x256xbf16>
    tpu.vector_store %arg10[%c32_124, %c0_125], %235 {strides = array<i32>} : memref<96x256xbf16, #tpu.memory_space<vmem>>, vector<32x256xbf16>,
    %c128_i32 = arith.constant 128 : i32
    %237 = tpu.dynamic_rotate %230 by %c128_i32 dim 1 : vector<32x256xf32>, i32 -> vector<32x256xf32>
    %238 = vector.broadcast %233 : vector<1x256xf32> to vector<32x256xf32>
    %239 = arith.mulf %237, %238 : vector<32x256xf32>
    %240 = arith.truncf %239 : vector<32x256xf32> to vector<32x256xbf16>
    %c0_126 = arith.constant 0 : index
    %c0_127 = arith.constant 0 : index
    %241 = vector.load %arg10[%c0_126, %c0_127] : memref<96x256xbf16, #tpu.memory_space<vmem>>, vector<32x256xbf16>
    tpu.vector_store %arg10[%c0_126, %c0_127], %240 {strides = array<i32>} : memref<96x256xbf16, #tpu.memory_space<vmem>>, vector<32x256xbf16>,
    %c128_i32_128 = arith.constant 128 : i32
    %242 = tpu.dynamic_rotate %230 by %c128_i32_128 dim 1 : vector<32x256xf32>, i32 -> vector<32x256xf32>
    %243 = vector.broadcast %234 : vector<1x256xf32> to vector<32x256xf32>
    %244 = arith.mulf %242, %243 : vector<32x256xf32>
    %245 = arith.truncf %244 : vector<32x256xf32> to vector<32x256xbf16>
    %c64_129 = arith.constant 64 : index
    %c0_130 = arith.constant 0 : index
    %246 = vector.load %arg10[%c64_129, %c0_130] : memref<96x256xbf16, #tpu.memory_space<vmem>>, vector<32x256xbf16>
    tpu.vector_store %arg10[%c64_129, %c0_130], %245 {strides = array<i32>} : memref<96x256xbf16, #tpu.memory_space<vmem>>, vector<32x256xbf16>,
    %c6 = arith.constant 6 : index
    %c0_131 = arith.constant 0 : index
    %c0_132 = arith.constant 0 : index
    %247 = vector.load %arg6[%c6, %c0_131, %c0_132] : memref<12x32x3xf32, #tpu.memory_space<vmem>>, vector<1x32x3xf32>
    %248 = vector.shape_cast %247 : vector<1x32x3xf32> to vector<32x3xf32>
    %c6_133 = arith.constant 6 : index
    %c0_134 = arith.constant 0 : index
    %c0_135 = arith.constant 0 : index
    %249 = vector.load %arg5[%c6_133, %c0_134, %c0_135] : memref<12x32x96xbf16, #tpu.memory_space<vmem>>, vector<1x32x96xbf16>
    %250 = vector.shape_cast %249 : vector<1x32x96xbf16> to vector<32x96xbf16>
    %c0_136 = arith.constant 0 : index
    %c0_137 = arith.constant 0 : index
    %251 = vector.load %arg10[%c0_136, %c0_137] : memref<96x256xbf16, #tpu.memory_space<vmem>>, vector<96x256xbf16>
    %cst_138 = arith.constant dense<0.000000e+00> : vector<32x256xf32>
    %252 = tpu.matmul %250, %251, %cst_138 {dimension_numbers = #tpu.dot_dimension_numbers<[1], [0], [0], [1], [0, 0, 1, 1], [], []>} : vector<32x96xbf16>, vector<96x256xbf16>, vector<32x256xf32> -> vector<32x256xf32>
    %253 = vector.extract_strided_slice %248 {offsets = [0, 0], sizes = [32, 1], strides = [1, 1]} : vector<32x3xf32> to vector<32x1xf32>
    %254 = vector.broadcast %253 : vector<32x1xf32> to vector<32x256xf32>
    %255 = arith.addf %252, %254 : vector<32x256xf32>
    %cst_139 = arith.constant 0.000000e+00 : f32
    %256 = vector.broadcast %cst_139 : f32 to vector<32x256xf32>
    %257 = arith.maximumf %255, %256 : vector<32x256xf32>
    %cst_140 = arith.constant 0.000000e+00 : f32
    %258 = vector.broadcast %cst_140 : f32 to vector<32x256xf32>
    %259 = arith.minimumf %255, %258 : vector<32x256xf32>
    %260 = math.exp %259 : vector<32x256xf32>
    %261 = arith.addf %257, %260 : vector<32x256xf32>
    %cst_141 = arith.constant 1.000000e+00 : f32
    %262 = vector.broadcast %cst_141 : f32 to vector<32x256xf32>
    %263 = arith.subf %261, %262 : vector<32x256xf32>
    %264 = vector.extract_strided_slice %248 {offsets = [0, 1], sizes = [32, 1], strides = [1, 1]} : vector<32x3xf32> to vector<32x1xf32>
    %265 = vector.broadcast %264 : vector<32x1xf32> to vector<32x256xf32>
    %266 = arith.mulf %263, %265 : vector<32x256xf32>
    %267 = vector.extract_strided_slice %248 {offsets = [0, 2], sizes = [32, 1], strides = [1, 1]} : vector<32x3xf32> to vector<32x1xf32>
    %268 = vector.broadcast %267 : vector<32x1xf32> to vector<32x256xf32>
    %269 = arith.addf %266, %268 : vector<32x256xf32>
    %270 = arith.truncf %269 : vector<32x256xf32> to vector<32x256xbf16>
    %c32_142 = arith.constant 32 : index
    %c0_143 = arith.constant 0 : index
    %271 = vector.load %arg10[%c32_142, %c0_143] : memref<96x256xbf16, #tpu.memory_space<vmem>>, vector<32x256xbf16>
    tpu.vector_store %arg10[%c32_142, %c0_143], %270 {strides = array<i32>} : memref<96x256xbf16, #tpu.memory_space<vmem>>, vector<32x256xbf16>,
    %c128_i32_144 = arith.constant 128 : i32
    %272 = tpu.dynamic_rotate %269 by %c128_i32_144 dim 1 : vector<32x256xf32>, i32 -> vector<32x256xf32>
    %273 = vector.broadcast %233 : vector<1x256xf32> to vector<32x256xf32>
    %274 = arith.mulf %272, %273 : vector<32x256xf32>
    %275 = arith.truncf %274 : vector<32x256xf32> to vector<32x256xbf16>
    %c0_145 = arith.constant 0 : index
    %c0_146 = arith.constant 0 : index
    %276 = vector.load %arg10[%c0_145, %c0_146] : memref<96x256xbf16, #tpu.memory_space<vmem>>, vector<32x256xbf16>
    tpu.vector_store %arg10[%c0_145, %c0_146], %275 {strides = array<i32>} : memref<96x256xbf16, #tpu.memory_space<vmem>>, vector<32x256xbf16>,
    %c128_i32_147 = arith.constant 128 : i32
    %277 = tpu.dynamic_rotate %269 by %c128_i32_147 dim 1 : vector<32x256xf32>, i32 -> vector<32x256xf32>
    %278 = vector.broadcast %234 : vector<1x256xf32> to vector<32x256xf32>
    %279 = arith.mulf %277, %278 : vector<32x256xf32>
    %280 = arith.truncf %279 : vector<32x256xf32> to vector<32x256xbf16>
    %c64_148 = arith.constant 64 : index
    %c0_149 = arith.constant 0 : index
    %281 = vector.load %arg10[%c64_148, %c0_149] : memref<96x256xbf16, #tpu.memory_space<vmem>>, vector<32x256xbf16>
    tpu.vector_store %arg10[%c64_148, %c0_149], %280 {strides = array<i32>} : memref<96x256xbf16, #tpu.memory_space<vmem>>, vector<32x256xbf16>,
    %c7 = arith.constant 7 : index
    %c0_150 = arith.constant 0 : index
    %c0_151 = arith.constant 0 : index
    %282 = vector.load %arg6[%c7, %c0_150, %c0_151] : memref<12x32x3xf32, #tpu.memory_space<vmem>>, vector<1x32x3xf32>
    %283 = vector.shape_cast %282 : vector<1x32x3xf32> to vector<32x3xf32>
    %c7_152 = arith.constant 7 : index
    %c0_153 = arith.constant 0 : index
    %c0_154 = arith.constant 0 : index
    %284 = vector.load %arg5[%c7_152, %c0_153, %c0_154] : memref<12x32x96xbf16, #tpu.memory_space<vmem>>, vector<1x32x96xbf16>
    %285 = vector.shape_cast %284 : vector<1x32x96xbf16> to vector<32x96xbf16>
    %c0_155 = arith.constant 0 : index
    %c0_156 = arith.constant 0 : index
    %286 = vector.load %arg10[%c0_155, %c0_156] : memref<96x256xbf16, #tpu.memory_space<vmem>>, vector<96x256xbf16>
    %cst_157 = arith.constant dense<0.000000e+00> : vector<32x256xf32>
    %287 = tpu.matmul %285, %286, %cst_157 {dimension_numbers = #tpu.dot_dimension_numbers<[1], [0], [0], [1], [0, 0, 1, 1], [], []>} : vector<32x96xbf16>, vector<96x256xbf16>, vector<32x256xf32> -> vector<32x256xf32>
    %288 = vector.extract_strided_slice %283 {offsets = [0, 0], sizes = [32, 1], strides = [1, 1]} : vector<32x3xf32> to vector<32x1xf32>
    %289 = vector.broadcast %288 : vector<32x1xf32> to vector<32x256xf32>
    %290 = arith.addf %287, %289 : vector<32x256xf32>
    %cst_158 = arith.constant 0.000000e+00 : f32
    %291 = vector.broadcast %cst_158 : f32 to vector<32x256xf32>
    %292 = arith.maximumf %290, %291 : vector<32x256xf32>
    %cst_159 = arith.constant 0.000000e+00 : f32
    %293 = vector.broadcast %cst_159 : f32 to vector<32x256xf32>
    %294 = arith.minimumf %290, %293 : vector<32x256xf32>
    %295 = math.exp %294 : vector<32x256xf32>
    %296 = arith.addf %292, %295 : vector<32x256xf32>
    %cst_160 = arith.constant 1.000000e+00 : f32
    %297 = vector.broadcast %cst_160 : f32 to vector<32x256xf32>
    %298 = arith.subf %296, %297 : vector<32x256xf32>
    %299 = vector.extract_strided_slice %283 {offsets = [0, 1], sizes = [32, 1], strides = [1, 1]} : vector<32x3xf32> to vector<32x1xf32>
    %300 = vector.broadcast %299 : vector<32x1xf32> to vector<32x256xf32>
    %301 = arith.mulf %298, %300 : vector<32x256xf32>
    %302 = vector.extract_strided_slice %283 {offsets = [0, 2], sizes = [32, 1], strides = [1, 1]} : vector<32x3xf32> to vector<32x1xf32>
    %303 = vector.broadcast %302 : vector<32x1xf32> to vector<32x256xf32>
    %304 = arith.addf %301, %303 : vector<32x256xf32>
    %305 = arith.addf %304, %230 : vector<32x256xf32>
    %cst_161 = arith.constant 0.000000e+00 : bf16
    %306 = vector.broadcast %cst_161 : bf16 to vector<32x256xbf16>
    %c0_162 = arith.constant 0 : index
    %c0_163 = arith.constant 0 : index
    %307 = vector.load %arg10[%c0_162, %c0_163] : memref<96x256xbf16, #tpu.memory_space<vmem>>, vector<32x256xbf16>
    tpu.vector_store %arg10[%c0_162, %c0_163], %306 {strides = array<i32>} : memref<96x256xbf16, #tpu.memory_space<vmem>>, vector<32x256xbf16>,
    %c64_164 = arith.constant 64 : index
    %c0_165 = arith.constant 0 : index
    %308 = vector.load %arg10[%c64_164, %c0_165] : memref<96x256xbf16, #tpu.memory_space<vmem>>, vector<32x256xbf16>
    tpu.vector_store %arg10[%c64_164, %c0_165], %306 {strides = array<i32>} : memref<96x256xbf16, #tpu.memory_space<vmem>>, vector<32x256xbf16>,
    %309 = arith.truncf %305 : vector<32x256xf32> to vector<32x256xbf16>
    %c32_166 = arith.constant 32 : index
    %c0_167 = arith.constant 0 : index
    %310 = vector.load %arg10[%c32_166, %c0_167] : memref<96x256xbf16, #tpu.memory_space<vmem>>, vector<32x256xbf16>
    tpu.vector_store %arg10[%c32_166, %c0_167], %309 {strides = array<i32>} : memref<96x256xbf16, #tpu.memory_space<vmem>>, vector<32x256xbf16>,
    %c8 = arith.constant 8 : index
    %c0_168 = arith.constant 0 : index
    %c0_169 = arith.constant 0 : index
    %311 = vector.load %arg6[%c8, %c0_168, %c0_169] : memref<12x32x3xf32, #tpu.memory_space<vmem>>, vector<1x32x3xf32>
    %312 = vector.shape_cast %311 : vector<1x32x3xf32> to vector<32x3xf32>
    %c8_170 = arith.constant 8 : index
    %c0_171 = arith.constant 0 : index
    %c0_172 = arith.constant 0 : index
    %313 = vector.load %arg5[%c8_170, %c0_171, %c0_172] : memref<12x32x96xbf16, #tpu.memory_space<vmem>>, vector<1x32x96xbf16>
    %314 = vector.shape_cast %313 : vector<1x32x96xbf16> to vector<32x96xbf16>
    %c0_173 = arith.constant 0 : index
    %c0_174 = arith.constant 0 : index
    %315 = vector.load %arg10[%c0_173, %c0_174] : memref<96x256xbf16, #tpu.memory_space<vmem>>, vector<96x256xbf16>
    %cst_175 = arith.constant dense<0.000000e+00> : vector<32x256xf32>
    %316 = tpu.matmul %314, %315, %cst_175 {dimension_numbers = #tpu.dot_dimension_numbers<[1], [0], [0], [1], [0, 0, 1, 1], [], []>} : vector<32x96xbf16>, vector<96x256xbf16>, vector<32x256xf32> -> vector<32x256xf32>
    %317 = vector.extract_strided_slice %312 {offsets = [0, 0], sizes = [32, 1], strides = [1, 1]} : vector<32x3xf32> to vector<32x1xf32>
    %318 = vector.broadcast %317 : vector<32x1xf32> to vector<32x256xf32>
    %319 = arith.addf %316, %318 : vector<32x256xf32>
    %cst_176 = arith.constant 0.000000e+00 : f32
    %320 = vector.broadcast %cst_176 : f32 to vector<32x256xf32>
    %321 = arith.maximumf %319, %320 : vector<32x256xf32>
    %cst_177 = arith.constant 0.000000e+00 : f32
    %322 = vector.broadcast %cst_177 : f32 to vector<32x256xf32>
    %323 = arith.minimumf %319, %322 : vector<32x256xf32>
    %324 = math.exp %323 : vector<32x256xf32>
    %325 = arith.addf %321, %324 : vector<32x256xf32>
    %cst_178 = arith.constant 1.000000e+00 : f32
    %326 = vector.broadcast %cst_178 : f32 to vector<32x256xf32>
    %327 = arith.subf %325, %326 : vector<32x256xf32>
    %328 = vector.extract_strided_slice %312 {offsets = [0, 1], sizes = [32, 1], strides = [1, 1]} : vector<32x3xf32> to vector<32x1xf32>
    %329 = vector.broadcast %328 : vector<32x1xf32> to vector<32x256xf32>
    %330 = arith.mulf %327, %329 : vector<32x256xf32>
    %331 = vector.extract_strided_slice %312 {offsets = [0, 2], sizes = [32, 1], strides = [1, 1]} : vector<32x3xf32> to vector<32x1xf32>
    %332 = vector.broadcast %331 : vector<32x1xf32> to vector<32x256xf32>
    %333 = arith.addf %330, %332 : vector<32x256xf32>
    %334 = arith.truncf %333 : vector<32x256xf32> to vector<32x256xbf16>
    %c32_179 = arith.constant 32 : index
    %c0_180 = arith.constant 0 : index
    %335 = vector.load %arg10[%c32_179, %c0_180] : memref<96x256xbf16, #tpu.memory_space<vmem>>, vector<32x256xbf16>
    tpu.vector_store %arg10[%c32_179, %c0_180], %334 {strides = array<i32>} : memref<96x256xbf16, #tpu.memory_space<vmem>>, vector<32x256xbf16>,
    %c9 = arith.constant 9 : index
    %c0_181 = arith.constant 0 : index
    %c0_182 = arith.constant 0 : index
    %336 = vector.load %arg6[%c9, %c0_181, %c0_182] : memref<12x32x3xf32, #tpu.memory_space<vmem>>, vector<1x32x3xf32>
    %337 = vector.shape_cast %336 : vector<1x32x3xf32> to vector<32x3xf32>
    %c9_183 = arith.constant 9 : index
    %c0_184 = arith.constant 0 : index
    %c0_185 = arith.constant 0 : index
    %338 = vector.load %arg5[%c9_183, %c0_184, %c0_185] : memref<12x32x96xbf16, #tpu.memory_space<vmem>>, vector<1x32x96xbf16>
    %339 = vector.shape_cast %338 : vector<1x32x96xbf16> to vector<32x96xbf16>
    %c0_186 = arith.constant 0 : index
    %c0_187 = arith.constant 0 : index
    %340 = vector.load %arg10[%c0_186, %c0_187] : memref<96x256xbf16, #tpu.memory_space<vmem>>, vector<96x256xbf16>
    %cst_188 = arith.constant dense<0.000000e+00> : vector<32x256xf32>
    %341 = tpu.matmul %339, %340, %cst_188 {dimension_numbers = #tpu.dot_dimension_numbers<[1], [0], [0], [1], [0, 0, 1, 1], [], []>} : vector<32x96xbf16>, vector<96x256xbf16>, vector<32x256xf32> -> vector<32x256xf32>
    %342 = vector.extract_strided_slice %337 {offsets = [0, 0], sizes = [32, 1], strides = [1, 1]} : vector<32x3xf32> to vector<32x1xf32>
    %343 = vector.broadcast %342 : vector<32x1xf32> to vector<32x256xf32>
    %344 = arith.addf %341, %343 : vector<32x256xf32>
    %cst_189 = arith.constant 0.000000e+00 : f32
    %345 = vector.broadcast %cst_189 : f32 to vector<32x256xf32>
    %346 = arith.maximumf %344, %345 : vector<32x256xf32>
    %cst_190 = arith.constant 0.000000e+00 : f32
    %347 = vector.broadcast %cst_190 : f32 to vector<32x256xf32>
    %348 = arith.minimumf %344, %347 : vector<32x256xf32>
    %349 = math.exp %348 : vector<32x256xf32>
    %350 = arith.addf %346, %349 : vector<32x256xf32>
    %cst_191 = arith.constant 1.000000e+00 : f32
    %351 = vector.broadcast %cst_191 : f32 to vector<32x256xf32>
    %352 = arith.subf %350, %351 : vector<32x256xf32>
    %353 = vector.extract_strided_slice %337 {offsets = [0, 1], sizes = [32, 1], strides = [1, 1]} : vector<32x3xf32> to vector<32x1xf32>
    %354 = vector.broadcast %353 : vector<32x1xf32> to vector<32x256xf32>
    %355 = arith.mulf %352, %354 : vector<32x256xf32>
    %356 = vector.extract_strided_slice %337 {offsets = [0, 2], sizes = [32, 1], strides = [1, 1]} : vector<32x3xf32> to vector<32x1xf32>
    %357 = vector.broadcast %356 : vector<32x1xf32> to vector<32x256xf32>
    %358 = arith.addf %355, %357 : vector<32x256xf32>
    %359 = arith.addf %358, %305 : vector<32x256xf32>
    %cst_192 = arith.constant 0.000000e+00 : bf16
    %360 = vector.broadcast %cst_192 : bf16 to vector<32x256xbf16>
    %c0_193 = arith.constant 0 : index
    %c0_194 = arith.constant 0 : index
    %361 = vector.load %arg10[%c0_193, %c0_194] : memref<96x256xbf16, #tpu.memory_space<vmem>>, vector<32x256xbf16>
    tpu.vector_store %arg10[%c0_193, %c0_194], %360 {strides = array<i32>} : memref<96x256xbf16, #tpu.memory_space<vmem>>, vector<32x256xbf16>,
    %c64_195 = arith.constant 64 : index
    %c0_196 = arith.constant 0 : index
    %362 = vector.load %arg10[%c64_195, %c0_196] : memref<96x256xbf16, #tpu.memory_space<vmem>>, vector<32x256xbf16>
    tpu.vector_store %arg10[%c64_195, %c0_196], %360 {strides = array<i32>} : memref<96x256xbf16, #tpu.memory_space<vmem>>, vector<32x256xbf16>,
    %363 = arith.truncf %359 : vector<32x256xf32> to vector<32x256xbf16>
    %c32_197 = arith.constant 32 : index
    %c0_198 = arith.constant 0 : index
    %364 = vector.load %arg10[%c32_197, %c0_198] : memref<96x256xbf16, #tpu.memory_space<vmem>>, vector<32x256xbf16>
    tpu.vector_store %arg10[%c32_197, %c0_198], %363 {strides = array<i32>} : memref<96x256xbf16, #tpu.memory_space<vmem>>, vector<32x256xbf16>,
    %c10 = arith.constant 10 : index
    %c0_199 = arith.constant 0 : index
    %c0_200 = arith.constant 0 : index
    %365 = vector.load %arg6[%c10, %c0_199, %c0_200] : memref<12x32x3xf32, #tpu.memory_space<vmem>>, vector<1x32x3xf32>
    %366 = vector.shape_cast %365 : vector<1x32x3xf32> to vector<32x3xf32>
    %c10_201 = arith.constant 10 : index
    %c0_202 = arith.constant 0 : index
    %c0_203 = arith.constant 0 : index
    %367 = vector.load %arg5[%c10_201, %c0_202, %c0_203] : memref<12x32x96xbf16, #tpu.memory_space<vmem>>, vector<1x32x96xbf16>
    %368 = vector.shape_cast %367 : vector<1x32x96xbf16> to vector<32x96xbf16>
    %c0_204 = arith.constant 0 : index
    %c0_205 = arith.constant 0 : index
    %369 = vector.load %arg10[%c0_204, %c0_205] : memref<96x256xbf16, #tpu.memory_space<vmem>>, vector<96x256xbf16>
    %cst_206 = arith.constant dense<0.000000e+00> : vector<32x256xf32>
    %370 = tpu.matmul %368, %369, %cst_206 {dimension_numbers = #tpu.dot_dimension_numbers<[1], [0], [0], [1], [0, 0, 1, 1], [], []>} : vector<32x96xbf16>, vector<96x256xbf16>, vector<32x256xf32> -> vector<32x256xf32>
    %371 = vector.extract_strided_slice %366 {offsets = [0, 0], sizes = [32, 1], strides = [1, 1]} : vector<32x3xf32> to vector<32x1xf32>
    %372 = vector.broadcast %371 : vector<32x1xf32> to vector<32x256xf32>
    %373 = arith.addf %370, %372 : vector<32x256xf32>
    %cst_207 = arith.constant 0.000000e+00 : f32
    %374 = vector.broadcast %cst_207 : f32 to vector<32x256xf32>
    %375 = arith.maximumf %373, %374 : vector<32x256xf32>
    %cst_208 = arith.constant 0.000000e+00 : f32
    %376 = vector.broadcast %cst_208 : f32 to vector<32x256xf32>
    %377 = arith.minimumf %373, %376 : vector<32x256xf32>
    %378 = math.exp %377 : vector<32x256xf32>
    %379 = arith.addf %375, %378 : vector<32x256xf32>
    %cst_209 = arith.constant 1.000000e+00 : f32
    %380 = vector.broadcast %cst_209 : f32 to vector<32x256xf32>
    %381 = arith.subf %379, %380 : vector<32x256xf32>
    %382 = vector.extract_strided_slice %366 {offsets = [0, 1], sizes = [32, 1], strides = [1, 1]} : vector<32x3xf32> to vector<32x1xf32>
    %383 = vector.broadcast %382 : vector<32x1xf32> to vector<32x256xf32>
    %384 = arith.mulf %381, %383 : vector<32x256xf32>
    %385 = vector.extract_strided_slice %366 {offsets = [0, 2], sizes = [32, 1], strides = [1, 1]} : vector<32x3xf32> to vector<32x1xf32>
    %386 = vector.broadcast %385 : vector<32x1xf32> to vector<32x256xf32>
    %387 = arith.addf %384, %386 : vector<32x256xf32>
    %388 = arith.truncf %387 : vector<32x256xf32> to vector<32x256xbf16>
    %c32_210 = arith.constant 32 : index
    %c0_211 = arith.constant 0 : index
    %389 = vector.load %arg10[%c32_210, %c0_211] : memref<96x256xbf16, #tpu.memory_space<vmem>>, vector<32x256xbf16>
    tpu.vector_store %arg10[%c32_210, %c0_211], %388 {strides = array<i32>} : memref<96x256xbf16, #tpu.memory_space<vmem>>, vector<32x256xbf16>,
    %c11 = arith.constant 11 : index
    %c0_212 = arith.constant 0 : index
    %c0_213 = arith.constant 0 : index
    %390 = vector.load %arg6[%c11, %c0_212, %c0_213] : memref<12x32x3xf32, #tpu.memory_space<vmem>>, vector<1x32x3xf32>
    %391 = vector.shape_cast %390 : vector<1x32x3xf32> to vector<32x3xf32>
    %c11_214 = arith.constant 11 : index
    %c0_215 = arith.constant 0 : index
    %c0_216 = arith.constant 0 : index
    %392 = vector.load %arg5[%c11_214, %c0_215, %c0_216] : memref<12x32x96xbf16, #tpu.memory_space<vmem>>, vector<1x32x96xbf16>
    %393 = vector.shape_cast %392 : vector<1x32x96xbf16> to vector<32x96xbf16>
    %c0_217 = arith.constant 0 : index
    %c0_218 = arith.constant 0 : index
    %394 = vector.load %arg10[%c0_217, %c0_218] : memref<96x256xbf16, #tpu.memory_space<vmem>>, vector<96x256xbf16>
    %cst_219 = arith.constant dense<0.000000e+00> : vector<32x256xf32>
    %395 = tpu.matmul %393, %394, %cst_219 {dimension_numbers = #tpu.dot_dimension_numbers<[1], [0], [0], [1], [0, 0, 1, 1], [], []>} : vector<32x96xbf16>, vector<96x256xbf16>, vector<32x256xf32> -> vector<32x256xf32>
    %396 = vector.extract_strided_slice %391 {offsets = [0, 0], sizes = [32, 1], strides = [1, 1]} : vector<32x3xf32> to vector<32x1xf32>
    %397 = vector.broadcast %396 : vector<32x1xf32> to vector<32x256xf32>
    %398 = arith.addf %395, %397 : vector<32x256xf32>
    %cst_220 = arith.constant 0.000000e+00 : f32
    %399 = vector.broadcast %cst_220 : f32 to vector<32x256xf32>
    %400 = arith.maximumf %398, %399 : vector<32x256xf32>
    %cst_221 = arith.constant 0.000000e+00 : f32
    %401 = vector.broadcast %cst_221 : f32 to vector<32x256xf32>
    %402 = arith.minimumf %398, %401 : vector<32x256xf32>
    %403 = math.exp %402 : vector<32x256xf32>
    %404 = arith.addf %400, %403 : vector<32x256xf32>
    %cst_222 = arith.constant 1.000000e+00 : f32
    %405 = vector.broadcast %cst_222 : f32 to vector<32x256xf32>
    %406 = arith.subf %404, %405 : vector<32x256xf32>
    %407 = vector.extract_strided_slice %391 {offsets = [0, 1], sizes = [32, 1], strides = [1, 1]} : vector<32x3xf32> to vector<32x1xf32>
    %408 = vector.broadcast %407 : vector<32x1xf32> to vector<32x256xf32>
    %409 = arith.mulf %406, %408 : vector<32x256xf32>
    %410 = vector.extract_strided_slice %391 {offsets = [0, 2], sizes = [32, 1], strides = [1, 1]} : vector<32x3xf32> to vector<32x1xf32>
    %411 = vector.broadcast %410 : vector<32x1xf32> to vector<32x256xf32>
    %412 = arith.addf %409, %411 : vector<32x256xf32>
    %413 = arith.addf %412, %359 : vector<32x256xf32>
    %c0_223 = arith.constant 0 : index
    %c0_224 = arith.constant 0 : index
    %414 = vector.load %arg7[%c0_223, %c0_224] : memref<1x32xf32, #tpu.memory_space<vmem>>, vector<1x32xf32>
    %cst_225 = arith.constant dense<0.000000e+00> : vector<1x256xf32>
    %415 = tpu.matmul %414, %413, %cst_225 {dimension_numbers = #tpu.dot_dimension_numbers<[1], [0], [0], [1], [0, 0, 1, 1], [], []>} : vector<1x32xf32>, vector<32x256xf32>, vector<1x256xf32> -> vector<1x256xf32>
    %c0_226 = arith.constant 0 : index
    %c0_227 = arith.constant 0 : index
    %416 = vector.load %arg8[%c0_226, %c0_227] : memref<1x1xf32, #tpu.memory_space<vmem>>, vector<1x1xf32>
    %417 = vector.broadcast %416 : vector<1x1xf32> to vector<1x256xf32>
    %418 = arith.addf %415, %417 : vector<1x256xf32>
    %c0_228 = arith.constant 0 : index
    %c0_229 = arith.constant 0 : index
    %419 = vector.load %arg9[%c0_228, %c0_229] : memref<1x256xf32, #tpu.memory_space<vmem>>, vector<1x256xf32>
    tpu.vector_store %arg9[%c0_228, %c0_229], %418 {strides = array<i32>} : memref<1x256xf32, #tpu.memory_space<vmem>>, vector<1x256xf32>,
    return
  }
  func.func @transform_0(%arg0: i32) -> (i32, i32) {
    %c0_i32 = arith.constant 0 : i32
    %c0_i32_0 = arith.constant 0 : i32
    return %c0_i32, %arg0 : i32, i32
  }
  func.func @transform_1(%arg0: i32) -> (i32, i32, i32) {
    %c0_i32 = arith.constant 0 : i32
    %c0_i32_0 = arith.constant 0 : i32
    %c0_i32_1 = arith.constant 0 : i32
    %c0_i32_2 = arith.constant 0 : i32
    return %c0_i32, %c0_i32_0, %c0_i32_1 : i32, i32, i32
  }
  func.func @transform_2(%arg0: i32) -> (i32, i32) {
    %c0_i32 = arith.constant 0 : i32
    %c0_i32_0 = arith.constant 0 : i32
    %c0_i32_1 = arith.constant 0 : i32
    return %c0_i32, %c0_i32_0 : i32, i32
  }
  func.func @transform_3(%arg0: i32) -> (i32, i32) {
    %c0_i32 = arith.constant 0 : i32
    %c0_i32_0 = arith.constant 0 : i32
    %c0_i32_1 = arith.constant 0 : i32
    return %c0_i32, %c0_i32_0 : i32, i32
  }
  func.func @transform_4(%arg0: i32) -> (i32, i32, i32) {
    %c0_i32 = arith.constant 0 : i32
    %c0_i32_0 = arith.constant 0 : i32
    %c0_i32_1 = arith.constant 0 : i32
    %c0_i32_2 = arith.constant 0 : i32
    return %c0_i32, %c0_i32_0, %c0_i32_1 : i32, i32, i32
  }
  func.func @transform_5(%arg0: i32) -> (i32, i32, i32) {
    %c0_i32 = arith.constant 0 : i32
    %c0_i32_0 = arith.constant 0 : i32
    %c0_i32_1 = arith.constant 0 : i32
    %c0_i32_2 = arith.constant 0 : i32
    return %c0_i32, %c0_i32_0, %c0_i32_1 : i32, i32, i32
  }
  func.func @transform_6(%arg0: i32) -> (i32, i32) {
    %c0_i32 = arith.constant 0 : i32
    %c0_i32_0 = arith.constant 0 : i32
    %c0_i32_1 = arith.constant 0 : i32
    return %c0_i32, %c0_i32_0 : i32, i32
  }
  func.func @transform_7(%arg0: i32) -> (i32, i32) {
    %c0_i32 = arith.constant 0 : i32
    %c0_i32_0 = arith.constant 0 : i32
    %c0_i32_1 = arith.constant 0 : i32
    return %c0_i32, %c0_i32_0 : i32, i32
  }
  func.func @transform_8(%arg0: i32) -> (i32, i32) {
    %c0_i32 = arith.constant 0 : i32
    %c0_i32_0 = arith.constant 0 : i32
    return %c0_i32, %arg0 : i32, i32
  }
}

</mosaic_0001>

<bundles_post_ra>
// kernel: tpu_custom_call.1
= control target key start
LH: loop header
LB: loop body
LE: loop exit
PB: predicated region body
PF: predicated region fallthrough
CT: control target
= control target key end

     0   :  { %s7915_s0 = inlined_call_operand.vmem [shape: f32[4,512], index: 0, kind: input, shape index: {}]   ;;  %s7916_s1 = inlined_call_operand.vmem [shape: f32[6,2,256], index: 1, kind: input, shape index: {}]   ;;  %s7917_s2 = inlined_call_operand.vmem [shape: f32[32,4], index: 2, kind: input, shape index: {}]   ;;  %s7918_s3 = inlined_call_operand.vmem [shape: f32[32,1], index: 3, kind: input, shape index: {}]   ;;  %s7919_s4 = inlined_call_operand.vmem [shape: bf16[12,32,96], index: 4, kind: input, shape index: {}]   ;;  %s7920_s5 = inlined_call_operand.vmem [shape: f32[12,32,3], index: 5, kind: input, shape index: {}]   ;;  %s7921_s6 = inlined_call_operand.vmem [shape: f32[1,32], index: 6, kind: input, shape index: {}]   ;;  %s7922_s7 = inlined_call_operand.<no memory space> [shape: f32[1,1], index: 7, kind: input, shape index: {}]   ;;  %s7923_s8 = inlined_call_operand.hbm [shape: f32[1,512], index: 8, kind: output, shape index: {}]  }
   0x1   :  { %v13_v0 = vstv %s7922_s7 }
   0x2   :  { %14 = vst [vmem:[#allocation3] sm:$0x1] %v13_v0 }
   0x3   :  { %15 = vsyncpa [#allocation5], 0 }
   0x4   :  { %17 = vsyncpa [#allocation5 + $0x1], 0  ;;  %s6432_s29 = smov 0   ;;  %s6434_s30 = smov 0  }
   0x5   :  { %s6436_s9 = smov 0   ;;  %s6438_s10 = smov 0  }
   0x6 LB: > { %s6453_s7 = sadd.s32 4294967295, %s6371_s10   ;;  %s5212_s11 = sadd.s32 4294967294, %s6371_s10   ;;  %s6371_s10 = sphi %s6438_s10, %s7929_s10   ;;  %s6367_s9 = sphi %s6436_s9, %s7928_s9   ;;  %s6363_s30 = sphi %s6434_s30, %s7927_s30   ;;  %s6359_s29 = sphi %s6432_s29, %s7926_s29  }
   0x7   : > { %s6457_s12 = sadd.s32 1, %s6371_s10   ;;  %s203_s13 = sadd.s32 1, %s6367_s9 }
   0x8   : > { %s200_s14 = ssub.s32 %s6371_s10, %s6457_s12  ;;  %p213_p0 = scmp.ne.s32.totalorder %s6367_s9, %s6363_s30 }
   0x9   : > { %p201_p1 = scmp.eq.s32.totalorder %s200_s14, 0  ;;  %p214_p2 = scmp.eq.s32.totalorder %s6453_s7, 1 }
   0xa   : > { %p219_p3 = scmp.ne.s32.totalorder %s6363_s30, %s6359_s29  ;;  %p220_p4 = scmp.eq.s32.totalorder %s5212_s11, 1 }
   0xb   : > { %s6468_s15 = scalar_select %p201_p1, %s6367_s9, %s203_s13  }
   0xc   : > { %p6470_p5 = por %p214_p2, %p213_p0  ;;  %p6474_p6 = por %p220_p4, %p219_p3 }
   0xd   : > { %p5215_p7 = scmp.ge.s32.totalorder %s6371_s10, 1  ;;  %p268_p8 = scmp.lt.s32.totalorder %s6371_s10, 3 }
   0xf   : > { %p269_p9 = pnand %p5215_p7, %p268_p8 }
  0x10   : > { %s5217_s18 = sshll.u32 (!%p269_p9), %s6453_s7, 1  ;;  %s6375_s25 = smov (!%p269_p9), 124  }
  0x11   : > { %272 = sbr.rel (%p269_p9) target bundleno = 4297 (0x10c9), region = 52  ;;  %p303_p10 = scmp.lt.s32.totalorder (!%p269_p9), %s5217_s18, 3 }
  0x12   : > { %s6376_s26 = smov (!%p269_p9), 4   ;;  %s6380_s28 = smov (!%p269_p9), 32  }
  0x13   : > { %s299_s20 = sand.u32 (!%p269_p9), 1, %s6363_s30  }
  0x14   : > { %s5216_s21 = sshll.u32 (!%p269_p9), %s299_s20, 1  ;;  %s5139_s24 = scalar_lea.sflag (!%p269_p9), [#allocation5], %s299_s20 }
  0x16   : > { %v6373_v1 = vmov 0.0   ;;  %v315_v2 = vld [vmem:[%s7918_s3] sm:$0xff]  ;;  %v6374_v3 = vmov 0   ;;  %v317_v4 = vld [vmem:[%s7918_s3 + $0x10] sm:$0xff]  ;;  %v316_v5 = vld [vmem:[%s7918_s3 + $0x8] sm:$0xff]  ;;  %s7931_s18 = smov (!%p303_p10, %s5217_s18), 3  ;;  %v493_v39 = vlaneseq }
  0x17   : > { %423 = vmatprep.mubr.f32.mxu0 %v6373_v1  ;;  %5997 = vset.pattern.permute.xlu1 %v6374_v3  ;;  %v318_v6 = vld [vmem:[%s7918_s3 + $0x18] sm:$0xff]  ;;  %s5218_s27 = sshll.u32 %s7931_s18, 2  ;;  %vm354_vm0 = vcmask 1043456   ;;  %v310_v8 = vld [vmem:[%s7917_s2] sm:$0xff]  ;;  %vm341_vm1 = vcmask 31744   ;;  %v311_v10 = vld [vmem:[%s7917_s2 + $0x8] sm:$0xff] }
  0x18   : > { %5996 = vset.pattern.permute.xlu0 %v6374_v3  ;;  %321 = vperm.xlu1 %5997, %v315_v2   ;;  %s306_s13 = scalar_lea.vmem %s7915_s0, %s5218_s27  ;;  %v312_v11 = vld [vmem:[%s7917_s2 + $0x10] sm:$0xff]  ;;  %v313_v12 = vld [vmem:[%s7917_s2 + $0x18] sm:$0xff]  ;;  %v638_v35 = vld [vmem:[%s7920_s5] sm:$0xff]  ;;  %v6377_v37 = vmov 1   ;;  %v6378_v38 = vmov 2   ;;  %v6585_v40 = vshrl.u32 %v493_v39, 7 }
  0x19   : > { %331 = vperm.xlu0 %5996, %v317_v4   ;;  %787 = vmatprep.mubr.bf16.mxu1 %v6374_v3  ;;  %v314_v7 = vld [vmem:[%s306_s13] sm:$0xff]  ;;  %v640_v33 = vld [vmem:[%s7920_s5 + $0x10] sm:$0xff]  ;;  %v641_v34 = vld [vmem:[%s7920_s5 + $0x18] sm:$0xff]  ;;  %v6597_v47 = vand.u32 127, %v493_v39  ;;  %vm748_vm4 = vcmask 785408   ;;  %s6379_s27 = smov 96  }
  0x1a   : > { %v340_v9 = vcombine.high %v314_v7, %v314_v7  ;;  %v639_v36 = vld [vmem:[%s7920_s5 + $0x8] sm:$0xff]  ;;  %v6588_v42 = vsub.s32 1, %v6585_v40  ;;  %v6591_v43 = vsub.s32 3, %v6585_v40  ;;  %v448_v44 = vld [vmem:[%s7916_s1] sm:$0xf]  ;;  %vm5040_vm8 = vcmask 261120  }
  0x1b   : > { %vm575_vm2 = vcmp.lt.s32.totalorder %v6597_v47, 124  ;;  %vm495_vm3 = vcmp.lt.s32.totalorder %v6597_v47, 4  ;;  %vm1453_vm5 = vcmp.lt.s32.totalorder %v6597_v47, 96  ;;  %vm1373_vm6 = vcmp.lt.s32.totalorder %v6597_v47, 32  ;;  %s5834_s18 = sshll.u32 %s6453_s7, 5 }
  0x1c   : > { %326 = vperm.xlu1 %5997, %v316_v5   ;;  %5219 = vmatprep.subr.msk.mxu0 %vm354_vm0, %v340_v9  ;;  %v587_v48 = vrot.slane %v448_v44, %v6588_v42  ;;  %v591_v49 = vrot.slane %v448_v44, %v6591_v43  ;;  %vm2252_vm7 = vcmp.lt.s32.totalorder %v6597_v47, 64  ;;  %vm5135_vm9 = vcmp.lt.s32.totalorder %v493_v39, 256  ;;  %s5151_s23 = scalar_lea.hbm %s7923_s8, %s5834_s18 }
  0x1d   : > { %336 = vperm.xlu0 %5996, %v318_v6   ;;  %5220 = vmatpush1.msk.msra.mxu0 %vm354_vm0, %v314_v7 }
  0x1e   : > { %5221 = vmatmul.mubr.msk.f32.vlgmr.msra.gmra.mxu0 %vm341_vm1, %v310_v8  ;;  %v6603_v52 = vrot.slane %v587_v48, %v6588_v42  ;;  %v6606_v53 = vrot.slane %v591_v49, %v6588_v42  ;;  %v6625_v8 = vsub.s32 0, %v6585_v40 }
  0x1f   : > { %429 = vmatprep.mubr.f32.mxu0 %v6373_v1 }
  0x22   : > { %5222 = vmatmul.mubr.msk.f32.gmra.mxu0 %vm341_vm1, %v311_v10 }
  0x23   : > { %435 = vmatprep.mubr.f32.mxu0 %v6373_v1 }
  0x26   : > { %5223 = vmatmul.mubr.msk.f32.gmra.mxu0 %vm341_vm1, %v312_v11  ;;  %v6632_v11 = vsub.s32 2, %v6585_v40 }
  0x27   : > { %441 = vmatprep.mubr.f32.mxu0 %v6373_v1 }
  0x2a   : > { %5224 = vmatmul.mubr.msk.f32.gmra.mxu0 %vm341_vm1, %v313_v12 }
  0x2b   : > { %1202 = vmatprep.mubr.bf16.mxu0 %v6374_v3 }
  0x93   : > { %v322_v13 = vpop.permute.xlu1 %321 }
  0x94   : > { %v332_v20 = vpop.permute.xlu0 %331 }
  0x97   : > { %v327_v17 = vpop.permute.xlu1 %326 }
  0x98   : > { %v337_v25 = vpop.permute.xlu0 %336 }
  0xde   : > { %v425_v14 = vpop.f32.mrf.mxu0 }
  0xdf   : > { %v6516_v15 = vadd.f32 %v425_v14, %v322_v13 }
  0xe0   : > { %v427_v16 = vpop.f32.mrf.mxu0 }
  0xe1   : > { %559 = vrot.lane.b32.xlu0 %v6516_v15, %s6375_s25  ;;  %v6536_v30 = vadd.f32 %v427_v16, %v322_v13 }
  0xe2   : > { %v431_v18 = vpop.f32.mrf.mxu0 }
  0xe3   : > { %v6520_v19 = vadd.f32 %v431_v18, %v327_v17 }
  0xe4   : > { %v433_v21 = vpop.f32.mrf.mxu0 }
  0xe5   : > { %561 = vrot.lane.b32.xlu1 %v6520_v19, %s6375_s25  ;;  %v6544_v32 = vadd.f32 %v433_v21, %v327_v17 }
  0xe6   : > { %v437_v22 = vpop.f32.mrf.mxu0 }
  0xe7   : > { %v6524_v23 = vadd.f32 %v437_v22, %v332_v20  ;;  %v508_v22 = vrot.slane %v448_v44, %v6625_v8 }
  0xe8   : > { %v439_v24 = vpop.f32.mrf.mxu0 }
  0xe9   : > { %563 = vrot.lane.b32.xlu0 %v6524_v23, %s6375_s25  ;;  %v6528_v27 = vadd.f32 %v439_v24, %v332_v20  ;;  %v512_v24 = vrot.slane %v448_v44, %v6632_v11 }
  0xea   : > { %v443_v26 = vpop.f32.mrf.mxu0 }
  0xeb   : > { %v6530_v28 = vadd.f32 %v443_v26, %v337_v25 }
  0xec   : > { %v445_v29 = vpop.f32.mrf.mxu0 }
  0xed   : > { %565 = vrot.lane.b32.xlu1 %v6530_v28, %s6375_s25  ;;  %571 = vrot.lane.b32.xlu0 %v6528_v27, %s6375_s25  ;;  %v6538_v31 = vadd.f32 %v445_v29, %v337_v25 }
  0xef   : > { %v5842_v25 = vpack.c.bf16 %v6538_v31, %v6528_v27 }
  0xf1   : > { %573 = vrot.lane.b32.xlu1 %v6538_v31, %s6375_s25  ;;  %567 = vrot.lane.b32.xlu0 %v6536_v30, %s6375_s25 }
  0xf5   : > { %569 = vrot.lane.b32.xlu1 %v6544_v32, %s6375_s25  ;;  %481 = vrot.lane.b32.xlu0 %v6524_v23, %s6376_s26 }
  0xf9   : > { %483 = vrot.lane.b32.xlu1 %v6530_v28, %s6376_s26  ;;  %489 = vrot.lane.b32.xlu0 %v6528_v27, %s6376_s26 }
  0xfd   : > { %479 = vrot.lane.b32.xlu1 %v6520_v19, %s6376_s26  ;;  %477 = vrot.lane.b32.xlu0 %v6516_v15, %s6376_s26 }
 0x101   : > { %491 = vrot.lane.b32.xlu1 %v6538_v31, %s6376_s26  ;;  %485 = vrot.lane.b32.xlu0 %v6536_v30, %s6376_s26 }
 0x105   : > { %487 = vrot.lane.b32.xlu1 %v6544_v32, %s6376_s26  ;;  %670 = vperm.xlu0 %5996, %v640_v33  }
 0x109   : > { %675 = vperm.xlu1 %5997, %v641_v34   ;;  %660 = vperm.xlu0 %5996, %v638_v35  }
 0x10d   : > { %665 = vperm.xlu1 %5997, %v639_v36   ;;  %5998 = vset.pattern.permute.xlu0 %v6377_v37 }
 0x10e   : > { %865 = vperm.xlu0 %5998, %v640_v33  }
 0x111   : > { %5999 = vset.pattern.permute.xlu1 %v6377_v37 }
 0x112   : > { %869 = vperm.xlu1 %5999, %v641_v34   ;;  %6001 = vset.pattern.permute.xlu0 %v6378_v38 }
 0x113   : > { %893 = vperm.xlu0 %6001, %v641_v34   ;;  %v6646_v34 = vrot.slane %v508_v22, %v6625_v8 }
 0x116   : > { %6000 = vset.pattern.permute.xlu1 %v6378_v38 }
 0x117   : > { %889 = vperm.xlu1 %6000, %v640_v33   ;;  %881 = vperm.xlu0 %6001, %v638_v35   ;;  %v5841_v33 = vpack.c.bf16 %v6530_v28, %v6524_v23 }
 0x11b   : > { %6002 = vset.pattern.permute.xlu1 %v6377_v37  ;;  %6004 = vset.pattern.permute.xlu0 %v6374_v3 }
 0x11c   : > { %857 = vperm.xlu1 %6002, %v638_v35   ;;  %v6649_v35 = vrot.slane %v512_v24, %v6625_v8 }
 0x120   : > { %861 = vperm.xlu1 %6002, %v639_v36  }
 0x124   : > { %6003 = vset.pattern.permute.xlu1 %v6378_v38 }
 0x125   : > { %885 = vperm.xlu1 %6003, %v639_v36   ;;  %v5840_v36 = vpack.c.bf16 %v6544_v32, %v6536_v30 }
 0x129   : > { %6005 = vset.pattern.permute.xlu1 %v6374_v3 }
 0x153   : > { %v560_v41 = vpop.permute.xlu0 %559 }
 0x157   : > { %v562_v45 = vpop.permute.xlu1 %561 }
 0x15b   : > { %v564_v46 = vpop.permute.xlu0 %563 }
 0x15f   : > { %v566_v50 = vpop.permute.xlu1 %565  ;;  %v572_v51 = vpop.permute.xlu0 %571 }
 0x160   : > { %v578_v54 = vsel %vm575_vm2, %v564_v46, %v572_v51  ;;  %v582_v55 = vsel %vm575_vm2, %v572_v51, %v564_v46 }
 0x161   : > { %v607_v60 = vmul.f32 %v6606_v53, %v582_v55  ;;  %v606_v62 = vmul.f32 %v6603_v52, %v578_v54 }
 0x163   : > { %v574_v56 = vpop.permute.xlu1 %573  ;;  %v568_v57 = vpop.permute.xlu0 %567 }
 0x164   : > { %v579_v58 = vsel %vm575_vm2, %v566_v50, %v574_v56  ;;  %v583_v59 = vsel %vm575_vm2, %v574_v56, %v566_v50  ;;  %v576_v0 = vsel %vm575_vm2, %v560_v41, %v568_v57  ;;  %v580_v2 = vsel %vm575_vm2, %v568_v57, %v560_v41 }
 0x165   : > { %v609_v61 = vmul.f32 %v6606_v53, %v583_v59  ;;  %v608_v63 = vmul.f32 %v6603_v52, %v579_v58  ;;  %v602_v12 = vmul.f32 %v6603_v52, %v576_v0  ;;  %v603_v13 = vmul.f32 %v6606_v53, %v580_v2 }
 0x166   : > { %v5839_v50 = vpack.c.bf16 %v6520_v19, %v6516_v15 }
 0x167   : > { %v570_v4 = vpop.permute.xlu1 %569  ;;  %v482_v5 = vpop.permute.xlu0 %481  ;;  %v5846_v6 = vpack.c.bf16 %v609_v61, %v607_v60  ;;  %v5845_v7 = vpack.c.bf16 %v608_v63, %v606_v62 }
 0x168   : > { %v577_v9 = vsel %vm575_vm2, %v562_v45, %v570_v4  ;;  %v581_v10 = vsel %vm575_vm2, %v570_v4, %v562_v45 }
 0x169   : > { %v604_v14 = vmul.f32 %v6603_v52, %v577_v9  ;;  %v605_v16 = vmul.f32 %v6606_v53, %v581_v10  ;;  %759 = vmatprep.subr.bf16.mxu1 %v5846_v6  ;;  %v6095_v9 = vld [vmem:[%s7919_s4] sm:$0xff]   ;;  %v6096_v10 = vld [vmem:[%s7919_s4 + $0x8] sm:$0xff]  }
 0x16a   : > { %760 = vmatpush1.bf16.msra.mxu1 %v5845_v7 }
 0x16b   : > { %v484_v17 = vpop.permute.xlu1 %483  ;;  %v490_v18 = vpop.permute.xlu0 %489  ;;  %v5844_v20 = vpack.c.bf16 %v605_v16, %v603_v13  ;;  %v5843_v21 = vpack.c.bf16 %v604_v14, %v602_v12 }
 0x16c   : > { %v498_v41 = vsel %vm495_vm3, %v482_v5, %v490_v18  ;;  %v502_v44 = vsel %vm495_vm3, %v490_v18, %v482_v5 }
 0x16d   : > { %761 = vmatprep.subr.bf16.mxu1 %v5844_v20  ;;  %v527_v51 = vmul.f32 %v6646_v34, %v502_v44  ;;  %v528_v54 = vmul.f32 %v6649_v35, %v498_v41 }
 0x16e   : > { %762 = vmatpush1.bf16.msra.mxu1 %v5843_v21 }
 0x16f   : > { %v480_v26 = vpop.permute.xlu1 %479  ;;  %763 = vmatprep.subr.bf16.mxu1 %v5842_v25  ;;  %v478_v29 = vpop.permute.xlu0 %477 }
 0x172   : > { %764 = vmatpush1.bf16.msra.mxu1 %v5841_v33 }
 0x173   : > { %v492_v45 = vpop.permute.xlu1 %491  ;;  %765 = vmatprep.subr.bf16.mxu1 %v5840_v36  ;;  %v486_v46 = vpop.permute.xlu0 %485 }
 0x174   : > { %v499_v48 = vsel %vm495_vm3, %v484_v17, %v492_v45  ;;  %v503_v49 = vsel %vm495_vm3, %v492_v45, %v484_v17  ;;  %v496_v57 = vsel %vm495_vm3, %v478_v29, %v486_v46  ;;  %v500_v58 = vsel %vm495_vm3, %v486_v46, %v478_v29 }
 0x175   : > { %v529_v55 = vmul.f32 %v6646_v34, %v503_v49  ;;  %v530_v56 = vmul.f32 %v6649_v35, %v499_v48  ;;  %v523_v0 = vmul.f32 %v6646_v34, %v500_v58  ;;  %v524_v2 = vmul.f32 %v6649_v35, %v496_v57 }
 0x176   : > { %766 = vmatpush1.bf16.msra.mxu1 %v5839_v50 }
 0x177   : > { %v488_v59 = vpop.permute.xlu1 %487  ;;  %v5838_v60 = vpack.c.bf16 %v530_v56, %v528_v54  ;;  %v5837_v61 = vpack.c.bf16 %v529_v55, %v527_v51 }
 0x178   : > { %v497_v62 = vsel %vm495_vm3, %v480_v26, %v488_v59  ;;  %v501_v63 = vsel %vm495_vm3, %v488_v59, %v480_v26 }
 0x179   : > { %v525_v4 = vmul.f32 %v6646_v34, %v501_v63  ;;  %v526_v5 = vmul.f32 %v6649_v35, %v497_v62  ;;  %767 = vmatprep.subr.bf16.mxu1 %v5838_v60 }
 0x17a   : > { %768 = vmatpush1.bf16.msra.mxu1 %v5837_v61 }
 0x17b   : > { %v5836_v6 = vpack.c.bf16 %v526_v5, %v524_v2  ;;  %v5835_v7 = vpack.c.bf16 %v525_v4, %v523_v0 }
 0x17d   : > { %769 = vmatprep.subr.bf16.mxu1 %v5836_v6 }
 0x17e   : > { %770 = vmatpush1.bf16.msra.mxu1 %v5835_v7 }
 0x180   : > { %v671_v12 = vpop.permute.xlu0 %670 }
 0x181   : > { %5251 = vmatmul.mubr.msk.bf16.vlgmr.msra.gmra.mxu1 %vm748_vm4, %v6095_v9 }
 0x182   : > { %797 = vmatprep.mubr.bf16.mxu1 %v6374_v3 }
 0x184   : > { %v676_v13 = vpop.permute.xlu1 %675  ;;  %v661_v14 = vpop.permute.xlu0 %660 }
 0x188   : > { %v666_v16 = vpop.permute.xlu1 %665 }
 0x189   : > { %5252 = vmatmul.mubr.msk.bf16.gmra.mxu1 %vm748_vm4, %v6096_v10  ;;  %v6693_v59 = vpop.permute.xlu0 %865 }
 0x18a   : > { %1666 = vmatprep.mubr.bf16.mxu1 %v6374_v3 }
 0x18d   : > { %v6689_v25 = vpop.permute.xlu1 %869 }
 0x18e   : > { %v894_v9 = vpop.permute.xlu0 %893 }
 0x192   : > { %v6691_v54 = vpop.permute.xlu1 %889 }
 0x197   : > { %v858_v5 = vpop.permute.xlu1 %857 }
 0x241   : > { %v789_v17 = vpop.f32.mrf.mxu1 }
 0x242   : > { %v790_v18 = vadd.f32 %v789_v17, %v661_v14 }
 0x243   : > { %v791_v20 = vpop.f32.mrf.mxu1 }
 0x244   : > { %v816_v21 = vmin.f32 %v790_v18, 0.0  ;;  %v792_v22 = vadd.f32 %v791_v20, %v661_v14  ;;  %v808_v10 = vmax.f32 %v790_v18, 0.0 }
 0x245   : > { %v793_v24 = vpop.f32.mrf.mxu1 }
 0x246   : > { %v824_v26 = vmul.f32 1.442695, %v816_v21  ;;  %v817_v29 = vmin.f32 %v792_v22, 0.0  ;;  %v794_v33 = vadd.f32 %v793_v24, %v666_v16  ;;  %v809_v17 = vmax.f32 %v792_v22, 0.0  ;;  %v862_v21 = vpop.permute.xlu1 %861 }
 0x247   : > { %v795_v36 = vpop.f32.mrf.mxu1 }
 0x248   : > { %6119 = vpow2.f32 %v824_v26  ;;  %v826_v41 = vmul.f32 1.442695, %v817_v29  ;;  %v818_v44 = vmin.f32 %v794_v33, 0.0  ;;  %v796_v45 = vadd.f32 %v795_v36, %v666_v16 }
 0x249   : > { %v799_v46 = vpop.f32.mrf.mxu1  ;;  %v810_v29 = vmax.f32 %v794_v33, 0.0 }
 0x24a   : > { %6121 = vpow2.f32 %v826_v41  ;;  %v828_v48 = vmul.f32 1.442695, %v818_v44  ;;  %v800_v49 = vadd.f32 %v799_v46, %v671_v12  ;;  %v819_v50 = vmin.f32 %v796_v45, 0.0  ;;  %v882_v41 = vpop.permute.xlu0 %881  ;;  %v886_v22 = vpop.permute.xlu1 %885 }
 0x24b   : > { %v801_v51 = vpop.f32.mrf.mxu1 }
 0x24c   : > { %6123 = vpow2.f32 %v828_v48  ;;  %v820_v55 = vmin.f32 %v800_v49, 0.0  ;;  %v802_v56 = vadd.f32 %v801_v51, %v671_v12  ;;  %v830_v57 = vmul.f32 1.442695, %v819_v50 }
 0x24d   : > { %v803_v58 = vpop.f32.mrf.mxu1  ;;  %v811_v48 = vmax.f32 %v796_v45, 0.0  ;;  %v812_v18 = vmax.f32 %v800_v49, 0.0 }
 0x24e   : > { %v832_v60 = vmul.f32 1.442695, %v820_v55  ;;  %v821_v61 = vmin.f32 %v802_v56, 0.0  ;;  %v804_v62 = vadd.f32 %v803_v58, %v676_v13  ;;  %6125 = vpow2.f32 %v830_v57 }
 0x24f   : > { %v805_v63 = vpop.f32.mrf.mxu1 }
 0x250   : > { %6127 = vpow2.f32 %v832_v60  ;;  %v834_v0 = vmul.f32 1.442695, %v821_v61  ;;  %v822_v2 = vmin.f32 %v804_v62, 0.0  ;;  %v806_v4 = vadd.f32 %v805_v63, %v676_v13 }
 0x251   : > { %v813_v61 = vmax.f32 %v802_v56, 0.0  ;;  %v814_v45 = vmax.f32 %v804_v62, 0.0 }
 0x252   : > { %6129 = vpow2.f32 %v834_v0  ;;  %v836_v6 = vmul.f32 1.442695, %v822_v2  ;;  %v823_v7 = vmin.f32 %v806_v4, 0.0 }
 0x254   : > { %6131 = vpow2.f32 %v836_v6  ;;  %v838_v14 = vmul.f32 1.442695, %v823_v7 }
 0x255   : > { %v6120_v12 = vpop.eup %6119 }
 0x256   : > { %v840_v16 = vadd.f32 %v6120_v12, %v808_v10  ;;  %6133 = vpow2.f32 %v838_v14 }
 0x257   : > { %v6122_v20 = vpop.eup %6121 }
 0x258   : > { %v5253_v24 = vadd.f32 -1.0, %v840_v16  ;;  %v841_v26 = vadd.f32 %v6122_v20, %v809_v17  ;;  %v815_v20 = vmax.f32 %v806_v4, 0.0 }
 0x259   : > { %v6124_v36 = vpop.eup %6123 }
 0x25a   : > { %v842_v13 = vadd.f32 %v6124_v36, %v810_v29  ;;  %v872_v44 = vmul.f32 %v5253_v24, %v858_v5  ;;  %v5254_v46 = vadd.f32 -1.0, %v841_v26 }
 0x25b   : > { %v6126_v50 = vpop.eup %6125 }
 0x25c   : > { %v5255_v51 = vadd.f32 -1.0, %v842_v13  ;;  %v6695_v55 = vadd.f32 %v882_v41, %v872_v44  ;;  %v843_v58 = vadd.f32 %v6126_v50, %v811_v48  ;;  %v873_v2 = vmul.f32 %v5254_v46, %v858_v5 }
 0x25d   : > { %v6128_v57 = vpop.eup %6127 }
 0x25e   : > { %v844_v60 = vadd.f32 %v6128_v57, %v812_v18  ;;  %v874_v63 = vmul.f32 %v5255_v51, %v862_v21  ;;  %992 = vrot.lane.b32.xlu0 %v6695_v55, %s6375_s25  ;;  %v5256_v0 = vadd.f32 -1.0, %v843_v58  ;;  %v6706_v24 = vadd.f32 %v882_v41, %v873_v2  ;;  %v5274_v18 = vld [vmem:[%s7920_s5 + $0x28] sm:$0xff] }
 0x25f   : > { %v6130_v33 = vpop.eup %6129 }
 0x260   : > { %v5257_v6 = vadd.f32 -1.0, %v844_v60  ;;  %v845_v7 = vadd.f32 %v6130_v33, %v813_v61  ;;  %v6699_v10 = vadd.f32 %v886_v22, %v874_v63  ;;  %v875_v12 = vmul.f32 %v5256_v0, %v862_v21 }
 0x261   : > { %v6132_v49 = vpop.eup %6131 }
 0x262   : > { %v5258_v14 = vadd.f32 -1.0, %v845_v7  ;;  %v846_v16 = vadd.f32 %v6132_v49, %v814_v45  ;;  %v876_v17 = vmul.f32 %v5257_v6, %v6693_v59  ;;  %994 = vrot.lane.b32.xlu1 %v6699_v10, %s6375_s25  ;;  %v5851_v56 = vpack.c.bf16 %v6699_v10, %v6695_v55 }
 0x263   : > { %v6708_v5 = vadd.f32 %v886_v22, %v875_v12  ;;  %v6134_v62 = vpop.eup %6133 }
 0x264   : > { %v5259_v26 = vadd.f32 -1.0, %v846_v16  ;;  %v877_v29 = vmul.f32 %v5258_v14, %v6693_v59  ;;  %v6712_v21 = vadd.f32 %v6691_v54, %v876_v17  ;;  %v847_v36 = vadd.f32 %v6134_v62, %v815_v20 }
 0x265   : > { %v5852_v13 = vpack.c.bf16 %v6708_v5, %v6706_v24 }
 0x266   : > { %v878_v44 = vmul.f32 %v5259_v26, %v6689_v25  ;;  %996 = vrot.lane.b32.xlu0 %v6712_v21, %s6375_s25  ;;  %v5260_v4 = vadd.f32 -1.0, %v847_v36  ;;  %v6722_v46 = vadd.f32 %v6691_v54, %v877_v29  ;;  %v5275_v54 = vld [vmem:[%s7920_s5 + $0x30] sm:$0xff] }
 0x268   : > { %v6719_v41 = vadd.f32 %v894_v9, %v878_v44  ;;  %v879_v59 = vmul.f32 %v5260_v4, %v6689_v25  ;;  %v5276_v25 = vld [vmem:[%s7920_s5 + $0x38] sm:$0xff] }
 0x26a   : > { %998 = vrot.lane.b32.xlu1 %v6719_v41, %s6375_s25  ;;  %1004 = vrot.lane.b32.xlu0 %v6722_v46, %s6375_s25  ;;  %v5853_v48 = vpack.c.bf16 %v6719_v41, %v6712_v21  ;;  %v6731_v50 = vadd.f32 %v894_v9, %v879_v59  ;;  %v5273_v9 = vld [vmem:[%s7920_s5 + $0x20] sm:$0xff] }
 0x26c   : > { %v5854_v51 = vpack.c.bf16 %v6731_v50, %v6722_v46 }
 0x26e   : > { %1006 = vrot.lane.b32.xlu1 %v6731_v50, %s6375_s25  ;;  %1000 = vrot.lane.b32.xlu0 %v6706_v24, %s6375_s25 }
 0x272   : > { %1002 = vrot.lane.b32.xlu1 %v6708_v5, %s6375_s25  ;;  %936 = vrot.lane.b32.xlu0 %v6712_v21, %s6376_s26  ;;  %s6381_s25 = smov 64  }
 0x276   : > { %938 = vrot.lane.b32.xlu1 %v6719_v41, %s6376_s26  ;;  %944 = vrot.lane.b32.xlu0 %v6722_v46, %s6376_s26 }
 0x27a   : > { %934 = vrot.lane.b32.xlu1 %v6699_v10, %s6376_s26  ;;  %932 = vrot.lane.b32.xlu0 %v6695_v55, %s6376_s26 }
 0x27e   : > { %946 = vrot.lane.b32.xlu1 %v6731_v50, %s6376_s26  ;;  %940 = vrot.lane.b32.xlu0 %v6706_v24, %s6376_s26 }
 0x282   : > { %942 = vrot.lane.b32.xlu1 %v6708_v5, %s6376_s26  ;;  %1086 = vperm.xlu0 %6004, %v5275_v54   ;;  %s301_s26 = scalar_lea.vmem [#allocation4], %s5216_s21 }
 0x286   : > { %1091 = vperm.xlu1 %6005, %v5276_v25   ;;  %1081 = vperm.xlu0 %6004, %v5274_v18  }
 0x28a   : > { %1076 = vperm.xlu1 %6005, %v5273_v9   ;;  %6007 = vset.pattern.permute.xlu0 %v6377_v37 }
 0x28b   : > { %1284 = vperm.xlu0 %6007, %v5276_v25  }
 0x28e   : > { %6006 = vset.pattern.permute.xlu1 %v6377_v37 }
 0x28f   : > { %1280 = vperm.xlu1 %6006, %v5275_v54   ;;  %1272 = vperm.xlu0 %6007, %v5273_v9  }
 0x293   : > { %6008 = vset.pattern.permute.xlu1 %v6378_v38  ;;  %6010 = vset.pattern.permute.xlu0 %v6378_v38 }
 0x294   : > { %1304 = vperm.xlu1 %6008, %v5275_v54   ;;  %1296 = vperm.xlu0 %6010, %v5273_v9  }
 0x298   : > { %1308 = vperm.xlu1 %6008, %v5276_v25   ;;  %6013 = vset.pattern.permute.xlu0 %v6374_v3 }
 0x29c   : > { %6009 = vset.pattern.permute.xlu1 %v6377_v37 }
 0x29d   : > { %1276 = vperm.xlu1 %6009, %v5274_v18  }
 0x2a1   : > { %6011 = vset.pattern.permute.xlu1 %v6378_v38 }
 0x2a2   : > { %1300 = vperm.xlu1 %6011, %v5274_v18  }
 0x2a6   : > { %6012 = vset.pattern.permute.xlu1 %v6374_v3 }
 0x2d0   : > { %v993_v57 = vpop.permute.xlu0 %992 }
 0x2d4   : > { %v995_v58 = vpop.permute.xlu1 %994 }
 0x2d8   : > { %v997_v22 = vpop.permute.xlu0 %996 }
 0x2dc   : > { %v999_v60 = vpop.permute.xlu1 %998  ;;  %v1005_v61 = vpop.permute.xlu0 %1004 }
 0x2dd   : > { %v1010_v63 = vsel %vm575_vm2, %v997_v22, %v1005_v61  ;;  %v1014_v33 = vsel %vm575_vm2, %v1005_v61, %v997_v22 }
 0x2de   : > { %v1020_v45 = vmul.f32 %v1010_v63, %v6603_v52  ;;  %v1021_v49 = vmul.f32 %v1014_v33, %v6606_v53 }
 0x2e0   : > { %v1007_v0 = vpop.permute.xlu1 %1006  ;;  %v1001_v2 = vpop.permute.xlu0 %1000 }
 0x2e1   : > { %v1011_v6 = vsel %vm575_vm2, %v999_v60, %v1007_v0  ;;  %v1015_v7 = vsel %vm575_vm2, %v1007_v0, %v999_v60  ;;  %v1008_v16 = vsel %vm575_vm2, %v993_v57, %v1001_v2  ;;  %v1012_v17 = vsel %vm575_vm2, %v1001_v2, %v993_v57 }
 0x2e2   : > { %v1022_v12 = vmul.f32 %v1011_v6, %v6603_v52  ;;  %v1023_v14 = vmul.f32 %v1015_v7, %v6606_v53  ;;  %v1016_v4 = vmul.f32 %v1008_v16, %v6603_v52  ;;  %v1017_v59 = vmul.f32 %v1012_v17, %v6606_v53 }
 0x2e4   : > { %v5857_v20 = vpack.c.bf16 %v1022_v12, %v1020_v45  ;;  %v1003_v62 = vpop.permute.xlu1 %1002  ;;  %v937_v26 = vpop.permute.xlu0 %936  ;;  %v5858_v29 = vpack.c.bf16 %v1023_v14, %v1021_v49 }
 0x2e5   : > { %v1009_v36 = vsel %vm575_vm2, %v995_v58, %v1003_v62  ;;  %v1013_v44 = vsel %vm575_vm2, %v1003_v62, %v995_v58 }
 0x2e6   : > { %v1018_v25 = vmul.f32 %v1009_v36, %v6603_v52  ;;  %v1019_v54 = vmul.f32 %v1013_v44, %v6606_v53  ;;  %1174 = vmatprep.subr.bf16.mxu0 %v5858_v29 }
 0x2e7   : > { %1175 = vmatpush1.bf16.msra.mxu0 %v5857_v20 }
 0x2e8   : > { %v5855_v9 = vpack.c.bf16 %v1018_v25, %v1016_v4  ;;  %v939_v18 = vpop.permute.xlu1 %938  ;;  %v945_v57 = vpop.permute.xlu0 %944  ;;  %v5856_v22 = vpack.c.bf16 %v1019_v54, %v1017_v59 }
 0x2e9   : > { %v950_v61 = vsel %vm495_vm3, %v937_v26, %v945_v57  ;;  %v954_v52 = vsel %vm495_vm3, %v945_v57, %v937_v26 }
 0x2ea   : > { %1176 = vmatprep.subr.bf16.mxu0 %v5856_v22  ;;  %v961_v33 = vmul.f32 %v950_v61, %v6649_v35 }
 0x2eb   : > { %1177 = vmatpush1.bf16.msra.mxu0 %v5855_v9 }
 0x2ec   : > { %v935_v60 = vpop.permute.xlu1 %934  ;;  %1178 = vmatprep.subr.bf16.mxu0 %v5854_v51  ;;  %v933_v58 = vpop.permute.xlu0 %932  ;;  %v960_v51 = vmul.f32 %v954_v52, %v6646_v34 }
 0x2ef   : > { %1179 = vmatpush1.bf16.msra.mxu0 %v5853_v48 }
 0x2f0   : > { %v947_v53 = vpop.permute.xlu1 %946  ;;  %1180 = vmatprep.subr.bf16.mxu0 %v5852_v13  ;;  %v941_v63 = vpop.permute.xlu0 %940 }
 0x2f1   : > { %v951_v46 = vsel %vm495_vm3, %v939_v18, %v947_v53  ;;  %v955_v50 = vsel %vm495_vm3, %v947_v53, %v939_v18  ;;  %v948_v41 = vsel %vm495_vm3, %v933_v58, %v941_v63  ;;  %v952_v24 = vsel %vm495_vm3, %v941_v63, %v933_v58 }
 0x2f2   : > { %v962_v0 = vmul.f32 %v955_v50, %v6646_v34  ;;  %v963_v21 = vmul.f32 %v951_v46, %v6649_v35  ;;  %v956_v7 = vmul.f32 %v952_v24, %v6646_v34  ;;  %v957_v45 = vmul.f32 %v948_v41, %v6649_v35 }
 0x2f3   : > { %1181 = vmatpush1.bf16.msra.mxu0 %v5851_v56  ;;  %v6097_v56 = vld [vmem:[%s7919_s4 + $0x10] sm:$0xff]  }
 0x2f4   : > { %v5849_v5 = vpack.c.bf16 %v962_v0, %v960_v51  ;;  %v943_v13 = vpop.permute.xlu1 %942  ;;  %v5850_v48 = vpack.c.bf16 %v963_v21, %v961_v33 }
 0x2f5   : > { %v949_v2 = vsel %vm495_vm3, %v935_v60, %v943_v13  ;;  %v953_v6 = vsel %vm495_vm3, %v943_v13, %v935_v60 }
 0x2f6   : > { %v958_v49 = vmul.f32 %v953_v6, %v6646_v34  ;;  %v959_v12 = vmul.f32 %v949_v2, %v6649_v35  ;;  %1182 = vmatprep.subr.bf16.mxu0 %v5850_v48  ;;  %v6098_v34 = vld [vmem:[%s7919_s4 + $0x18] sm:$0xff]  }
 0x2f7   : > { %1183 = vmatpush1.bf16.msra.mxu0 %v5849_v5 }
 0x2f8   : > { %v5847_v55 = vpack.c.bf16 %v958_v49, %v956_v7  ;;  %v5848_v10 = vpack.c.bf16 %v959_v12, %v957_v45 }
 0x2fa   : > { %1184 = vmatprep.subr.bf16.mxu0 %v5848_v10 }
 0x2fb   : > { %1185 = vmatpush1.bf16.msra.mxu0 %v5847_v55 }
 0x2fd   : > { %v1087_v14 = vpop.permute.xlu0 %1086 }
 0x2fe   : > { %5295 = vmatmul.mubr.msk.bf16.vlgmr.msra.gmra.mxu0 %vm748_vm4, %v6097_v56 }
 0x2ff   : > { %1212 = vmatprep.mubr.bf16.mxu0 %v6374_v3 }
 0x301   : > { %v1092_v35 = vpop.permute.xlu1 %1091  ;;  %v1082_v26 = vpop.permute.xlu0 %1081 }
 0x305   : > { %v1077_v16 = vpop.permute.xlu1 %1076 }
 0x306   : > { %5296 = vmatmul.mubr.msk.bf16.gmra.mxu0 %vm748_vm4, %v6098_v34  ;;  %v6854_v0 = vpop.permute.xlu0 %1284 }
 0x307   : > { %2081 = vmatprep.mubr.bf16.mxu0 %v6374_v3 }
 0x30a   : > { %v6847_v54 = vpop.permute.xlu1 %1280  ;;  %v1273_v49 = vpop.permute.xlu0 %1272 }
 0x30f   : > { %v6852_v50 = vpop.permute.xlu1 %1304 }
 0x313   : > { %v6856_v45 = vpop.permute.xlu1 %1308 }
 0x318   : > { %v1277_v34 = vpop.permute.xlu1 %1276 }
 0x3be   : > { %v1204_v17 = vpop.f32.mrf.mxu0 }
 0x3bf   : > { %v1205_v20 = vadd.f32 %v1204_v17, %v1077_v16 }
 0x3c0   : > { %v1206_v62 = vpop.f32.mrf.mxu0 }
 0x3c1   : > { %v1231_v29 = vmin.f32 %v1205_v20, 0.0  ;;  %v1207_v36 = vadd.f32 %v1206_v62, %v1077_v16  ;;  %v1223_v12 = vmax.f32 %v1205_v20, 0.0  ;;  %v1297_v62 = vpop.permute.xlu0 %1296  ;;  %v1301_v20 = vpop.permute.xlu1 %1300 }
 0x3c2   : > { %v1208_v44 = vpop.f32.mrf.mxu0 }
 0x3c3   : > { %v1239_v4 = vmul.f32 1.442695, %v1231_v29  ;;  %v1232_v59 = vmin.f32 %v1207_v36, 0.0  ;;  %v1209_v25 = vadd.f32 %v1208_v44, %v1082_v26  ;;  %v1224_v44 = vmax.f32 %v1207_v36, 0.0 }
 0x3c4   : > { %v1210_v9 = vpop.f32.mrf.mxu0 }
 0x3c5   : > { %6135 = vpow2.f32 %v1239_v4  ;;  %v1233_v18 = vmin.f32 %v1209_v25, 0.0  ;;  %v1241_v57 = vmul.f32 1.442695, %v1232_v59  ;;  %v6849_v22 = vadd.f32 %v1210_v9, %v1082_v26 }
 0x3c6   : > { %v1214_v60 = vpop.f32.mrf.mxu0  ;;  %v1225_v16 = vmax.f32 %v1209_v25, 0.0 }
 0x3c7   : > { %v1243_v58 = vmul.f32 1.442695, %v1233_v18  ;;  %v1215_v61 = vadd.f32 %v1214_v60, %v1087_v14  ;;  %v1234_v52 = vmin.f32 %v6849_v22, 0.0 }
 0x3c8   : > { %v1216_v53 = vpop.f32.mrf.mxu0 }
 0x3c9   : > { %6137 = vpow2.f32 %v1243_v58  ;;  %v1235_v63 = vmin.f32 %v1215_v61, 0.0  ;;  %v1217_v46 = vadd.f32 %v1216_v53, %v1087_v14  ;;  %v1245_v51 = vmul.f32 1.442695, %v1234_v52 }
 0x3ca   : > { %6139 = vpow2.f32 %v1241_v57  ;;  %v1218_v33 = vpop.f32.mrf.mxu0  ;;  %v1227_v59 = vmax.f32 %v1215_v61, 0.0 }
 0x3cb   : > { %v1247_v21 = vmul.f32 1.442695, %v1235_v63  ;;  %v1236_v41 = vmin.f32 %v1217_v46, 0.0  ;;  %v1219_v24 = vadd.f32 %v1218_v33, %v1092_v35  ;;  %v1228_v52 = vmax.f32 %v1217_v46, 0.0 }
 0x3cc   : > { %v1220_v5 = vpop.f32.mrf.mxu0 }
 0x3cd   : > { %6141 = vpow2.f32 %v1247_v21  ;;  %v1249_v13 = vmul.f32 1.442695, %v1236_v41  ;;  %v1237_v48 = vmin.f32 %v1219_v24, 0.0  ;;  %v1221_v2 = vadd.f32 %v1220_v5, %v1092_v35 }
 0x3ce   : > { %6143 = vpow2.f32 %v1245_v51  ;;  %v1226_v51 = vmax.f32 %v6849_v22, 0.0  ;;  %v1229_v41 = vmax.f32 %v1219_v24, 0.0 }
 0x3cf   : > { %6145 = vpow2.f32 %v1249_v13  ;;  %v1251_v6 = vmul.f32 1.442695, %v1237_v48  ;;  %v1238_v7 = vmin.f32 %v1221_v2, 0.0 }
 0x3d1   : > { %6147 = vpow2.f32 %v1251_v6  ;;  %v1253_v10 = vmul.f32 1.442695, %v1238_v7  ;;  %v1230_v7 = vmax.f32 %v1221_v2, 0.0 }
 0x3d2   : > { %v6136_v55 = vpop.eup %6135 }
 0x3d3   : > { %v1255_v56 = vadd.f32 %v6136_v55, %v1223_v12  ;;  %6149 = vpow2.f32 %v1253_v10 }
 0x3d5   : > { %v5297_v14 = vadd.f32 -1.0, %v1255_v56 }
 0x3d6   : > { %v6138_v17 = vpop.eup %6137 }
 0x3d7   : > { %v6140_v26 = vpop.eup %6139  ;;  %v1257_v29 = vadd.f32 %v6138_v17, %v1225_v16  ;;  %v1287_v35 = vmul.f32 %v5297_v14, %v1273_v49 }
 0x3d8   : > { %v1256_v57 = vadd.f32 %v6140_v26, %v1224_v44 }
 0x3d9   : > { %v5299_v4 = vadd.f32 -1.0, %v1257_v29  ;;  %v1311_v9 = vadd.f32 %v1297_v62, %v1287_v35 }
 0x3da   : > { %v6142_v18 = vpop.eup %6141  ;;  %v5298_v5 = vadd.f32 -1.0, %v1256_v57 }
 0x3db   : > { %v6144_v60 = vpop.eup %6143  ;;  %v1259_v58 = vadd.f32 %v6142_v18, %v1227_v59  ;;  %v1289_v53 = vmul.f32 %v5299_v4, %v1277_v34  ;;  %v6859_v63 = vadd.f32 %v1311_v9, %v6516_v15 }
 0x3dc   : > { %v6146_v25 = vpop.eup %6145  ;;  %v1258_v13 = vadd.f32 %v6144_v60, %v1226_v51  ;;  %v1288_v56 = vmul.f32 %v5298_v5, %v1273_v49 }
 0x3dd   : > { %v5301_v33 = vadd.f32 -1.0, %v1259_v58  ;;  %v1260_v21 = vadd.f32 %v6146_v25, %v1228_v52  ;;  %v1313_v36 = vadd.f32 %v1301_v20, %v1289_v53  ;;  %1437 = vrot.lane.b32.xlu1 %v6859_v63, %s6379_s27 }
 0x3de   : > { %v6148_v61 = vpop.eup %6147  ;;  %v5300_v14 = vadd.f32 -1.0, %v1258_v13  ;;  %v1312_v35 = vadd.f32 %v1297_v62, %v1288_v56  ;;  %v5305_v62 = vld [vmem:[%s7916_s1 + $0x4] sm:$0xf] }
 0x3df   : > { %v5302_v48 = vadd.f32 -1.0, %v1260_v21  ;;  %v1291_v46 = vmul.f32 %v5301_v33, %v6847_v54  ;;  %v1261_v6 = vadd.f32 %v6148_v61, %v1229_v41  ;;  %v6866_v15 = vadd.f32 %v1313_v36, %v6520_v19 }
 0x3e0   : > { %v6150_v22 = vpop.eup %6149  ;;  %v1465_v9 = vrot.slane %v5305_v62, %v6588_v42  ;;  %v1469_v18 = vrot.slane %v5305_v62, %v6591_v43 }
 0x3e1   : > { %v1292_v12 = vmul.f32 %v5302_v48, %v6847_v54  ;;  %v5303_v24 = vadd.f32 -1.0, %v1261_v6  ;;  %v1315_v55 = vadd.f32 %v6852_v50, %v1291_v46  ;;  %1439 = vrot.lane.b32.xlu0 %v6866_v15, %s6379_s27  ;;  %v1262_v10 = vadd.f32 %v6150_v22, %v1230_v7 }
 0x3e2   : > { %v6950_v60 = vrot.slane %v1465_v9, %v6588_v42  ;;  %v6953_v58 = vrot.slane %v1469_v18, %v6588_v42 }
 0x3e3   : > { %v1316_v16 = vadd.f32 %v6852_v50, %v1292_v12  ;;  %v6874_v17 = vadd.f32 %v1315_v55, %v6524_v23  ;;  %v1293_v19 = vmul.f32 %v5303_v24, %v6854_v0  ;;  %v5304_v2 = vadd.f32 -1.0, %v1262_v10 }
 0x3e4   : > { %v1290_v50 = vmul.f32 %v5300_v14, %v1277_v34 }
 0x3e5   : > { %v1317_v26 = vadd.f32 %v6856_v45, %v1293_v19  ;;  %1441 = vrot.lane.b32.xlu1 %v6874_v17, %s6379_s27  ;;  %v1294_v54 = vmul.f32 %v5304_v2, %v6854_v0  ;;  %v6882_v29 = vadd.f32 %v1316_v16, %v6528_v27  ;;  %v6896_v0 = vadd.f32 %v1312_v35, %v6536_v30  ;;  %v5320_v30 = vld [vmem:[%s7920_s5 + $0x50] sm:$0xff] }
 0x3e6   : > { %v1314_v27 = vadd.f32 %v1301_v20, %v1290_v50  ;;  %v1390_v50 = vrot.slane %v5305_v62, %v6632_v11 }
 0x3e7   : > { %v6885_v49 = vadd.f32 %v1317_v26, %v6530_v28  ;;  %v1318_v23 = vadd.f32 %v6856_v45, %v1294_v54  ;;  %v5319_v45 = vld [vmem:[%s7920_s5 + $0x48] sm:$0xff]  ;;  %v1386_v54 = vrot.slane %v5305_v62, %v6625_v8 }
 0x3e8   : > { %v6903_v28 = vadd.f32 %v1314_v27, %v6544_v32  ;;  %v5318_v32 = vld [vmem:[%s7920_s5 + $0x40] sm:$0xff] }
 0x3e9   : > { %1443 = vrot.lane.b32.xlu0 %v6885_v49, %s6379_s27  ;;  %1449 = vrot.lane.b32.xlu1 %v6882_v29, %s6379_s27  ;;  %v6893_v44 = vadd.f32 %v1318_v23, %v6538_v31  ;;  %v5321_v31 = vld [vmem:[%s7920_s5 + $0x58] sm:$0xff] }
 0x3eb   : > { %v5866_v35 = vpack.c.bf16 %v6893_v44, %v6882_v29 }
 0x3ed   : > { %1451 = vrot.lane.b32.xlu0 %v6893_v44, %s6379_s27  ;;  %1445 = vrot.lane.b32.xlu1 %v6896_v0, %s6379_s27 }
 0x3f1   : > { %1447 = vrot.lane.b32.xlu0 %v6903_v28, %s6379_s27  ;;  %1361 = vrot.lane.b32.xlu1 %v6874_v17, %s6380_s28 }
 0x3f5   : > { %1363 = vrot.lane.b32.xlu0 %v6885_v49, %s6380_s28  ;;  %1369 = vrot.lane.b32.xlu1 %v6882_v29, %s6380_s28 }
 0x3f9   : > { %1359 = vrot.lane.b32.xlu0 %v6866_v15, %s6380_s28  ;;  %1357 = vrot.lane.b32.xlu1 %v6859_v63, %s6380_s28 }
 0x3fd   : > { %1371 = vrot.lane.b32.xlu0 %v6893_v44, %s6380_s28  ;;  %1365 = vrot.lane.b32.xlu1 %v6896_v0, %s6380_s28 }
 0x401   : > { %1367 = vrot.lane.b32.xlu0 %v6903_v28, %s6380_s28  ;;  %1550 = vperm.xlu1 %6012, %v5320_v30  }
 0x405   : > { %1555 = vperm.xlu0 %6013, %v5321_v31   ;;  %1540 = vperm.xlu1 %6012, %v5318_v32  }
 0x409   : > { %6014 = vset.pattern.permute.xlu0 %v6377_v37  ;;  %1545 = vperm.xlu1 %6012, %v5319_v45  }
 0x40a   : > { %1744 = vperm.xlu0 %6014, %v5320_v30  }
 0x40d   : > { %6015 = vset.pattern.permute.xlu1 %v6377_v37 }
 0x40e   : > { %6017 = vset.pattern.permute.xlu0 %v6378_v38  ;;  %1748 = vperm.xlu1 %6015, %v5321_v31  }
 0x40f   : > { %1772 = vperm.xlu0 %6017, %v5321_v31   ;;  %v6987_v31 = vrot.slane %v1386_v54, %v6625_v8 }
 0x412   : > { %6016 = vset.pattern.permute.xlu1 %v6378_v38 }
 0x413   : > { %1760 = vperm.xlu0 %6017, %v5318_v32   ;;  %1768 = vperm.xlu1 %6016, %v5320_v30   ;;  %v5865_v30 = vpack.c.bf16 %v6885_v49, %v6874_v17 }
 0x417   : > { %6020 = vset.pattern.permute.xlu0 %v6374_v3  ;;  %6018 = vset.pattern.permute.xlu1 %v6377_v37 }
 0x418   : > { %1736 = vperm.xlu1 %6018, %v5318_v32   ;;  %v6990_v32 = vrot.slane %v1390_v50, %v6625_v8 }
 0x41c   : > { %1740 = vperm.xlu1 %6018, %v5319_v45  }
 0x420   : > { %6019 = vset.pattern.permute.xlu1 %v6378_v38 }
 0x421   : > { %1764 = vperm.xlu1 %6019, %v5319_v45   ;;  %v5864_v45 = vpack.c.bf16 %v6903_v28, %v6896_v0 }
 0x425   : > { %6021 = vset.pattern.permute.xlu1 %v6374_v3 }
 0x44f   : > { %v1438_v34 = vpop.permute.xlu1 %1437 }
 0x453   : > { %v1440_v4 = vpop.permute.xlu0 %1439 }
 0x457   : > { %v1442_v59 = vpop.permute.xlu1 %1441 }
 0x45b   : > { %v1444_v57 = vpop.permute.xlu0 %1443  ;;  %v1450_v20 = vpop.permute.xlu1 %1449 }
 0x45c   : > { %v1456_v52 = vsel %vm1453_vm5, %v1442_v59, %v1450_v20  ;;  %v1460_v53 = vsel %vm1453_vm5, %v1450_v20, %v1442_v59 }
 0x45d   : > { %v1484_v41 = vmul.f32 %v6950_v60, %v1456_v52  ;;  %v1485_v36 = vmul.f32 %v6953_v58, %v1460_v53 }
 0x45f   : > { %v1452_v25 = vpop.permute.xlu0 %1451  ;;  %v1446_v51 = vpop.permute.xlu1 %1445 }
 0x460   : > { %v1457_v33 = vsel %vm1453_vm5, %v1444_v57, %v1452_v25  ;;  %v1461_v21 = vsel %vm1453_vm5, %v1452_v25, %v1444_v57  ;;  %v1454_v13 = vsel %vm1453_vm5, %v1438_v34, %v1446_v51  ;;  %v1458_v48 = vsel %vm1453_vm5, %v1446_v51, %v1438_v34 }
 0x461   : > { %v1486_v61 = vmul.f32 %v6950_v60, %v1457_v33  ;;  %v1487_v5 = vmul.f32 %v6953_v58, %v1461_v21  ;;  %v1480_v55 = vmul.f32 %v6950_v60, %v1454_v13  ;;  %v1481_v10 = vmul.f32 %v6953_v58, %v1458_v48 }
 0x462   : > { %v5863_v57 = vpack.c.bf16 %v6866_v15, %v6859_v63 }
 0x463   : > { %v5869_v46 = vpack.c.bf16 %v1486_v61, %v1484_v41  ;;  %v1448_v6 = vpop.permute.xlu0 %1447  ;;  %v1362_v7 = vpop.permute.xlu1 %1361  ;;  %v5870_v22 = vpack.c.bf16 %v1487_v5, %v1485_v36 }
 0x464   : > { %v1455_v12 = vsel %vm1453_vm5, %v1440_v4, %v1448_v6  ;;  %v1459_v24 = vsel %vm1453_vm5, %v1448_v6, %v1440_v4 }
 0x465   : > { %v1482_v56 = vmul.f32 %v6950_v60, %v1455_v12  ;;  %v1483_v14 = vmul.f32 %v6953_v58, %v1459_v24  ;;  %1638 = vmatprep.subr.bf16.mxu1 %v5870_v22  ;;  %v6099_v12 = vld [vmem:[%s7919_s4 + $0x20] sm:$0xff]   ;;  %v6100_v24 = vld [vmem:[%s7919_s4 + $0x28] sm:$0xff]  }
 0x466   : > { %1639 = vmatpush1.bf16.msra.mxu1 %v5869_v46 }
 0x467   : > { %v5867_v16 = vpack.c.bf16 %v1482_v56, %v1480_v55  ;;  %v1364_v19 = vpop.permute.xlu0 %1363  ;;  %v1370_v2 = vpop.permute.xlu1 %1369  ;;  %v5868_v26 = vpack.c.bf16 %v1483_v14, %v1481_v10 }
 0x468   : > { %v1376_v34 = vsel %vm1373_vm6, %v1362_v7, %v1370_v2  ;;  %v1380_v62 = vsel %vm1373_vm6, %v1370_v2, %v1362_v7 }
 0x469   : > { %1640 = vmatprep.subr.bf16.mxu1 %v5868_v26  ;;  %v1405_v20 = vmul.f32 %v6987_v31, %v1380_v62  ;;  %v1406_v52 = vmul.f32 %v6990_v32, %v1376_v34 }
 0x46a   : > { %1641 = vmatpush1.bf16.msra.mxu1 %v5867_v16 }
 0x46b   : > { %v1360_v23 = vpop.permute.xlu0 %1359  ;;  %1642 = vmatprep.subr.bf16.mxu1 %v5866_v35  ;;  %v1358_v27 = vpop.permute.xlu1 %1357 }
 0x46e   : > { %1643 = vmatpush1.bf16.msra.mxu1 %v5865_v30 }
 0x46f   : > { %v1372_v4 = vpop.permute.xlu0 %1371  ;;  %1644 = vmatprep.subr.bf16.mxu1 %v5864_v45  ;;  %v1366_v59 = vpop.permute.xlu1 %1365 }
 0x470   : > { %v1377_v9 = vsel %vm1373_vm6, %v1364_v19, %v1372_v4  ;;  %v1381_v18 = vsel %vm1373_vm6, %v1372_v4, %v1364_v19  ;;  %v1374_v51 = vsel %vm1373_vm6, %v1358_v27, %v1366_v59  ;;  %v1378_v33 = vsel %vm1373_vm6, %v1366_v59, %v1358_v27 }
 0x471   : > { %v1407_v53 = vmul.f32 %v6987_v31, %v1381_v18  ;;  %v1408_v25 = vmul.f32 %v6990_v32, %v1377_v9  ;;  %v1401_v13 = vmul.f32 %v6987_v31, %v1378_v33  ;;  %v1402_v48 = vmul.f32 %v6990_v32, %v1374_v51 }
 0x472   : > { %1645 = vmatpush1.bf16.msra.mxu1 %v5863_v57 }
 0x473   : > { %v5861_v21 = vpack.c.bf16 %v1407_v53, %v1405_v20  ;;  %v1368_v41 = vpop.permute.xlu0 %1367  ;;  %v5862_v36 = vpack.c.bf16 %v1408_v25, %v1406_v52 }
 0x474   : > { %v1375_v61 = vsel %vm1373_vm6, %v1360_v23, %v1368_v41  ;;  %v1379_v5 = vsel %vm1373_vm6, %v1368_v41, %v1360_v23 }
 0x475   : > { %v1403_v46 = vmul.f32 %v6987_v31, %v1379_v5  ;;  %v1404_v6 = vmul.f32 %v6990_v32, %v1375_v61  ;;  %1646 = vmatprep.subr.bf16.mxu1 %v5862_v36 }
 0x476   : > { %1647 = vmatpush1.bf16.msra.mxu1 %v5861_v21 }
 0x477   : > { %v5859_v7 = vpack.c.bf16 %v1403_v46, %v1401_v13  ;;  %v5860_v22 = vpack.c.bf16 %v1404_v6, %v1402_v48 }
 0x479   : > { %1648 = vmatprep.subr.bf16.mxu1 %v5860_v22 }
 0x47a   : > { %1649 = vmatpush1.bf16.msra.mxu1 %v5859_v7 }
 0x47c   : > { %v1551_v55 = vpop.permute.xlu1 %1550 }
 0x47d   : > { %5340 = vmatmul.mubr.msk.bf16.vlgmr.msra.gmra.mxu1 %vm748_vm4, %v6099_v12 }
 0x47e   : > { %1676 = vmatprep.mubr.bf16.mxu1 %v6374_v3 }
 0x480   : > { %v1541_v10 = vpop.permute.xlu1 %1540  ;;  %v1556_v59 = vpop.permute.xlu0 %1555 }
 0x484   : > { %v1546_v56 = vpop.permute.xlu1 %1545 }
 0x485   : > { %5341 = vmatmul.mubr.msk.bf16.gmra.mxu1 %vm748_vm4, %v6100_v24  ;;  %v7034_v21 = vpop.permute.xlu0 %1744 }
 0x486   : > { %2520 = vmatprep.mubr.bf16.mxu1 %v6374_v3 }
 0x489   : > { %v7030_v50 = vpop.permute.xlu1 %1748 }
 0x48a   : > { %v1773_v12 = vpop.permute.xlu0 %1772 }
 0x48e   : > { %v7032_v52 = vpop.permute.xlu1 %1768 }
 0x493   : > { %v1737_v6 = vpop.permute.xlu1 %1736 }
 0x53d   : > { %v1668_v14 = vpop.f32.mrf.mxu1 }
 0x53e   : > { %v1669_v16 = vadd.f32 %v1668_v14, %v1541_v10 }
 0x53f   : > { %v1670_v19 = vpop.f32.mrf.mxu1 }
 0x540   : > { %v1695_v2 = vmin.f32 %v1669_v16, 0.0  ;;  %v1671_v26 = vadd.f32 %v1670_v19, %v1541_v10  ;;  %v1687_v24 = vmax.f32 %v1669_v16, 0.0 }
 0x541   : > { %v1672_v54 = vpop.f32.mrf.mxu1 }
 0x542   : > { %v1703_v35 = vmul.f32 1.442695, %v1695_v2  ;;  %v1696_v23 = vmin.f32 %v1671_v26, 0.0  ;;  %v1673_v27 = vadd.f32 %v1672_v54, %v1546_v56  ;;  %v1688_v14 = vmax.f32 %v1671_v26, 0.0  ;;  %v1741_v2 = vpop.permute.xlu1 %1740 }
 0x543   : > { %v1674_v30 = vpop.f32.mrf.mxu1 }
 0x544   : > { %6151 = vpow2.f32 %v1703_v35  ;;  %v1705_v45 = vmul.f32 1.442695, %v1696_v23  ;;  %v1697_v34 = vmin.f32 %v1673_v27, 0.0  ;;  %v1675_v62 = vadd.f32 %v1674_v30, %v1546_v56 }
 0x545   : > { %v1678_v4 = vpop.f32.mrf.mxu1  ;;  %v1689_v23 = vmax.f32 %v1673_v27, 0.0 }
 0x546   : > { %6153 = vpow2.f32 %v1705_v45  ;;  %v1707_v9 = vmul.f32 1.442695, %v1697_v34  ;;  %v1679_v18 = vadd.f32 %v1678_v4, %v1551_v55  ;;  %v1698_v57 = vmin.f32 %v1675_v62, 0.0  ;;  %v1761_v45 = vpop.permute.xlu0 %1760  ;;  %v1765_v26 = vpop.permute.xlu1 %1764 }
 0x547   : > { %v1680_v20 = vpop.f32.mrf.mxu1 }
 0x548   : > { %6155 = vpow2.f32 %v1707_v9  ;;  %v1699_v53 = vmin.f32 %v1679_v18, 0.0  ;;  %v1681_v25 = vadd.f32 %v1680_v20, %v1551_v55  ;;  %v1709_v51 = vmul.f32 1.442695, %v1698_v57 }
 0x549   : > { %v1682_v33 = vpop.f32.mrf.mxu1  ;;  %v1690_v9 = vmax.f32 %v1675_v62, 0.0  ;;  %v1691_v16 = vmax.f32 %v1679_v18, 0.0 }
 0x54a   : > { %v1711_v41 = vmul.f32 1.442695, %v1699_v53  ;;  %v1700_v36 = vmin.f32 %v1681_v25, 0.0  ;;  %v1683_v61 = vadd.f32 %v1682_v33, %v1556_v59  ;;  %6157 = vpow2.f32 %v1709_v51 }
 0x54b   : > { %v1684_v5 = vpop.f32.mrf.mxu1 }
 0x54c   : > { %6159 = vpow2.f32 %v1711_v41  ;;  %v1713_v13 = vmul.f32 1.442695, %v1700_v36  ;;  %v1701_v48 = vmin.f32 %v1683_v61, 0.0  ;;  %v1685_v46 = vadd.f32 %v1684_v5, %v1556_v59 }
 0x54d   : > { %v1692_v36 = vmax.f32 %v1681_v25, 0.0  ;;  %v1693_v62 = vmax.f32 %v1683_v61, 0.0 }
 0x54e   : > { %6161 = vpow2.f32 %v1713_v13  ;;  %v1715_v7 = vmul.f32 1.442695, %v1701_v48  ;;  %v1702_v22 = vmin.f32 %v1685_v46, 0.0 }
 0x550   : > { %6163 = vpow2.f32 %v1715_v7  ;;  %v1717_v10 = vmul.f32 1.442695, %v1702_v22 }
 0x551   : > { %v6152_v55 = vpop.eup %6151 }
 0x552   : > { %v1719_v56 = vadd.f32 %v6152_v55, %v1687_v24  ;;  %6165 = vpow2.f32 %v1717_v10 }
 0x553   : > { %v6154_v19 = vpop.eup %6153 }
 0x554   : > { %v5342_v54 = vadd.f32 -1.0, %v1719_v56  ;;  %v1720_v35 = vadd.f32 %v6154_v19, %v1688_v14  ;;  %v1694_v19 = vmax.f32 %v1685_v46, 0.0 }
 0x555   : > { %v6156_v30 = vpop.eup %6155 }
 0x556   : > { %v1721_v34 = vadd.f32 %v6156_v30, %v1689_v23  ;;  %v1751_v4 = vmul.f32 %v5342_v54, %v1737_v6  ;;  %v5343_v59 = vadd.f32 -1.0, %v1720_v35 }
 0x557   : > { %v6158_v57 = vpop.eup %6157 }
 0x558   : > { %v5344_v20 = vadd.f32 -1.0, %v1721_v34  ;;  %v7036_v53 = vadd.f32 %v1761_v45, %v1751_v4  ;;  %v1722_v33 = vadd.f32 %v6158_v57, %v1690_v9  ;;  %v1752_v48 = vmul.f32 %v5343_v59, %v1737_v6 }
 0x559   : > { %v6160_v51 = vpop.eup %6159 }
 0x55a   : > { %v1723_v41 = vadd.f32 %v6160_v51, %v1691_v16  ;;  %v1753_v5 = vmul.f32 %v5344_v20, %v1741_v2  ;;  %1871 = vrot.lane.b32.xlu0 %v7036_v53, %s6379_s27  ;;  %v5345_v13 = vadd.f32 -1.0, %v1722_v33  ;;  %v7047_v54 = vadd.f32 %v1761_v45, %v1752_v48  ;;  %v5363_v16 = vld [vmem:[%s7920_s5 + $0x68] sm:$0xff] }
 0x55b   : > { %v6162_v27 = vpop.eup %6161 }
 0x55c   : > { %v5346_v7 = vadd.f32 -1.0, %v1723_v41  ;;  %v1724_v22 = vadd.f32 %v6162_v27, %v1692_v36  ;;  %v7040_v24 = vadd.f32 %v1765_v26, %v1753_v5  ;;  %v1754_v55 = vmul.f32 %v5345_v13, %v1741_v2 }
 0x55d   : > { %v6164_v18 = vpop.eup %6163 }
 0x55e   : > { %v5347_v10 = vadd.f32 -1.0, %v1724_v22  ;;  %v1725_v56 = vadd.f32 %v6164_v18, %v1693_v62  ;;  %v1755_v14 = vmul.f32 %v5346_v7, %v7034_v21  ;;  %1873 = vrot.lane.b32.xlu1 %v7040_v24, %s6379_s27  ;;  %v5875_v25 = vpack.c.bf16 %v7040_v24, %v7036_v53 }
 0x55f   : > { %v7049_v6 = vadd.f32 %v1765_v26, %v1754_v55  ;;  %v6166_v61 = vpop.eup %6165 }
 0x560   : > { %v5348_v35 = vadd.f32 -1.0, %v1725_v56  ;;  %v1756_v23 = vmul.f32 %v5347_v10, %v7034_v21  ;;  %v7053_v2 = vadd.f32 %v7032_v52, %v1755_v14  ;;  %v1726_v30 = vadd.f32 %v6166_v61, %v1694_v19 }
 0x561   : > { %v5876_v34 = vpack.c.bf16 %v7049_v6, %v7047_v54 }
 0x562   : > { %v1757_v4 = vmul.f32 %v5348_v35, %v7030_v50  ;;  %1875 = vrot.lane.b32.xlu0 %v7053_v2, %s6379_s27  ;;  %v5349_v46 = vadd.f32 -1.0, %v1726_v30  ;;  %v7063_v59 = vadd.f32 %v7032_v52, %v1756_v23  ;;  %v5364_v52 = vld [vmem:[%s7920_s5 + $0x70] sm:$0xff] }
 0x564   : > { %v7060_v45 = vadd.f32 %v1773_v12, %v1757_v4  ;;  %v1758_v21 = vmul.f32 %v5349_v46, %v7030_v50  ;;  %v5365_v50 = vld [vmem:[%s7920_s5 + $0x78] sm:$0xff] }
 0x566   : > { %1877 = vrot.lane.b32.xlu1 %v7060_v45, %s6379_s27  ;;  %1883 = vrot.lane.b32.xlu0 %v7063_v59, %s6379_s27  ;;  %v5877_v9 = vpack.c.bf16 %v7060_v45, %v7053_v2  ;;  %v7072_v57 = vadd.f32 %v1773_v12, %v1758_v21  ;;  %v5362_v12 = vld [vmem:[%s7920_s5 + $0x60] sm:$0xff] }
 0x568   : > { %v5878_v20 = vpack.c.bf16 %v7072_v57, %v7063_v59 }
 0x56a   : > { %1885 = vrot.lane.b32.xlu1 %v7072_v57, %s6379_s27  ;;  %1879 = vrot.lane.b32.xlu0 %v7047_v54, %s6379_s27 }
 0x56e   : > { %1881 = vrot.lane.b32.xlu1 %v7049_v6, %s6379_s27  ;;  %1815 = vrot.lane.b32.xlu0 %v7053_v2, %s6380_s28  ;;  %s6383_s27 = smov [#allocation4]  }
 0x56f   : > { %s6315_s7 = sshll.u32 %s6383_s27, 4  ;;  %s6316_s7 = int_to_ptr.vmem [resolvable:$false] %s6315_s7 }
 0x570   : > { %s6317_s13 = scalar_lea.vmem %s6316_s7, 64 }
 0x572   : > { %1817 = vrot.lane.b32.xlu1 %v7060_v45, %s6380_s28  ;;  %1823 = vrot.lane.b32.xlu0 %v7063_v59, %s6380_s28 }
 0x576   : > { %1813 = vrot.lane.b32.xlu1 %v7040_v24, %s6380_s28  ;;  %1811 = vrot.lane.b32.xlu0 %v7036_v53, %s6380_s28 }
 0x57a   : > { %1825 = vrot.lane.b32.xlu1 %v7072_v57, %s6380_s28  ;;  %1819 = vrot.lane.b32.xlu0 %v7047_v54, %s6380_s28 }
 0x57e   : > { %1821 = vrot.lane.b32.xlu1 %v7049_v6, %s6380_s28  ;;  %1965 = vperm.xlu0 %6020, %v5364_v52  }
 0x582   : > { %1970 = vperm.xlu1 %6021, %v5365_v50   ;;  %1960 = vperm.xlu0 %6020, %v5363_v16  }
 0x586   : > { %1955 = vperm.xlu1 %6021, %v5362_v12   ;;  %6023 = vset.pattern.permute.xlu0 %v6377_v37 }
 0x587   : > { %2163 = vperm.xlu0 %6023, %v5365_v50  }
 0x58a   : > { %6022 = vset.pattern.permute.xlu1 %v6377_v37 }
 0x58b   : > { %2159 = vperm.xlu1 %6022, %v5364_v52   ;;  %2151 = vperm.xlu0 %6023, %v5362_v12  }
 0x58f   : > { %6024 = vset.pattern.permute.xlu1 %v6378_v38  ;;  %6026 = vset.pattern.permute.xlu0 %v6378_v38 }
 0x590   : > { %2183 = vperm.xlu1 %6024, %v5364_v52   ;;  %2175 = vperm.xlu0 %6026, %v5362_v12  }
 0x594   : > { %2187 = vperm.xlu1 %6024, %v5365_v50   ;;  %6029 = vset.pattern.permute.xlu0 %v6374_v3 }
 0x598   : > { %6025 = vset.pattern.permute.xlu1 %v6377_v37 }
 0x599   : > { %2155 = vperm.xlu1 %6025, %v5363_v16  }
 0x59d   : > { %6027 = vset.pattern.permute.xlu1 %v6378_v38 }
 0x59e   : > { %2179 = vperm.xlu1 %6027, %v5363_v16  }
 0x5a2   : > { %6028 = vset.pattern.permute.xlu1 %v6374_v3 }
 0x5cc   : > { %v1872_v51 = vpop.permute.xlu0 %1871 }
 0x5d0   : > { %v1874_v33 = vpop.permute.xlu1 %1873 }
 0x5d4   : > { %v1876_v26 = vpop.permute.xlu0 %1875 }
 0x5d8   : > { %v1878_v41 = vpop.permute.xlu1 %1877  ;;  %v1884_v36 = vpop.permute.xlu0 %1883 }
 0x5d9   : > { %v1889_v5 = vsel %vm1453_vm5, %v1876_v26, %v1884_v36  ;;  %v1893_v27 = vsel %vm1453_vm5, %v1884_v36, %v1876_v26 }
 0x5da   : > { %v1899_v62 = vmul.f32 %v1889_v5, %v6950_v60  ;;  %v1900_v18 = vmul.f32 %v1893_v27, %v6953_v58 }
 0x5dc   : > { %v1886_v13 = vpop.permute.xlu1 %1885  ;;  %v1880_v48 = vpop.permute.xlu0 %1879 }
 0x5dd   : > { %v1890_v7 = vsel %vm1453_vm5, %v1878_v41, %v1886_v13  ;;  %v1894_v22 = vsel %vm1453_vm5, %v1886_v13, %v1878_v41  ;;  %v1887_v56 = vsel %vm1453_vm5, %v1872_v51, %v1880_v48  ;;  %v1891_v14 = vsel %vm1453_vm5, %v1880_v48, %v1872_v51 }
 0x5de   : > { %v1901_v55 = vmul.f32 %v1890_v7, %v6950_v60  ;;  %v1902_v10 = vmul.f32 %v1894_v22, %v6953_v58  ;;  %v1895_v46 = vmul.f32 %v1887_v56, %v6950_v60  ;;  %v1896_v21 = vmul.f32 %v1891_v14, %v6953_v58 }
 0x5e0   : > { %v5881_v19 = vpack.c.bf16 %v1901_v55, %v1899_v62  ;;  %v1882_v61 = vpop.permute.xlu1 %1881  ;;  %v1816_v35 = vpop.permute.xlu0 %1815  ;;  %v5882_v23 = vpack.c.bf16 %v1902_v10, %v1900_v18 }
 0x5e1   : > { %v1888_v30 = vsel %vm1453_vm5, %v1874_v33, %v1882_v61  ;;  %v1892_v4 = vsel %vm1453_vm5, %v1882_v61, %v1874_v33 }
 0x5e2   : > { %v1897_v50 = vmul.f32 %v1888_v30, %v6950_v60  ;;  %v1898_v52 = vmul.f32 %v1892_v4, %v6953_v58  ;;  %2053 = vmatprep.subr.bf16.mxu0 %v5882_v23 }
 0x5e3   : > { %2054 = vmatpush1.bf16.msra.mxu0 %v5881_v19 }
 0x5e4   : > { %v5879_v12 = vpack.c.bf16 %v1897_v50, %v1895_v46  ;;  %v1818_v16 = vpop.permute.xlu1 %1817  ;;  %v1824_v51 = vpop.permute.xlu0 %1823  ;;  %v5880_v26 = vpack.c.bf16 %v1898_v52, %v1896_v21 }
 0x5e5   : > { %v1829_v36 = vsel %vm1373_vm6, %v1816_v35, %v1824_v51  ;;  %v1833_v60 = vsel %vm1373_vm6, %v1824_v51, %v1816_v35 }
 0x5e6   : > { %2055 = vmatprep.subr.bf16.mxu0 %v5880_v26  ;;  %v1840_v27 = vmul.f32 %v1829_v36, %v6990_v32 }
 0x5e7   : > { %2056 = vmatpush1.bf16.msra.mxu0 %v5879_v12 }
 0x5e8   : > { %v1814_v41 = vpop.permute.xlu1 %1813  ;;  %2057 = vmatprep.subr.bf16.mxu0 %v5878_v20  ;;  %v1812_v33 = vpop.permute.xlu0 %1811  ;;  %v1839_v20 = vmul.f32 %v1833_v60, %v6987_v31 }
 0x5eb   : > { %2058 = vmatpush1.bf16.msra.mxu0 %v5877_v9 }
 0x5ec   : > { %v1826_v58 = vpop.permute.xlu1 %1825  ;;  %2059 = vmatprep.subr.bf16.mxu0 %v5876_v34  ;;  %v1820_v5 = vpop.permute.xlu0 %1819 }
 0x5ed   : > { %v1830_v59 = vsel %vm1373_vm6, %v1818_v16, %v1826_v58  ;;  %v1834_v57 = vsel %vm1373_vm6, %v1826_v58, %v1818_v16  ;;  %v1827_v45 = vsel %vm1373_vm6, %v1812_v33, %v1820_v5  ;;  %v1831_v54 = vsel %vm1373_vm6, %v1820_v5, %v1812_v33 }
 0x5ee   : > { %v1841_v13 = vmul.f32 %v1834_v57, %v6987_v31  ;;  %v1842_v2 = vmul.f32 %v1830_v59, %v6990_v32  ;;  %v1835_v22 = vmul.f32 %v1831_v54, %v6987_v31  ;;  %v1836_v62 = vmul.f32 %v1827_v45, %v6990_v32 }
 0x5ef   : > { %2060 = vmatpush1.bf16.msra.mxu0 %v5875_v25  ;;  %v6101_v25 = vld [vmem:[%s7919_s4 + $0x30] sm:$0xff]  }
 0x5f0   : > { %v5873_v6 = vpack.c.bf16 %v1841_v13, %v1839_v20  ;;  %v1822_v34 = vpop.permute.xlu1 %1821  ;;  %v5874_v9 = vpack.c.bf16 %v1842_v2, %v1840_v27 }
 0x5f1   : > { %v1828_v48 = vsel %vm1373_vm6, %v1814_v41, %v1822_v34  ;;  %v1832_v7 = vsel %vm1373_vm6, %v1822_v34, %v1814_v41 }
 0x5f2   : > { %v1837_v18 = vmul.f32 %v1832_v7, %v6987_v31  ;;  %v1838_v55 = vmul.f32 %v1828_v48, %v6990_v32  ;;  %2061 = vmatprep.subr.bf16.mxu0 %v5874_v9  ;;  %v6102_v31 = vld [vmem:[%s7919_s4 + $0x38] sm:$0xff]  }
 0x5f3   : > { %2062 = vmatpush1.bf16.msra.mxu0 %v5873_v6 }
 0x5f4   : > { %v5871_v53 = vpack.c.bf16 %v1837_v18, %v1835_v22  ;;  %v5872_v24 = vpack.c.bf16 %v1838_v55, %v1836_v62 }
 0x5f6   : > { %2063 = vmatprep.subr.bf16.mxu0 %v5872_v24 }
 0x5f7   : > { %2064 = vmatpush1.bf16.msra.mxu0 %v5871_v53 }
 0x5f9   : > { %v1966_v10 = vpop.permute.xlu0 %1965 }
 0x5fa   : > { %5384 = vmatmul.mubr.msk.bf16.vlgmr.msra.gmra.mxu0 %vm748_vm4, %v6101_v25 }
 0x5fb   : > { %2091 = vmatprep.mubr.bf16.mxu0 %v6374_v3 }
 0x5fd   : > { %v1971_v32 = vpop.permute.xlu1 %1970  ;;  %v1961_v35 = vpop.permute.xlu0 %1960 }
 0x601   : > { %v1956_v56 = vpop.permute.xlu1 %1955 }
 0x602   : > { %5385 = vmatmul.mubr.msk.bf16.gmra.mxu0 %vm748_vm4, %v6102_v31  ;;  %v7195_v13 = vpop.permute.xlu0 %2163 }
 0x603   : > { %2911 = vmatprep.mubr.bf16.mxu0 %v6374_v3 }
 0x606   : > { %v7188_v52 = vpop.permute.xlu1 %2159  ;;  %v2152_v18 = vpop.permute.xlu0 %2151 }
 0x60b   : > { %v7193_v57 = vpop.permute.xlu1 %2183 }
 0x60f   : > { %v7197_v62 = vpop.permute.xlu1 %2187 }
 0x614   : > { %v2156_v31 = vpop.permute.xlu1 %2155 }
 0x6ba   : > { %v2083_v14 = vpop.f32.mrf.mxu0 }
 0x6bb   : > { %v2084_v19 = vadd.f32 %v2083_v14, %v1956_v56 }
 0x6bc   : > { %v2085_v61 = vpop.f32.mrf.mxu0 }
 0x6bd   : > { %v2110_v23 = vmin.f32 %v2084_v19, 0.0  ;;  %v2086_v30 = vadd.f32 %v2085_v61, %v1956_v56  ;;  %v2102_v55 = vmax.f32 %v2084_v19, 0.0  ;;  %v2176_v61 = vpop.permute.xlu0 %2175  ;;  %v2180_v19 = vpop.permute.xlu1 %2179 }
 0x6be   : > { %v2087_v4 = vpop.f32.mrf.mxu0 }
 0x6bf   : > { %v2118_v46 = vmul.f32 1.442695, %v2110_v23  ;;  %v2111_v21 = vmin.f32 %v2086_v30, 0.0  ;;  %v2088_v50 = vadd.f32 %v2087_v4, %v1961_v35  ;;  %v2103_v4 = vmax.f32 %v2086_v30, 0.0 }
 0x6c0   : > { %v2089_v12 = vpop.f32.mrf.mxu0 }
 0x6c1   : > { %6167 = vpow2.f32 %v2118_v46  ;;  %v2112_v16 = vmin.f32 %v2088_v50, 0.0  ;;  %v2120_v51 = vmul.f32 1.442695, %v2111_v21  ;;  %v7190_v26 = vadd.f32 %v2089_v12, %v1961_v35 }
 0x6c2   : > { %v2093_v41 = vpop.f32.mrf.mxu0 }
 0x6c3   : > { %v2122_v33 = vmul.f32 1.442695, %v2112_v16  ;;  %v2094_v36 = vadd.f32 %v2093_v41, %v1966_v10  ;;  %v2113_v60 = vmin.f32 %v7190_v26, 0.0 }
 0x6c4   : > { %v2095_v58 = vpop.f32.mrf.mxu0 }
 0x6c5   : > { %6169 = vpow2.f32 %v2122_v33  ;;  %v2114_v5 = vmin.f32 %v2094_v36, 0.0  ;;  %v2096_v59 = vadd.f32 %v2095_v58, %v1966_v10  ;;  %v2124_v20 = vmul.f32 1.442695, %v2113_v60 }
 0x6c6   : > { %6171 = vpow2.f32 %v2120_v51  ;;  %v2097_v27 = vpop.f32.mrf.mxu0  ;;  %v2104_v10 = vmax.f32 %v2088_v50, 0.0  ;;  %v2106_v21 = vmax.f32 %v2094_v36, 0.0 }
 0x6c7   : > { %v2126_v2 = vmul.f32 1.442695, %v2114_v5  ;;  %v2115_v45 = vmin.f32 %v2096_v59, 0.0  ;;  %v2098_v54 = vadd.f32 %v2097_v27, %v1971_v32  ;;  %v2107_v60 = vmax.f32 %v2096_v59, 0.0 }
 0x6c8   : > { %v2099_v6 = vpop.f32.mrf.mxu0 }
 0x6c9   : > { %6173 = vpow2.f32 %v2126_v2  ;;  %v2128_v34 = vmul.f32 1.442695, %v2115_v45  ;;  %v2116_v9 = vmin.f32 %v2098_v54, 0.0  ;;  %v2100_v48 = vadd.f32 %v2099_v6, %v1971_v32 }
 0x6ca   : > { %6175 = vpow2.f32 %v2124_v20  ;;  %v2105_v20 = vmax.f32 %v7190_v26, 0.0  ;;  %v2108_v45 = vmax.f32 %v2098_v54, 0.0 }
 0x6cb   : > { %6177 = vpow2.f32 %v2128_v34  ;;  %v2130_v7 = vmul.f32 1.442695, %v2116_v9  ;;  %v2117_v22 = vmin.f32 %v2100_v48, 0.0 }
 0x6cd   : > { %6179 = vpow2.f32 %v2130_v7  ;;  %v2132_v24 = vmul.f32 1.442695, %v2117_v22  ;;  %v2109_v22 = vmax.f32 %v2100_v48, 0.0 }
 0x6ce   : > { %v6168_v53 = vpop.eup %6167 }
 0x6cf   : > { %v2134_v25 = vadd.f32 %v6168_v53, %v2102_v55  ;;  %6181 = vpow2.f32 %v2132_v24 }
 0x6d1   : > { %v5386_v56 = vadd.f32 -1.0, %v2134_v25 }
 0x6d2   : > { %v6170_v14 = vpop.eup %6169 }
 0x6d3   : > { %v6172_v35 = vpop.eup %6171  ;;  %v2136_v23 = vadd.f32 %v6170_v14, %v2104_v10  ;;  %v2166_v32 = vmul.f32 %v5386_v56, %v2152_v18 }
 0x6d4   : > { %v2135_v51 = vadd.f32 %v6172_v35, %v2103_v4 }
 0x6d5   : > { %v5388_v46 = vadd.f32 -1.0, %v2136_v23  ;;  %v2190_v12 = vadd.f32 %v2176_v61, %v2166_v32 }
 0x6d6   : > { %v6174_v16 = vpop.eup %6173  ;;  %v5387_v34 = vadd.f32 -1.0, %v2135_v51 }
 0x6d7   : > { %v6176_v41 = vpop.eup %6175  ;;  %v2138_v33 = vadd.f32 %v6174_v16, %v2106_v21  ;;  %v2168_v58 = vmul.f32 %v5388_v46, %v2156_v31  ;;  %v7200_v5 = vadd.f32 %v2190_v12, %v6859_v63 }
 0x6d8   : > { %v6178_v50 = vpop.eup %6177  ;;  %v2137_v6 = vadd.f32 %v6176_v41, %v2105_v20  ;;  %v2167_v25 = vmul.f32 %v5387_v34, %v2152_v18 }
 0x6d9   : > { %v5390_v27 = vadd.f32 -1.0, %v2138_v33  ;;  %v2139_v2 = vadd.f32 %v6178_v50, %v2107_v60  ;;  %v2192_v30 = vadd.f32 %v2180_v19, %v2168_v58  ;;  %2236 = vrot.lane.b32.xlu1 %v7200_v5, %s6381_s25 }
 0x6da   : > { %v6180_v36 = vpop.eup %6179  ;;  %v5389_v10 = vadd.f32 -1.0, %v2137_v6  ;;  %v2191_v32 = vadd.f32 %v2176_v61, %v2167_v25  ;;  %v5394_v61 = vld [vmem:[%s7916_s1 + $0x8] sm:$0xf] }
 0x6db   : > { %v5391_v9 = vadd.f32 -1.0, %v2139_v2  ;;  %v2170_v59 = vmul.f32 %v5390_v27, %v7188_v52  ;;  %v2140_v7 = vadd.f32 %v6180_v36, %v2108_v45  ;;  %v7207_v63 = vadd.f32 %v2192_v30, %v6866_v15 }
 0x6dc   : > { %v6182_v26 = vpop.eup %6181  ;;  %v2319_v12 = vrot.slane %v5394_v61, %v6588_v42  ;;  %v2323_v16 = vrot.slane %v5394_v61, %v6591_v43 }
 0x6dd   : > { %v2171_v55 = vmul.f32 %v5391_v9, %v7188_v52  ;;  %v2194_v54 = vadd.f32 %v7193_v57, %v2170_v59  ;;  %v5392_v53 = vadd.f32 -1.0, %v2140_v7  ;;  %2238 = vrot.lane.b32.xlu0 %v7207_v63, %s6381_s25  ;;  %v2141_v24 = vadd.f32 %v6182_v26, %v2109_v22 }
 0x6de   : > { %v7275_v41 = vrot.slane %v2319_v12, %v6588_v42  ;;  %v7278_v33 = vrot.slane %v2323_v16, %v6588_v42 }
 0x6df   : > { %v2195_v56 = vadd.f32 %v7193_v57, %v2171_v55  ;;  %v7215_v14 = vadd.f32 %v2194_v54, %v6874_v17  ;;  %v2172_v15 = vmul.f32 %v5392_v53, %v7195_v13  ;;  %v5393_v48 = vadd.f32 -1.0, %v2141_v24 }
 0x6e0   : > { %v2169_v57 = vmul.f32 %v5389_v10, %v2156_v31  ;;  %v2269_v10 = vrot.slane %v5394_v61, %v6632_v11 }
 0x6e1   : > { %v2196_v35 = vadd.f32 %v7197_v62, %v2172_v15  ;;  %2240 = vrot.lane.b32.xlu1 %v7215_v14, %s6381_s25  ;;  %v2173_v52 = vmul.f32 %v5393_v48, %v7195_v13  ;;  %v7223_v23 = vadd.f32 %v2195_v56, %v6882_v29  ;;  %v7237_v13 = vadd.f32 %v2191_v32, %v6896_v0  ;;  %v5410_v0 = vld [vmem:[%s7920_s5 + $0x98] sm:$0xff] }
 0x6e2   : > { %v2193_v29 = vadd.f32 %v2180_v19, %v2169_v57 }
 0x6e3   : > { %v7226_v18 = vadd.f32 %v2196_v35, %v6885_v49  ;;  %v2197_v17 = vadd.f32 %v7197_v62, %v2173_v52  ;;  %v5407_v62 = vld [vmem:[%s7920_s5 + $0x80] sm:$0xff]  ;;  %v2265_v35 = vrot.slane %v5394_v61, %v6625_v8  ;;  %v7309_v52 = vrot.slane %v2269_v10, %v6625_v8 }
 0x6e4   : > { %v7244_v49 = vadd.f32 %v2193_v29, %v6903_v28  ;;  %v5408_v28 = vld [vmem:[%s7920_s5 + $0x88] sm:$0xff] }
 0x6e5   : > { %2242 = vrot.lane.b32.xlu0 %v7226_v18, %s6381_s25  ;;  %2248 = vrot.lane.b32.xlu1 %v7223_v23, %s6381_s25  ;;  %v7234_v4 = vadd.f32 %v2197_v17, %v6893_v44  ;;  %v5409_v44 = vld [vmem:[%s7920_s5 + $0x90] sm:$0xff]  ;;  %v5889_v57 = vpack.c.bf16 %v7226_v18, %v7215_v14  ;;  %v7317_v29 = vrot.slane %v2265_v35, %v6625_v8 }
 0x6e6   : > { %v5888_v17 = vpack.c.bf16 %v7244_v49, %v7237_v13 }
 0x6e7   : > { %v5890_v48 = vpack.c.bf16 %v7234_v4, %v7223_v23 }
 0x6e9   : > { %2250 = vrot.lane.b32.xlu0 %v7234_v4, %s6381_s25  ;;  %2244 = vrot.lane.b32.xlu1 %v7237_v13, %s6381_s25 }
 0x6ed   : > { %2246 = vrot.lane.b32.xlu0 %v7244_v49, %s6381_s25  ;;  %2404 = vperm.xlu1 %6028, %v5409_v44  }
 0x6f1   : > { %2409 = vperm.xlu0 %6029, %v5410_v0   ;;  %2394 = vperm.xlu1 %6028, %v5407_v62  }
 0x6f5   : > { %6030 = vset.pattern.permute.xlu0 %v6377_v37  ;;  %2399 = vperm.xlu1 %6028, %v5408_v28  }
 0x6f6   : > { %2598 = vperm.xlu0 %6030, %v5409_v44  }
 0x6f9   : > { %6031 = vset.pattern.permute.xlu1 %v6377_v37 }
 0x6fa   : > { %6033 = vset.pattern.permute.xlu0 %v6378_v38  ;;  %2602 = vperm.xlu1 %6031, %v5410_v0  }
 0x6fb   : > { %2626 = vperm.xlu0 %6033, %v5410_v0  }
 0x6fe   : > { %6032 = vset.pattern.permute.xlu1 %v6378_v38 }
 0x6ff   : > { %2614 = vperm.xlu0 %6033, %v5407_v62   ;;  %2622 = vperm.xlu1 %6032, %v5409_v44  }
 0x703   : > { %6036 = vset.pattern.permute.xlu0 %v6374_v3  ;;  %6034 = vset.pattern.permute.xlu1 %v6377_v37 }
 0x704   : > { %2590 = vperm.xlu1 %6034, %v5407_v62   ;;  %v5887_v62 = vpack.c.bf16 %v7207_v63, %v7200_v5 }
 0x708   : > { %2594 = vperm.xlu1 %6034, %v5408_v28  }
 0x70c   : > { %6035 = vset.pattern.permute.xlu1 %v6378_v38 }
 0x70d   : > { %2618 = vperm.xlu1 %6035, %v5408_v28  }
 0x711   : > { %6037 = vset.pattern.permute.xlu1 %v6374_v3 }
 0x74b   : > { %v2237_v31 = vpop.permute.xlu1 %2236 }
 0x74f   : > { %v2239_v46 = vpop.permute.xlu0 %2238 }
 0x753   : > { %v2241_v21 = vpop.permute.xlu1 %2240 }
 0x757   : > { %v2243_v51 = vpop.permute.xlu0 %2242  ;;  %v2249_v19 = vpop.permute.xlu1 %2248 }
 0x758   : > { %v2255_v60 = vsel %vm2252_vm7, %v2241_v21, %v2249_v19  ;;  %v2259_v58 = vsel %vm2252_vm7, %v2249_v19, %v2241_v21 }
 0x759   : > { %v2338_v45 = vmul.f32 %v7275_v41, %v2255_v60  ;;  %v2339_v30 = vmul.f32 %v7278_v33, %v2259_v58  ;;  %v2285_v44 = vmul.f32 %v7309_v52, %v2255_v60  ;;  %v2284_v61 = vmul.f32 %v7317_v29, %v2259_v58  ;;  %v6103_v60 = vld [vmem:[%s7919_s4 + $0x40] sm:$0xff]   ;;  %v6104_v58 = vld [vmem:[%s7919_s4 + $0x48] sm:$0xff]  }
 0x75b   : > { %v2251_v50 = vpop.permute.xlu0 %2250  ;;  %v2245_v20 = vpop.permute.xlu1 %2244 }
 0x75c   : > { %v2256_v27 = vsel %vm2252_vm7, %v2243_v51, %v2251_v50  ;;  %v2260_v2 = vsel %vm2252_vm7, %v2251_v50, %v2243_v51  ;;  %v2253_v34 = vsel %vm2252_vm7, %v2237_v31, %v2245_v20  ;;  %v2257_v9 = vsel %vm2252_vm7, %v2245_v20, %v2237_v31 }
 0x75d   : > { %v2340_v36 = vmul.f32 %v7275_v41, %v2256_v27  ;;  %v2341_v6 = vmul.f32 %v7278_v33, %v2260_v2  ;;  %v2334_v54 = vmul.f32 %v7275_v41, %v2253_v34  ;;  %v2335_v53 = vmul.f32 %v7278_v33, %v2257_v9 }
 0x75e   : > { %v2287_v32 = vmul.f32 %v7309_v52, %v2256_v27  ;;  %v2286_v0 = vmul.f32 %v7317_v29, %v2260_v2  ;;  %v2280_v51 = vmul.f32 %v7317_v29, %v2257_v9 }
 0x75f   : > { %v5893_v59 = vpack.c.bf16 %v2340_v36, %v2338_v45  ;;  %v2247_v7 = vpop.permute.xlu0 %2246  ;;  %v5894_v22 = vpack.c.bf16 %v2341_v6, %v2339_v30 }
 0x760   : > { %v2254_v26 = vsel %vm2252_vm7, %v2239_v46, %v2247_v7  ;;  %v2258_v55 = vsel %vm2252_vm7, %v2247_v7, %v2239_v46  ;;  %v5886_v31 = vpack.c.bf16 %v2287_v32, %v2285_v44  ;;  %v2281_v46 = vmul.f32 %v7309_v52, %v2253_v34 }
 0x761   : > { %v2336_v24 = vmul.f32 %v7275_v41, %v2254_v26  ;;  %v2337_v25 = vmul.f32 %v7278_v33, %v2258_v55  ;;  %2492 = vmatprep.subr.bf16.mxu1 %v5894_v22  ;;  %v2283_v28 = vmul.f32 %v7309_v52, %v2254_v26  ;;  %v5885_v21 = vpack.c.bf16 %v2286_v0, %v2284_v61 }
 0x762   : > { %2493 = vmatpush1.bf16.msra.mxu1 %v5893_v59  ;;  %v2282_v12 = vmul.f32 %v7317_v29, %v2258_v55 }
 0x763   : > { %v5891_v56 = vpack.c.bf16 %v2336_v24, %v2334_v54  ;;  %v5892_v15 = vpack.c.bf16 %v2337_v25, %v2335_v53  ;;  %v5884_v16 = vpack.c.bf16 %v2283_v28, %v2281_v46 }
 0x764   : > { %v5883_v19 = vpack.c.bf16 %v2282_v12, %v2280_v51 }
 0x765   : > { %2494 = vmatprep.subr.bf16.mxu1 %v5892_v15 }
 0x766   : > { %2495 = vmatpush1.bf16.msra.mxu1 %v5891_v56 }
 0x767   : > { %2496 = vmatprep.subr.bf16.mxu1 %v5890_v48 }
 0x768   : > { %v2405_v50 = vpop.permute.xlu1 %2404 }
 0x76a   : > { %2497 = vmatpush1.bf16.msra.mxu1 %v5889_v57 }
 0x76b   : > { %2498 = vmatprep.subr.bf16.mxu1 %v5888_v17 }
 0x76c   : > { %v2395_v20 = vpop.permute.xlu1 %2394  ;;  %v2410_v25 = vpop.permute.xlu0 %2409 }
 0x76e   : > { %2499 = vmatpush1.bf16.msra.mxu1 %v5887_v62 }
 0x76f   : > { %2500 = vmatprep.subr.bf16.mxu1 %v5886_v31 }
 0x770   : > { %v2400_v27 = vpop.permute.xlu1 %2399 }
 0x771   : > { %v7342_v0 = vpop.permute.xlu0 %2598 }
 0x772   : > { %2501 = vmatpush1.bf16.msra.mxu1 %v5885_v21 }
 0x773   : > { %2502 = vmatprep.subr.bf16.mxu1 %v5884_v16 }
 0x775   : > { %v7338_v9 = vpop.permute.xlu1 %2602 }
 0x776   : > { %2503 = vmatpush1.bf16.msra.mxu1 %v5883_v19 }
 0x779   : > { %5429 = vmatmul.mubr.msk.bf16.vlgmr.msra.gmra.mxu1 %vm748_vm4, %v6103_v60  ;;  %v2627_v60 = vpop.permute.xlu0 %2626 }
 0x77a   : > { %2530 = vmatprep.mubr.bf16.mxu1 %v6374_v3  ;;  %v7340_v35 = vpop.permute.xlu1 %2622 }
 0x77f   : > { %v2591_v16 = vpop.permute.xlu1 %2590 }
 0x781   : > { %5430 = vmatmul.mubr.msk.bf16.gmra.mxu1 %vm748_vm4, %v6104_v58 }
 0x782   : > { %3325 = vmatprep.mubr.bf16.mxu1 %v6374_v3 }
 0x839   : > { %v2522_v2 = vpop.f32.mrf.mxu1 }
 0x83a   : > { %v2523_v45 = vadd.f32 %v2522_v2, %v2395_v20 }
 0x83b   : > { %v2524_v30 = vpop.f32.mrf.mxu1 }
 0x83c   : > { %v2549_v36 = vmin.f32 %v2523_v45, 0.0  ;;  %v2525_v6 = vadd.f32 %v2524_v30, %v2395_v20  ;;  %v2541_v58 = vmax.f32 %v2523_v45, 0.0 }
 0x83d   : > { %v2526_v34 = vpop.f32.mrf.mxu1 }
 0x83e   : > { %v2557_v59 = vmul.f32 1.442695, %v2549_v36  ;;  %v2550_v7 = vmin.f32 %v2525_v6, 0.0  ;;  %v2527_v22 = vadd.f32 %v2526_v34, %v2400_v27  ;;  %v2542_v2 = vmax.f32 %v2525_v6, 0.0  ;;  %v2595_v36 = vpop.permute.xlu1 %2594 }
 0x83f   : > { %v2528_v26 = vpop.f32.mrf.mxu1 }
 0x840   : > { %6183 = vpow2.f32 %v2557_v59  ;;  %v2559_v55 = vmul.f32 1.442695, %v2550_v7  ;;  %v2551_v54 = vmin.f32 %v2527_v22, 0.0  ;;  %v2529_v53 = vadd.f32 %v2528_v26, %v2400_v27 }
 0x841   : > { %v2532_v24 = vpop.f32.mrf.mxu1  ;;  %v2543_v7 = vmax.f32 %v2527_v22, 0.0 }
 0x842   : > { %6185 = vpow2.f32 %v2559_v55  ;;  %v2561_v10 = vmul.f32 1.442695, %v2551_v54  ;;  %v2533_v56 = vadd.f32 %v2532_v24, %v2405_v50  ;;  %v2552_v15 = vmin.f32 %v2529_v53, 0.0  ;;  %v2615_v55 = vpop.permute.xlu0 %2614  ;;  %v2619_v6 = vpop.permute.xlu1 %2618 }
 0x843   : > { %v2534_v48 = vpop.f32.mrf.mxu1 }
 0x844   : > { %6187 = vpow2.f32 %v2561_v10  ;;  %v2553_v57 = vmin.f32 %v2533_v56, 0.0  ;;  %v2535_v32 = vadd.f32 %v2534_v48, %v2405_v50  ;;  %v2563_v17 = vmul.f32 1.442695, %v2552_v15 }
 0x845   : > { %v2536_v44 = vpop.f32.mrf.mxu1  ;;  %v2544_v10 = vmax.f32 %v2529_v53, 0.0  ;;  %v2545_v45 = vmax.f32 %v2533_v56, 0.0 }
 0x846   : > { %v2565_v62 = vmul.f32 1.442695, %v2553_v57  ;;  %v2554_v28 = vmin.f32 %v2535_v32, 0.0  ;;  %v2537_v31 = vadd.f32 %v2536_v44, %v2410_v25  ;;  %6189 = vpow2.f32 %v2563_v17 }
 0x847   : > { %v2538_v61 = vpop.f32.mrf.mxu1 }
 0x848   : > { %6191 = vpow2.f32 %v2565_v62  ;;  %v2567_v46 = vmul.f32 1.442695, %v2554_v28  ;;  %v2555_v21 = vmin.f32 %v2537_v31, 0.0  ;;  %v2539_v12 = vadd.f32 %v2538_v61, %v2410_v25 }
 0x849   : > { %v2546_v62 = vmax.f32 %v2535_v32, 0.0 }
 0x84a   : > { %6193 = vpow2.f32 %v2567_v46  ;;  %v2569_v51 = vmul.f32 1.442695, %v2555_v21  ;;  %v2556_v19 = vmin.f32 %v2539_v12, 0.0 }
 0x84c   : > { %6195 = vpow2.f32 %v2569_v51  ;;  %v2571_v20 = vmul.f32 1.442695, %v2556_v19  ;;  %v2547_v51 = vmax.f32 %v2537_v31, 0.0 }
 0x84d   : > { %v6184_v50 = vpop.eup %6183 }
 0x84e   : > { %v2573_v27 = vadd.f32 %v6184_v50, %v2541_v58  ;;  %6197 = vpow2.f32 %v2571_v20 }
 0x84f   : > { %v6186_v30 = vpop.eup %6185 }
 0x850   : > { %v5431_v34 = vadd.f32 -1.0, %v2573_v27  ;;  %v2574_v59 = vadd.f32 %v6186_v30, %v2542_v2  ;;  %v2548_v30 = vmax.f32 %v2539_v12, 0.0 }
 0x851   : > { %v6188_v26 = vpop.eup %6187 }
 0x852   : > { %v2575_v54 = vadd.f32 %v6188_v26, %v2543_v7  ;;  %v2605_v24 = vmul.f32 %v5431_v34, %v2591_v16  ;;  %v5432_v25 = vadd.f32 -1.0, %v2574_v59 }
 0x853   : > { %v6190_v15 = vpop.eup %6189 }
 0x854   : > { %v5433_v48 = vadd.f32 -1.0, %v2575_v54  ;;  %v7344_v57 = vadd.f32 %v2615_v55, %v2605_v24  ;;  %v2576_v44 = vadd.f32 %v6190_v15, %v2544_v10  ;;  %v2606_v21 = vmul.f32 %v5432_v25, %v2591_v16 }
 0x855   : > { %v6192_v17 = vpop.eup %6191 }
 0x856   : > { %v2577_v28 = vadd.f32 %v6192_v17, %v2545_v45  ;;  %v2607_v61 = vmul.f32 %v5433_v48, %v2595_v36  ;;  %2665 = vrot.lane.b32.xlu0 %v7344_v57, %s6381_s25  ;;  %v5434_v46 = vadd.f32 -1.0, %v2576_v44  ;;  %v7355_v34 = vadd.f32 %v2615_v55, %v2606_v21  ;;  %v5452_v45 = vld [vmem:[%s7920_s5 + $0xa8] sm:$0xff] }
 0x857   : > { %v6194_v22 = vpop.eup %6193 }
 0x858   : > { %v2578_v19 = vadd.f32 %v6194_v22, %v2546_v62  ;;  %v5435_v53 = vadd.f32 -1.0, %v2577_v28  ;;  %v7348_v58 = vadd.f32 %v2619_v6, %v2607_v61  ;;  %v2608_v50 = vmul.f32 %v5434_v46, %v2595_v36 }
 0x859   : > { %v6196_v56 = vpop.eup %6195 }
 0x85a   : > { %v2579_v20 = vadd.f32 %v6196_v56, %v2547_v51  ;;  %v5436_v27 = vadd.f32 -1.0, %v2578_v19  ;;  %v2609_v2 = vmul.f32 %v5435_v53, %v7342_v0  ;;  %v5899_v32 = vpack.c.bf16 %v7348_v58, %v7344_v57  ;;  %2667 = vrot.lane.b32.xlu1 %v7348_v58, %s6381_s25  ;;  %v5499_v57 = vld [vmem:[%s7920_s5 + $0xd8] sm:$0xff]  ;;  %v5496_v58 = vld [vmem:[%s7920_s5 + $0xc0] sm:$0xff] }
 0x85b   : > { %v7357_v31 = vadd.f32 %v2619_v6, %v2608_v50  ;;  %v6198_v16 = vpop.eup %6197 }
 0x85c   : > { %v5437_v59 = vadd.f32 -1.0, %v2579_v20  ;;  %v2610_v7 = vmul.f32 %v5436_v27, %v7342_v0  ;;  %v7361_v36 = vadd.f32 %v7340_v35, %v2609_v2  ;;  %v2580_v26 = vadd.f32 %v6198_v16, %v2548_v30 }
 0x85d   : > { %v5900_v54 = vpack.c.bf16 %v7357_v31, %v7355_v34 }
 0x85e   : > { %v2611_v24 = vmul.f32 %v5437_v59, %v7338_v9  ;;  %2669 = vrot.lane.b32.xlu0 %v7361_v36, %s6381_s25  ;;  %v5438_v12 = vadd.f32 -1.0, %v2580_v26  ;;  %v7369_v55 = vadd.f32 %v7340_v35, %v2610_v7  ;;  %v5453_v35 = vld [vmem:[%s7920_s5 + $0xb0] sm:$0xff] }
 0x860   : > { %v7371_v25 = vadd.f32 %v2627_v60, %v2611_v24  ;;  %v2612_v0 = vmul.f32 %v5438_v12, %v7338_v9  ;;  %v5454_v9 = vld [vmem:[%s7920_s5 + $0xb8] sm:$0xff] }
 0x862   : > { %v5901_v10 = vpack.c.bf16 %v7371_v25, %v7361_v36  ;;  %2671 = vrot.lane.b32.xlu1 %v7371_v25, %s6381_s25  ;;  %2677 = vrot.lane.b32.xlu0 %v7369_v55, %s6381_s25  ;;  %v2636_v15 = vadd.f32 %v2627_v60, %v2612_v0  ;;  %v5451_v60 = vld [vmem:[%s7920_s5 + $0xa0] sm:$0xff] }
 0x864   : > { %v5902_v48 = vpack.c.bf16 %v2636_v15, %v7369_v55 }
 0x866   : > { %2679 = vrot.lane.b32.xlu1 %v2636_v15, %s6381_s25  ;;  %2673 = vrot.lane.b32.xlu0 %v7355_v34, %s6381_s25 }
 0x86a   : > { %2675 = vrot.lane.b32.xlu1 %v7357_v31, %s6381_s25  ;;  %2795 = vperm.xlu0 %6036, %v5453_v35   ;;  %s5153_s25 = sshll.u32 %s301_s26, 4  ;;  %s5154_s25 = int_to_ptr.vmem [resolvable:$true] %s5153_s25 }
 0x86b   : > { %s6311_s11 = scalar_lea.vmem %s5154_s25, 32  ;;  %p6318_p0 = scmp.lt.s32.totalorder %s5154_s25, %s6316_s7 }
 0x86c   : > { %p6312_p11 = scmp.ne.s32.totalorder %s5154_s25, %s6311_s11  ;;  %p6319_p1 = scmp.lt.s32.totalorder %s6317_s13, %s6311_s11 }
 0x86e   : > { %2800 = vperm.xlu1 %6037, %v5454_v9   ;;  %2790 = vperm.xlu0 %6036, %v5452_v45   ;;  %p6313_p12 = pnand %p6312_p11, %p6470_p5  ;;  %p6320_p2 = por %p6319_p1, %p6318_p0 }
 0x870   : > { %p6314_p13 = pneg %p6313_p12 }
 0x872   : > { %2785 = vperm.xlu1 %6037, %v5451_v60   ;;  %6039 = vset.pattern.permute.xlu0 %v6377_v37  ;;  %p6321_p3 = pnand %p6320_p2, %p6314_p13 }
 0x873   : > { %2993 = vperm.xlu0 %6039, %v5454_v9  }
 0x876   : > { %6038 = vset.pattern.permute.xlu1 %v6377_v37 }
 0x877   : > { %2989 = vperm.xlu1 %6038, %v5453_v35   ;;  %2981 = vperm.xlu0 %6039, %v5451_v60  }
 0x87b   : > { %6040 = vset.pattern.permute.xlu1 %v6378_v38  ;;  %6042 = vset.pattern.permute.xlu0 %v6378_v38 }
 0x87c   : > { %3013 = vperm.xlu1 %6040, %v5453_v35   ;;  %3005 = vperm.xlu0 %6042, %v5451_v60  }
 0x880   : > { %3017 = vperm.xlu1 %6040, %v5454_v9   ;;  %6045 = vset.pattern.permute.xlu0 %v6374_v3 }
 0x881   : > { %3214 = vperm.xlu0 %6045, %v5499_v57  }
 0x884   : > { %6041 = vset.pattern.permute.xlu1 %v6377_v37 }
 0x885   : > { %2985 = vperm.xlu1 %6041, %v5452_v45   ;;  %6046 = vset.pattern.permute.xlu0 %v6377_v37 }
 0x889   : > { %6043 = vset.pattern.permute.xlu1 %v6378_v38 }
 0x88a   : > { %3009 = vperm.xlu1 %6043, %v5452_v45  }
 0x88e   : > { %6044 = vset.pattern.permute.xlu1 %v6374_v3 }
 0x8c8   : > { %v2666_v17 = vpop.permute.xlu0 %2665 }
 0x8cc   : > { %v2668_v44 = vpop.permute.xlu1 %2667 }
 0x8d0   : > { %v2670_v6 = vpop.permute.xlu0 %2669 }
 0x8d4   : > { %v2672_v62 = vpop.permute.xlu1 %2671  ;;  %v2678_v28 = vpop.permute.xlu0 %2677 }
 0x8d5   : > { %v2683_v61 = vsel %vm2252_vm7, %v2670_v6, %v2678_v28  ;;  %v2687_v22 = vsel %vm2252_vm7, %v2678_v28, %v2670_v6 }
 0x8d6   : > { %v2729_v53 = vmul.f32 %v2683_v61, %v7275_v41  ;;  %v2730_v56 = vmul.f32 %v2687_v22, %v7278_v33  ;;  %v2694_v47 = vmul.f32 %v2683_v61, %v7309_v52  ;;  %v2693_v45 = vmul.f32 %v2687_v22, %v7317_v29 }
 0x8d8   : > { %v2680_v46 = vpop.permute.xlu1 %2679  ;;  %v2674_v21 = vpop.permute.xlu0 %2673 }
 0x8d9   : > { %v2684_v51 = vsel %vm2252_vm7, %v2672_v62, %v2680_v46  ;;  %v2688_v19 = vsel %vm2252_vm7, %v2680_v46, %v2672_v62  ;;  %v2681_v27 = vsel %vm2252_vm7, %v2666_v17, %v2674_v21  ;;  %v2685_v2 = vsel %vm2252_vm7, %v2674_v21, %v2666_v17 }
 0x8da   : > { %v2731_v50 = vmul.f32 %v2684_v51, %v7275_v41  ;;  %v2732_v20 = vmul.f32 %v2688_v19, %v7278_v33  ;;  %v2725_v24 = vmul.f32 %v2681_v27, %v7275_v41  ;;  %v2726_v12 = vmul.f32 %v2685_v2, %v7278_v33 }
 0x8db   : > { %v2696_v35 = vmul.f32 %v2684_v51, %v7309_v52  ;;  %v2690_v36 = vmul.f32 %v2681_v27, %v7309_v52  ;;  %v2689_v34 = vmul.f32 %v2685_v2, %v7317_v29 }
 0x8dc   : > { %v5905_v30 = vpack.c.bf16 %v2731_v50, %v2729_v53  ;;  %v2676_v16 = vpop.permute.xlu1 %2675  ;;  %v5906_v59 = vpack.c.bf16 %v2732_v20, %v2730_v56 }
 0x8dd   : > { %v2682_v7 = vsel %vm2252_vm7, %v2668_v44, %v2676_v16  ;;  %v2686_v26 = vsel %vm2252_vm7, %v2676_v16, %v2668_v44  ;;  %v5898_v60 = vpack.c.bf16 %v2696_v35, %v2694_v47 }
 0x8de   : > { %v2727_v55 = vmul.f32 %v2682_v7, %v7275_v41  ;;  %v2728_v0 = vmul.f32 %v2686_v26, %v7278_v33  ;;  %2883 = vmatprep.subr.bf16.mxu0 %v5906_v59  ;;  %v2695_v41 = vmul.f32 %v2688_v19, %v7317_v29  ;;  %v2692_v33 = vmul.f32 %v2682_v7, %v7309_v52  ;;  %v6106_v52 = vld [vmem:[%s7919_s4 + $0x58] sm:$0xff]  }
 0x8df   : > { %2884 = vmatpush1.bf16.msra.mxu0 %v5905_v30 }
 0x8e0   : > { %v5903_v15 = vpack.c.bf16 %v2727_v55, %v2725_v24  ;;  %v5904_v9 = vpack.c.bf16 %v2728_v0, %v2726_v12  ;;  %v5897_v25 = vpack.c.bf16 %v2695_v41, %v2693_v45 }
 0x8e2   : > { %2885 = vmatprep.subr.bf16.mxu0 %v5904_v9 }
 0x8e3   : > { %2886 = vmatpush1.bf16.msra.mxu0 %v5903_v15 }
 0x8e4   : > { %2887 = vmatprep.subr.bf16.mxu0 %v5902_v48  ;;  %v5896_v48 = vpack.c.bf16 %v2692_v33, %v2690_v36 }
 0x8e5   : > { %v2796_v44 = vpop.permute.xlu0 %2795 }
 0x8e7   : > { %2888 = vmatpush1.bf16.msra.mxu0 %v5901_v10  ;;  %v2691_v10 = vmul.f32 %v2686_v26, %v7317_v29  ;;  %v5498_v29 = vld [vmem:[%s7920_s5 + $0xd0] sm:$0xff] }
 0x8e8   : > { %2889 = vmatprep.subr.bf16.mxu0 %v5900_v54  ;;  %v6105_v54 = vld [vmem:[%s7919_s4 + $0x50] sm:$0xff]   ;;  %3209 = vperm.xlu1 %6044, %v5498_v29  }
 0x8e9   : > { %v5895_v31 = vpack.c.bf16 %v2691_v10, %v2689_v34  ;;  %3403 = vperm.xlu0 %6046, %v5498_v29   ;;  %v2801_v17 = vpop.permute.xlu1 %2800  ;;  %v2791_v22 = vpop.permute.xlu0 %2790 }
 0x8eb   : > { %2890 = vmatpush1.bf16.msra.mxu0 %v5899_v32  ;;  %v5497_v32 = vld [vmem:[%s7920_s5 + $0xc8] sm:$0xff] }
 0x8ec   : > { %2891 = vmatprep.subr.bf16.mxu0 %v5898_v60  ;;  %3199 = vperm.xlu1 %6044, %v5496_v58  }
 0x8ed   : > { %6049 = vset.pattern.permute.xlu0 %v6378_v38  ;;  %v2786_v6 = vpop.permute.xlu1 %2785 }
 0x8ee   : > { %3431 = vperm.xlu0 %6049, %v5499_v57  }
 0x8ef   : > { %2892 = vmatpush1.bf16.msra.mxu0 %v5897_v25 }
 0x8f0   : > { %2893 = vmatprep.subr.bf16.mxu0 %v5896_v48  ;;  %3204 = vperm.xlu1 %6044, %v5497_v32  }
 0x8f2   : > { %3419 = vperm.xlu0 %6049, %v5496_v58   ;;  %v2990_v24 = vpop.permute.xlu1 %2989 }
 0x8f3   : > { %2894 = vmatpush1.bf16.msra.mxu0 %v5895_v31 }
 0x8f4   : > { %6047 = vset.pattern.permute.xlu1 %v6377_v37 }
 0x8f5   : > { %3407 = vperm.xlu1 %6047, %v5499_v57  }
 0x8f6   : > { %5473 = vmatmul.mubr.msk.bf16.vlgmr.msra.gmra.mxu0 %vm748_vm4, %v6105_v54  ;;  %6052 = vset.pattern.permute.xlu0 %v6374_v3 }
 0x8f7   : > { %2921 = vmatprep.mubr.bf16.mxu0 %v6374_v3  ;;  %v3014_v36 = vpop.permute.xlu1 %3013 }
 0x8f9   : > { %6048 = vset.pattern.permute.xlu1 %v6378_v38 }
 0x8fa   : > { %3427 = vperm.xlu1 %6048, %v5498_v29   ;;  %v2994_v29 = vpop.permute.xlu0 %2993 }
 0x8fb   : > { %v3018_v34 = vpop.permute.xlu1 %3017 }
 0x8fe   : > { %5474 = vmatmul.mubr.msk.bf16.gmra.mxu0 %vm748_vm4, %v6106_v52  ;;  %6050 = vset.pattern.permute.xlu1 %v6377_v37 }
 0x8ff   : > { %3692 = vmatprep.mubr.bf16.mxu0 %v6374_v3  ;;  %3395 = vperm.xlu1 %6050, %v5496_v58  }
 0x903   : > { %3399 = vperm.xlu1 %6050, %v5497_v32  }
 0x907   : > { %6051 = vset.pattern.permute.xlu1 %v6378_v38 }
 0x908   : > { %3423 = vperm.xlu1 %6051, %v5497_v32  }
 0x90c   : > { %6053 = vset.pattern.permute.xlu1 %v6374_v3 }
 0x9b6   : > { %v2913_v62 = vpop.f32.mrf.mxu0 }
 0x9b7   : > { %v2914_v28 = vadd.f32 %v2913_v62, %v2786_v6 }
 0x9b8   : > { %v2915_v61 = vpop.f32.mrf.mxu0 }
 0x9b9   : > { %v2940_v46 = vmin.f32 %v2914_v28, 0.0  ;;  %v2916_v21 = vadd.f32 %v2915_v61, %v2786_v6  ;;  %v2932_v57 = vmax.f32 %v2914_v28, 0.0 }
 0x9ba   : > { %v2917_v51 = vpop.f32.mrf.mxu0 }
 0x9bb   : > { %v2941_v19 = vmin.f32 %v2916_v21, 0.0  ;;  %v2918_v53 = vadd.f32 %v2917_v51, %v2791_v22  ;;  %v2948_v56 = vmul.f32 1.442695, %v2940_v46  ;;  %v2986_v46 = vpop.permute.xlu1 %2985 }
 0x9bc   : > { %v2919_v50 = vpop.f32.mrf.mxu0 }
 0x9bd   : > { %v2942_v20 = vmin.f32 %v2918_v53, 0.0  ;;  %v2920_v27 = vadd.f32 %v2919_v50, %v2791_v22  ;;  %v2950_v30 = vmul.f32 1.442695, %v2941_v19  ;;  %6199 = vpow2.f32 %v2948_v56 }
 0x9be   : > { %v2923_v2 = vpop.f32.mrf.mxu0  ;;  %v2934_v54 = vmax.f32 %v2918_v53, 0.0  ;;  %v2933_v22 = vmax.f32 %v2916_v21, 0.0 }
 0x9bf   : > { %v2952_v16 = vmul.f32 1.442695, %v2942_v20  ;;  %v2924_v59 = vadd.f32 %v2923_v2, %v2796_v44  ;;  %v2943_v7 = vmin.f32 %v2920_v27, 0.0  ;;  %v2982_v2 = vpop.permute.xlu0 %2981 }
 0x9c0   : > { %v2925_v26 = vpop.f32.mrf.mxu0 }
 0x9c1   : > { %6201 = vpow2.f32 %v2952_v16  ;;  %v2944_v12 = vmin.f32 %v2924_v59, 0.0  ;;  %v2926_v55 = vadd.f32 %v2925_v26, %v2796_v44  ;;  %v2954_v0 = vmul.f32 1.442695, %v2943_v7 }
 0x9c2   : > { %v2927_v15 = vpop.f32.mrf.mxu0  ;;  %6203 = vpow2.f32 %v2950_v30  ;;  %v2935_v44 = vmax.f32 %v2920_v27, 0.0  ;;  %v2936_v62 = vmax.f32 %v2924_v59, 0.0 }
 0x9c3   : > { %v2956_v9 = vmul.f32 1.442695, %v2944_v12  ;;  %v2945_v35 = vmin.f32 %v2926_v55, 0.0  ;;  %v2928_v47 = vadd.f32 %v2927_v15, %v2801_v17  ;;  %6205 = vpow2.f32 %v2954_v0 }
 0x9c4   : > { %v2929_v41 = vpop.f32.mrf.mxu0  ;;  %v2937_v56 = vmax.f32 %v2926_v55, 0.0  ;;  %v5483_v55 = vld [vmem:[%s7916_s1 + $0xc] sm:$0xf] }
 0x9c5   : > { %6207 = vpow2.f32 %v2956_v9  ;;  %v2958_v33 = vmul.f32 1.442695, %v2945_v35  ;;  %v2946_v60 = vmin.f32 %v2928_v47, 0.0  ;;  %v2930_v45 = vadd.f32 %v2929_v41, %v2801_v17  ;;  %v3010_v35 = vpop.permute.xlu1 %3009 }
 0x9c6   : > { %v2938_v7 = vmax.f32 %v2928_v47, 0.0 }
 0x9c7   : > { %6209 = vpow2.f32 %v2958_v33  ;;  %v2960_v25 = vmul.f32 1.442695, %v2946_v60  ;;  %v2947_v10 = vmin.f32 %v2930_v45, 0.0  ;;  %v2939_v9 = vmax.f32 %v2930_v45, 0.0 }
 0x9c9   : > { %6211 = vpow2.f32 %v2960_v25  ;;  %v2962_v48 = vmul.f32 1.442695, %v2947_v10 }
 0x9ca   : > { %v6200_v31 = vpop.eup %6199 }
 0x9cb   : > { %6213 = vpow2.f32 %v2962_v48  ;;  %v2964_v61 = vadd.f32 %v6200_v31, %v2932_v57  ;;  %v3006_v31 = vpop.permute.xlu0 %3005  ;;  %v3128_v57 = vrot.slane %v5483_v55, %v6591_v43 }
 0x9cd   : > { %v5475_v28 = vadd.f32 -1.0, %v2964_v61  ;;  %v7492_v43 = vrot.slane %v3128_v57, %v6588_v42  ;;  %v5540_v57 = vld [vmem:[%s7920_s5 + $0xe0] sm:$0xff] }
 0x9ce   : > { %v6202_v52 = vpop.eup %6201 }
 0x9cf   : > { %v2966_v58 = vadd.f32 %v6202_v52, %v2934_v54  ;;  %v6204_v32 = vpop.eup %6203  ;;  %v2996_v10 = vmul.f32 %v5475_v28, %v2982_v2  ;;  %v3070_v28 = vrot.slane %v5483_v55, %v6625_v8 }
 0x9d0   : > { %v6206_v6 = vpop.eup %6205  ;;  %v2965_v30 = vadd.f32 %v6204_v32, %v2933_v22 }
 0x9d1   : > { %v2967_v51 = vadd.f32 %v6206_v6, %v2935_v44  ;;  %v5477_v50 = vadd.f32 -1.0, %v2966_v58 }
 0x9d2   : > { %v6208_v17 = vpop.eup %6207  ;;  %v5476_v21 = vadd.f32 -1.0, %v2965_v30 }
 0x9d3   : > { %v2968_v19 = vadd.f32 %v6208_v17, %v2936_v62  ;;  %v5478_v12 = vadd.f32 -1.0, %v2967_v51  ;;  %v2998_v15 = vmul.f32 %v5477_v50, %v2986_v46  ;;  %v3020_v62 = vadd.f32 %v3006_v31, %v2996_v10 }
 0x9d4   : > { %v6210_v20 = vpop.eup %6209  ;;  %v2997_v32 = vmul.f32 %v5476_v21, %v2982_v2  ;;  %v3124_v17 = vrot.slane %v5483_v55, %v6588_v42 }
 0x9d5   : > { %v5479_v53 = vadd.f32 -1.0, %v2968_v19  ;;  %v2969_v16 = vadd.f32 %v6210_v20, %v2937_v56  ;;  %v2999_v48 = vmul.f32 %v5478_v12, %v2986_v46  ;;  %v3022_v52 = vadd.f32 %v3010_v35, %v2998_v15 }
 0x9d6   : > { %v6212_v26 = vpop.eup %6211  ;;  %v3021_v51 = vadd.f32 %v3006_v31, %v2997_v32  ;;  %v7498_v19 = vadd.f32 %v3020_v62, %v7200_v5  ;;  %v6108_v31 = vld [vmem:[%s7919_s4 + $0x68] sm:$0xff]  }
 0x9d7   : > { %v5480_v27 = vadd.f32 -1.0, %v2969_v16  ;;  %v3000_v0 = vmul.f32 %v5479_v53, %v2990_v24  ;;  %v2970_v59 = vadd.f32 %v6212_v26, %v2938_v7  ;;  %v7489_v46 = vadd.f32 %v3022_v52, %v7207_v63  ;;  %v5542_v52 = vld [vmem:[%s7920_s5 + $0xf0] sm:$0xff] }
 0x9d8   : > { %v6214_v41 = vpop.eup %6213  ;;  %v7516_v50 = vadd.f32 %v3021_v51, %v7237_v13  ;;  %v3074_v53 = vrot.slane %v5483_v55, %v6632_v11  ;;  %3576 = vperm.xlu0 %6052, %v5542_v52  }
 0x9d9   : > { %v3001_v33 = vmul.f32 %v5480_v27, %v2990_v24  ;;  %v3024_v60 = vadd.f32 %v3014_v36, %v3000_v0  ;;  %v5481_v25 = vadd.f32 -1.0, %v2970_v59  ;;  %v2971_v47 = vadd.f32 %v6214_v41, %v2939_v9 }
 0x9da   : > { %v3023_v24 = vadd.f32 %v3010_v35, %v2999_v48  ;;  %v3142_v5 = vmul.f32 %v7492_v43, %v7489_v46  ;;  %v7533_v26 = vrot.slane %v3074_v53, %v6625_v8  ;;  %v7542_v0 = vrot.slane %v3070_v28, %v6625_v8  ;;  %v6107_v48 = vld [vmem:[%s7919_s4 + $0x60] sm:$0xff]   ;;  %v3215_v53 = vpop.permute.xlu0 %3214 }
 0x9db   : > { %v3002_v54 = vmul.f32 %v5481_v25, %v2994_v29  ;;  %v3025_v58 = vadd.f32 %v3014_v36, %v3001_v33  ;;  %v5482_v45 = vadd.f32 -1.0, %v2971_v47  ;;  %v7482_v44 = vadd.f32 %v3024_v60, %v7215_v14 }
 0x9dc   : > { %v7508_v56 = vadd.f32 %v3023_v24, %v7244_v49  ;;  %v3140_v49 = vmul.f32 %v7492_v43, %v7498_v19  ;;  %v5911_v15 = vpack.c.bf16 %v7489_v46, %v7498_v19  ;;  %v3088_v35 = vmul.f32 %v7533_v26, %v7489_v46 }
 0x9dd   : > { %v3026_v6 = vadd.f32 %v3018_v34, %v3002_v54  ;;  %v3003_v61 = vmul.f32 %v5482_v45, %v2994_v29  ;;  %v7495_v36 = vadd.f32 %v3025_v58, %v7223_v23  ;;  %v3144_v29 = vmul.f32 %v7492_v43, %v7482_v44  ;;  %v5543_v54 = vld [vmem:[%s7920_s5 + $0xf8] sm:$0xff]  ;;  %v5541_v58 = vld [vmem:[%s7920_s5 + $0xe8] sm:$0xff]  ;;  %v3210_v45 = vpop.permute.xlu1 %3209 }
 0x9de   : > { %v7511_v23 = vrot.slane %v3124_v17, %v6588_v42  ;;  %v5916_v30 = vpack.c.bf16 %v3142_v5, %v3140_v49  ;;  %v5912_v27 = vpack.c.bf16 %v7508_v56, %v7516_v50  ;;  %v3090_v59 = vmul.f32 %v7533_v26, %v7482_v44  ;;  %3581 = vperm.xlu1 %6053, %v5543_v54  }
 0x9df   : > { %v7486_v22 = vadd.f32 %v3026_v6, %v7226_v18  ;;  %v3027_v14 = vadd.f32 %v3018_v34, %v3003_v61  ;;  %v3089_v55 = vmul.f32 %v7542_v0, %v7495_v36  ;;  %v3086_v41 = vmul.f32 %v7533_v26, %v7498_v19  ;;  %3571 = vperm.xlu0 %6052, %v5541_v58  }
 0x9e0   : > { %v3143_v20 = vmul.f32 %v7511_v23, %v7495_v36  ;;  %v3141_v42 = vmul.f32 %v7511_v23, %v7508_v56  ;;  %v3139_v13 = vmul.f32 %v7511_v23, %v7516_v50  ;;  %v3087_v60 = vmul.f32 %v7542_v0, %v7508_v56 }
 0x9e1   : > { %v3146_v18 = vmul.f32 %v7492_v43, %v7486_v22  ;;  %v7505_v63 = vadd.f32 %v3027_v14, %v7234_v4  ;;  %v5913_v12 = vpack.c.bf16 %v7486_v22, %v7482_v44  ;;  %v3092_v11 = vmul.f32 %v7533_v26, %v7486_v22  ;;  %v3200_v32 = vpop.permute.xlu1 %3199 }
 0x9e2   : > { %v5915_v16 = vpack.c.bf16 %v3141_v42, %v3139_v13  ;;  %v5908_v25 = vpack.c.bf16 %v3088_v35, %v3086_v41  ;;  %v3085_v10 = vmul.f32 %v7542_v0, %v7516_v50  ;;  %3566 = vperm.xlu1 %6053, %v5540_v57  }
 0x9e3   : > { %v5918_v34 = vpack.c.bf16 %v3146_v18, %v3144_v29  ;;  %v3145_v4 = vmul.f32 %v7511_v23, %v7505_v63  ;;  %v5914_v7 = vpack.c.bf16 %v7505_v63, %v7495_v36  ;;  %v3091_v9 = vmul.f32 %v7542_v0, %v7505_v63  ;;  %6055 = vset.pattern.permute.xlu0 %v6377_v37 }
 0x9e4   : > { %v5910_v21 = vpack.c.bf16 %v3092_v11, %v3090_v59  ;;  %v5907_v47 = vpack.c.bf16 %v3087_v60, %v3085_v10  ;;  %3774 = vperm.xlu0 %6055, %v5543_v54  }
 0x9e5   : > { %3297 = vmatprep.subr.bf16.mxu1 %v5918_v34  ;;  %v5917_v2 = vpack.c.bf16 %v3145_v4, %v3143_v20  ;;  %v5909_v33 = vpack.c.bf16 %v3091_v9, %v3089_v55  ;;  %v3205_v24 = vpop.permute.xlu1 %3204 }
 0x9e6   : > { %6054 = vset.pattern.permute.xlu1 %v6377_v37 }
 0x9e7   : > { %3298 = vmatpush1.bf16.msra.mxu1 %v5917_v2  ;;  %3770 = vperm.xlu1 %6054, %v5542_v52  }
 0x9e8   : > { %3299 = vmatprep.subr.bf16.mxu1 %v5916_v30  ;;  %3762 = vperm.xlu0 %6055, %v5540_v57  }
 0x9e9   : > { %v7593_v11 = vpop.permute.xlu1 %3407 }
 0x9eb   : > { %3300 = vmatpush1.bf16.msra.mxu1 %v5915_v16  ;;  %6056 = vset.pattern.permute.xlu1 %v6378_v38 }
 0x9ec   : > { %3301 = vmatprep.subr.bf16.mxu1 %v5914_v7  ;;  %3794 = vperm.xlu1 %6056, %v5542_v52   ;;  %v3404_v52 = vpop.permute.xlu0 %3403 }
 0x9ed   : > { %6058 = vset.pattern.permute.xlu0 %v6378_v38 }
 0x9ee   : > { %3786 = vperm.xlu0 %6058, %v5540_v57  }
 0x9ef   : > { %3302 = vmatpush1.bf16.msra.mxu1 %v5913_v12 }
 0x9f0   : > { %3303 = vmatprep.subr.bf16.mxu1 %v5912_v27  ;;  %3798 = vperm.xlu1 %6056, %v5543_v54  }
 0x9f2   : > { %6061 = vset.pattern.permute.xlu0 %v6374_v3 }
 0x9f3   : > { %3304 = vmatpush1.bf16.msra.mxu1 %v5911_v15 }
 0x9f4   : > { %3305 = vmatprep.subr.bf16.mxu1 %v5910_v21  ;;  %6057 = vset.pattern.permute.xlu1 %v6377_v37 }
 0x9f5   : > { %3766 = vperm.xlu1 %6057, %v5541_v58  }
 0x9f7   : > { %3306 = vmatpush1.bf16.msra.mxu1 %v5909_v33 }
 0x9f8   : > { %3307 = vmatprep.subr.bf16.mxu1 %v5908_v25  ;;  %v3428_v25 = vpop.permute.xlu1 %3427 }
 0x9f9   : > { %6059 = vset.pattern.permute.xlu1 %v6378_v38 }
 0x9fa   : > { %3790 = vperm.xlu1 %6059, %v5541_v58  }
 0x9fb   : > { %3308 = vmatpush1.bf16.msra.mxu1 %v5907_v47 }
 0x9fe   : > { %5518 = vmatmul.mubr.msk.bf16.vlgmr.msra.gmra.mxu1 %vm748_vm4, %v6107_v48  ;;  %6060 = vset.pattern.permute.xlu1 %v6374_v3  ;;  %v3396_v48 = vpop.permute.xlu1 %3395 }
 0x9ff   : > { %3335 = vmatprep.mubr.bf16.mxu1 %v6374_v3 }
 0xa06   : > { %5519 = vmatmul.mubr.msk.bf16.gmra.mxu1 %vm748_vm4, %v6108_v31 }
 0xa07   : > { %4003 = vmatprep.mubr.bf16.mxu1 %v6374_v3 }
 0xabe   : > { %v3327_v6 = vpop.f32.mrf.mxu1 }
 0xabf   : > { %v3328_v62 = vadd.f32 %v3327_v6, %v3200_v32 }
 0xac0   : > { %v3329_v61 = vpop.f32.mrf.mxu1 }
 0xac1   : > { %v7590_v17 = vadd.f32 %v3329_v61, %v3200_v32  ;;  %v3354_v51 = vmin.f32 %v3328_v62, 0.0  ;;  %v3346_v58 = vmax.f32 %v3328_v62, 0.0  ;;  %v3432_v62 = vpop.permute.xlu0 %3431 }
 0xac2   : > { %v3331_v14 = vpop.f32.mrf.mxu1 }
 0xac3   : > { %v3332_v29 = vadd.f32 %v3331_v14, %v3205_v24  ;;  %v3355_v5 = vmin.f32 %v7590_v17, 0.0  ;;  %v3362_v49 = vmul.f32 1.442695, %v3354_v51 }
 0xac4   : > { %v3333_v18 = vpop.f32.mrf.mxu1 }
 0xac5   : > { %v3356_v34 = vmin.f32 %v3332_v29, 0.0  ;;  %v3334_v20 = vadd.f32 %v3333_v18, %v3205_v24  ;;  %v3364_v28 = vmul.f32 1.442695, %v3355_v5  ;;  %v3348_v31 = vmax.f32 %v3332_v29, 0.0 }
 0xac6   : > { %v3337_v4 = vpop.f32.mrf.mxu1  ;;  %v3347_v5 = vmax.f32 %v7590_v17, 0.0 }
 0xac7   : > { %v3366_v2 = vmul.f32 1.442695, %v3356_v34  ;;  %v3338_v42 = vadd.f32 %v3337_v4, %v3210_v45  ;;  %v3357_v30 = vmin.f32 %v3334_v20, 0.0  ;;  %v3349_v61 = vmax.f32 %v3334_v20, 0.0  ;;  %v3400_v4 = vpop.permute.xlu1 %3399 }
 0xac8   : > { %v3339_v13 = vpop.f32.mrf.mxu1 }
 0xac9   : > { %6215 = vpow2.f32 %v3366_v2  ;;  %v3358_v16 = vmin.f32 %v3338_v42, 0.0  ;;  %v3340_v7 = vadd.f32 %v3339_v13, %v3210_v45  ;;  %v3368_v12 = vmul.f32 1.442695, %v3357_v30 }
 0xaca   : > { %v3341_v27 = vpop.f32.mrf.mxu1  ;;  %6217 = vpow2.f32 %v3362_v49  ;;  %v3350_v45 = vmax.f32 %v3338_v42, 0.0 }
 0xacb   : > { %v3370_v59 = vmul.f32 1.442695, %v3358_v16  ;;  %v3359_v15 = vmin.f32 %v3340_v7, 0.0  ;;  %v3342_v9 = vadd.f32 %v3341_v27, %v3215_v53  ;;  %6219 = vpow2.f32 %v3368_v12 }
 0xacc   : > { %v3343_v21 = vpop.f32.mrf.mxu1  ;;  %v3351_v14 = vmax.f32 %v3340_v7, 0.0 }
 0xacd   : > { %6221 = vpow2.f32 %v3370_v59  ;;  %v3372_v35 = vmul.f32 1.442695, %v3359_v15  ;;  %v3360_v55 = vmin.f32 %v3342_v9, 0.0  ;;  %v3344_v41 = vadd.f32 %v3343_v21, %v3215_v53 }
 0xace   : > { %6223 = vpow2.f32 %v3364_v28  ;;  %v3352_v2 = vmax.f32 %v3342_v9, 0.0 }
 0xacf   : > { %6225 = vpow2.f32 %v3372_v35  ;;  %v3374_v33 = vmul.f32 1.442695, %v3360_v55  ;;  %v3361_v60 = vmin.f32 %v3344_v41, 0.0  ;;  %v3353_v27 = vmax.f32 %v3344_v41, 0.0 }
 0xad1   : > { %6227 = vpow2.f32 %v3374_v33  ;;  %v3376_v10 = vmul.f32 1.442695, %v3361_v60  ;;  %v3424_v33 = vpop.permute.xlu1 %3423 }
 0xad3   : > { %6229 = vpow2.f32 %v3376_v10 }
 0xad6   : > { %v6216_v47 = vpop.eup %6215 }
 0xad7   : > { %v6218_v54 = vpop.eup %6217  ;;  %v3380_v32 = vadd.f32 %v6216_v47, %v3348_v31 }
 0xad8   : > { %v6220_v57 = vpop.eup %6219  ;;  %v3378_v18 = vadd.f32 %v6218_v54, %v3346_v58  ;;  %v3420_v54 = vpop.permute.xlu0 %3419 }
 0xad9   : > { %v3381_v49 = vadd.f32 %v6220_v57, %v3349_v61  ;;  %v5522_v13 = vadd.f32 -1.0, %v3380_v32 }
 0xada   : > { %v6222_v6 = vpop.eup %6221  ;;  %v5520_v20 = vadd.f32 -1.0, %v3378_v18 }
 0xadb   : > { %v6224_v24 = vpop.eup %6223  ;;  %v3382_v51 = vadd.f32 %v6222_v6, %v3350_v45  ;;  %v5523_v7 = vadd.f32 -1.0, %v3381_v49  ;;  %v3412_v21 = vmul.f32 %v5522_v13, %v3400_v4 }
 0xadc   : > { %v6226_v34 = vpop.eup %6225  ;;  %v3379_v16 = vadd.f32 %v6224_v24, %v3347_v5  ;;  %v3410_v10 = vmul.f32 %v5520_v20, %v3396_v48 }
 0xadd   : > { %v3383_v30 = vadd.f32 %v6226_v34, %v3351_v14  ;;  %v5524_v29 = vadd.f32 -1.0, %v3382_v51  ;;  %v3413_v31 = vmul.f32 %v5523_v7, %v3400_v4  ;;  %v3436_v58 = vadd.f32 %v3424_v33, %v3412_v21 }
 0xade   : > { %v6228_v53 = vpop.eup %6227  ;;  %v5521_v55 = vadd.f32 -1.0, %v3379_v16  ;;  %v3434_v6 = vadd.f32 %v3420_v54, %v3410_v10  ;;  %v3582_v10 = vpop.permute.xlu1 %3581 }
 0xadf   : > { %v3384_v42 = vadd.f32 %v6228_v53, %v3352_v2  ;;  %v5525_v28 = vadd.f32 -1.0, %v3383_v30  ;;  %v3414_v12 = vmul.f32 %v5524_v29, %v3404_v52  ;;  %v3437_v14 = vadd.f32 %v3424_v33, %v3413_v31  ;;  %v5579_v33 = vld [vmem:[%s7920_s5 + $0x118] sm:$0xff] }
 0xae0   : > { %v6230_v59 = vpop.eup %6229  ;;  %v3411_v32 = vmul.f32 %v5521_v55, %v3396_v48  ;;  %v3509_v18 = vmul.f32 %v3436_v58, %v7492_v43  ;;  %v3471_v20 = vmul.f32 %v3434_v6, %v7533_v26  ;;  %v5578_v55 = vld [vmem:[%s7920_s5 + $0x110] sm:$0xff]  ;;  %3892 = vperm.xlu0 %6061, %v5579_v33  }
 0xae1   : > { %v5526_v15 = vadd.f32 -1.0, %v3384_v42  ;;  %v3385_v35 = vadd.f32 %v6230_v59, %v3353_v27  ;;  %v3415_v17 = vmul.f32 %v5525_v28, %v3404_v52  ;;  %v3438_v60 = vadd.f32 %v3428_v25, %v3414_v12  ;;  %3887 = vperm.xlu1 %6060, %v5578_v55  }
 0xae2   : > { %v3435_v4 = vadd.f32 %v3420_v54, %v3411_v32  ;;  %v5923_v42 = vpack.c.bf16 %v3436_v58, %v3434_v6  ;;  %v3472_v27 = vmul.f32 %v3437_v14, %v7542_v0  ;;  %v3567_v54 = vpop.permute.xlu1 %3566 }
 0xae3   : > { %v3416_v9 = vmul.f32 %v5526_v15, %v7593_v11  ;;  %v5527_v47 = vadd.f32 -1.0, %v3385_v35  ;;  %v3439_v45 = vadd.f32 %v3428_v25, %v3415_v17  ;;  %v3511_v61 = vmul.f32 %v3438_v60, %v7492_v43  ;;  %v6109_v35 = vld [vmem:[%s7919_s4 + $0x70] sm:$0xff]  }
 0xae4   : > { %v3507_v25 = vmul.f32 %v3434_v6, %v7492_v43  ;;  %v3506_v2 = vmul.f32 %v3435_v4, %v7511_v23  ;;  %v5924_v53 = vpack.c.bf16 %v3437_v14, %v3435_v4  ;;  %v3470_v15 = vmul.f32 %v3435_v4, %v7542_v0  ;;  %6062 = vset.pattern.permute.xlu0 %v6377_v37 }
 0xae5   : > { %v3440_v57 = vadd.f32 %v3432_v62, %v3416_v9  ;;  %v3417_v41 = vmul.f32 %v5527_v47, %v7593_v11  ;;  %v3510_v34 = vmul.f32 %v3439_v45, %v7511_v23  ;;  %v3508_v11 = vmul.f32 %v3437_v14, %v7511_v23  ;;  %v5576_v9 = vld [vmem:[%s7920_s5 + $0x100] sm:$0xff]  ;;  %4081 = vperm.xlu0 %6062, %v5578_v55   ;;  %v3577_v47 = vpop.permute.xlu0 %3576 }
 0xae6   : > { %v5928_v49 = vpack.c.bf16 %v3509_v18, %v3507_v25  ;;  %v3474_v12 = vmul.f32 %v3439_v45, %v7542_v0  ;;  %v5919_v21 = vpack.c.bf16 %v3472_v27, %v3470_v15  ;;  %v7630_v17 = vcombine.low %v6374_v3, %v6374_v3  ;;  %3877 = vperm.xlu1 %6060, %v5576_v9  }
 0xae7   : > { %v3513_v52 = vmul.f32 %v3440_v57, %v7492_v43  ;;  %v3441_v24 = vadd.f32 %v3432_v62, %v3417_v41  ;;  %v5927_v30 = vpack.c.bf16 %v3508_v11, %v3506_v2  ;;  %v5925_v13 = vpack.c.bf16 %v3440_v57, %v3438_v60 }
 0xae8   : > { %v3477_v16 = vmul.f32 %v3440_v57, %v7533_v26  ;;  %v3475_v43 = vmul.f32 %v3438_v60, %v7533_v26  ;;  %v5577_v60 = vld [vmem:[%s7920_s5 + $0x108] sm:$0xff] }
 0xae9   : > { %v5930_v51 = vpack.c.bf16 %v3513_v52, %v3511_v61  ;;  %v3512_v5 = vmul.f32 %v3441_v24, %v7511_v23  ;;  %v5926_v29 = vpack.c.bf16 %v3441_v24, %v3439_v45  ;;  %v3476_v62 = vmul.f32 %v3441_v24, %v7542_v0  ;;  %6065 = vset.pattern.permute.xlu0 %v6378_v38 }
 0xaea   : > { %v5922_v28 = vpack.c.bf16 %v3477_v16, %v3475_v43  ;;  %v3473_v23 = vmul.f32 %v3436_v58, %v7533_v26  ;;  %v6110_v26 = vld [vmem:[%s7919_s4 + $0x78] sm:$0xff]   ;;  %v7626_v0 = vcombine.high %v6374_v3, %v6374_v3  ;;  %3882 = vperm.xlu1 %6060, %v5577_v60   ;;  %4109 = vperm.xlu0 %6065, %v5579_v33   ;;  %v3572_v58 = vpop.permute.xlu0 %3571 }
 0xaeb   : > { %3664 = vmatprep.subr.bf16.mxu0 %v5930_v51  ;;  %v5929_v48 = vpack.c.bf16 %v3512_v5, %v3510_v34  ;;  %v5921_v7 = vpack.c.bf16 %v3476_v62, %v3474_v12 }
 0xaec   : > { %v5920_v59 = vpack.c.bf16 %v3473_v23, %v3471_v20  ;;  %3975 = vmatprep.subr.bf16.mxu1 %v7626_v0 }
 0xaed   : > { %3665 = vmatpush1.bf16.msra.mxu0 %v5929_v48  ;;  %3976 = vmatpush1.bf16.msra.mxu1 %v7630_v17 }
 0xaee   : > { %3666 = vmatprep.subr.bf16.mxu0 %v5928_v49  ;;  %3977 = vmatprep.subr.bf16.mxu1 %v7626_v0 }
 0xaef   : > { %6063 = vset.pattern.permute.xlu1 %v6377_v37  ;;  %4097 = vperm.xlu0 %6065, %v5576_v9  }
 0xaf0   : > { %4085 = vperm.xlu1 %6063, %v5579_v33  }
 0xaf1   : > { %3667 = vmatpush1.bf16.msra.mxu0 %v5927_v30  ;;  %3978 = vmatpush1.bf16.msra.mxu1 %v7630_v17 }
 0xaf2   : > { %3668 = vmatprep.subr.bf16.mxu0 %v5926_v29 }
 0xaf3   : > { %6068 = vset.pattern.permute.xlu0 %v6374_v3 }
 0xaf4   : > { %6064 = vset.pattern.permute.xlu1 %v6378_v38 }
 0xaf5   : > { %3669 = vmatpush1.bf16.msra.mxu0 %v5925_v13  ;;  %4105 = vperm.xlu1 %6064, %v5578_v55  }
 0xaf6   : > { %3670 = vmatprep.subr.bf16.mxu0 %v5924_v53 }
 0xaf9   : > { %3671 = vmatpush1.bf16.msra.mxu0 %v5923_v42  ;;  %6066 = vset.pattern.permute.xlu1 %v6377_v37 }
 0xafa   : > { %3672 = vmatprep.subr.bf16.mxu0 %v5922_v28  ;;  %4073 = vperm.xlu1 %6066, %v5576_v9   ;;  %v3771_v28 = vpop.permute.xlu1 %3770 }
 0xafd   : > { %3673 = vmatpush1.bf16.msra.mxu0 %v5921_v7 }
 0xafe   : > { %3674 = vmatprep.subr.bf16.mxu0 %v5920_v59  ;;  %4077 = vperm.xlu1 %6066, %v5577_v60   ;;  %v3795_v7 = vpop.permute.xlu1 %3794 }
 0xb01   : > { %3675 = vmatpush1.bf16.msra.mxu0 %v5919_v21 }
 0xb02   : > { %4270 = vmatprep.subr.bf16.mxu0 %v7626_v0  ;;  %6067 = vset.pattern.permute.xlu1 %v6378_v38  ;;  %v3799_v55 = vpop.permute.xlu1 %3798 }
 0xb03   : > { %4101 = vperm.xlu1 %6067, %v5577_v60  }
 0xb04   : > { %5562 = vmatmul.mubr.msk.bf16.vlgmr.msra.gmra.mxu0 %vm748_vm4, %v6109_v35 }
 0xb05   : > { %3702 = vmatprep.mubr.bf16.mxu0 %v6374_v3  ;;  %4271 = vmatpush1.bf16.msra.mxu0 %v7630_v17 }
 0xb06   : > { %4272 = vmatprep.subr.bf16.mxu0 %v7626_v0 }
 0xb07   : > { %6069 = vset.pattern.permute.xlu1 %v6374_v3 }
 0xb09   : > { %4273 = vmatpush1.bf16.msra.mxu0 %v7630_v17 }
 0xb0c   : > { %5563 = vmatmul.mubr.msk.bf16.gmra.mxu0 %vm748_vm4, %v6110_v26 }
 0xb0d   : > { %4298 = vmatprep.mubr.bf16.mxu0 %v6374_v3 }
 0xbc4   : > { %v3694_v31 = vpop.f32.mrf.mxu0 }
 0xbc5   : > { %v7660_v32 = vadd.f32 %v3694_v31, %v3567_v54 }
 0xbc6   : > { %v3696_v57 = vpop.f32.mrf.mxu0 }
 0xbc7   : > { %v3697_v45 = vadd.f32 %v3696_v57, %v3567_v54  ;;  %v3721_v14 = vmin.f32 %v7660_v32, 0.0  ;;  %v3775_v57 = vpop.permute.xlu0 %3774 }
 0xbc8   : > { %v3698_v41 = vpop.f32.mrf.mxu0 }
 0xbc9   : > { %v3722_v6 = vmin.f32 %v3697_v45, 0.0  ;;  %v3699_v61 = vadd.f32 %v3698_v41, %v3572_v58  ;;  %v3729_v2 = vmul.f32 1.442695, %v3721_v14  ;;  %v3714_v9 = vmax.f32 %v3697_v45, 0.0  ;;  %v3767_v45 = vpop.permute.xlu1 %3766 }
 0xbca   : > { %v3700_v52 = vpop.f32.mrf.mxu0 }
 0xbcb   : > { %v3723_v24 = vmin.f32 %v3699_v61, 0.0  ;;  %v3731_v51 = vmul.f32 1.442695, %v3722_v6  ;;  %v3701_v18 = vadd.f32 %v3700_v52, %v3572_v58  ;;  %v3715_v31 = vmax.f32 %v3699_v61, 0.0 }
 0xbcc   : > { %v3704_v34 = vpop.f32.mrf.mxu0  ;;  %v3713_v6 = vmax.f32 %v7660_v32, 0.0 }
 0xbcd   : > { %v3733_v5 = vmul.f32 1.442695, %v3723_v24  ;;  %v3705_v4 = vadd.f32 %v3704_v34, %v3577_v47  ;;  %v3724_v25 = vmin.f32 %v3701_v18, 0.0  ;;  %6231 = vpow2.f32 %v3731_v51 }
 0xbce   : > { %v3706_v11 = vpop.f32.mrf.mxu0  ;;  %v3716_v21 = vmax.f32 %v3701_v18, 0.0 }
 0xbcf   : > { %v3725_v48 = vmin.f32 %v3705_v4, 0.0  ;;  %v3707_v49 = vadd.f32 %v3706_v11, %v3577_v47  ;;  %v3735_v30 = vmul.f32 1.442695, %v3724_v25  ;;  %6233 = vpow2.f32 %v3733_v5 }
 0xbd0   : > { %v3708_v29 = vpop.f32.mrf.mxu0  ;;  %v3717_v26 = vmax.f32 %v3705_v4, 0.0 }
 0xbd1   : > { %v3737_v13 = vmul.f32 1.442695, %v3725_v48  ;;  %v3726_v53 = vmin.f32 %v3707_v49, 0.0  ;;  %v3709_v16 = vadd.f32 %v3708_v29, %v3582_v10  ;;  %6235 = vpow2.f32 %v3735_v30 }
 0xbd2   : > { %v3710_v43 = vpop.f32.mrf.mxu0  ;;  %v3718_v54 = vmax.f32 %v3707_v49, 0.0 }
 0xbd3   : > { %6237 = vpow2.f32 %v3737_v13  ;;  %v3739_v62 = vmul.f32 1.442695, %v3726_v53  ;;  %v3727_v42 = vmin.f32 %v3709_v16, 0.0  ;;  %v3711_v23 = vadd.f32 %v3710_v43, %v3582_v10 }
 0xbd4   : > { %6239 = vpow2.f32 %v3729_v2  ;;  %v3719_v52 = vmax.f32 %v3709_v16, 0.0  ;;  %v3763_v2 = vpop.permute.xlu0 %3762 }
 0xbd5   : > { %6241 = vpow2.f32 %v3739_v62  ;;  %v3741_v12 = vmul.f32 1.442695, %v3727_v42  ;;  %v3728_v20 = vmin.f32 %v3711_v23, 0.0  ;;  %v3720_v11 = vmax.f32 %v3711_v23, 0.0 }
 0xbd7   : > { %6243 = vpow2.f32 %v3741_v12  ;;  %v3743_v27 = vmul.f32 1.442695, %v3728_v20 }
 0xbd9   : > { %6245 = vpow2.f32 %v3743_v27  ;;  %v3791_v27 = vpop.permute.xlu1 %3790 }
 0xbda   : > { %v6232_v59 = vpop.eup %6231 }
 0xbdb   : > { %v3746_v41 = vadd.f32 %v6232_v59, %v3714_v9 }
 0xbdc   : > { %v6234_v15 = vpop.eup %6233 }
 0xbdd   : > { %v3747_v14 = vadd.f32 %v6234_v15, %v3715_v31  ;;  %v5565_v48 = vadd.f32 -1.0, %v3746_v41  ;;  %v5612_v41 = vld [vmem:[%s7920_s5 + $0x120] sm:$0xff] }
 0xbde   : > { %v6236_v35 = vpop.eup %6235 }
 0xbdf   : > { %v3748_v60 = vadd.f32 %v6236_v35, %v3716_v21  ;;  %v5566_v30 = vadd.f32 -1.0, %v3747_v14  ;;  %v3778_v42 = vmul.f32 %v5565_v48, %v3763_v2 }
 0xbe0   : > { %v6238_v33 = vpop.eup %6237 }
 0xbe1   : > { %v6240_v47 = vpop.eup %6239  ;;  %v3749_v10 = vadd.f32 %v6238_v33, %v3717_v26  ;;  %v5567_v18 = vadd.f32 -1.0, %v3748_v60  ;;  %v3779_v20 = vmul.f32 %v5566_v30, %v3767_v45  ;;  %v3787_v26 = vpop.permute.xlu0 %3786 }
 0xbe2   : > { %v6242_v58 = vpop.eup %6241  ;;  %v3745_v25 = vadd.f32 %v6240_v47, %v3713_v6  ;;  %v3802_v9 = vadd.f32 %v3787_v26, %v3778_v42  ;;  %v5613_v6 = vld [vmem:[%s7920_s5 + $0x128] sm:$0xff] }
 0xbe3   : > { %v3750_v24 = vadd.f32 %v6242_v58, %v3718_v54  ;;  %v5568_v34 = vadd.f32 -1.0, %v3749_v10  ;;  %v3780_v53 = vmul.f32 %v5567_v18, %v3767_v45  ;;  %v3803_v47 = vadd.f32 %v3791_v27, %v3779_v20  ;;  %v5614_v58 = vld [vmem:[%s7920_s5 + $0x130] sm:$0xff] }
 0xbe4   : > { %v6244_v51 = vpop.eup %6243  ;;  %v5564_v43 = vadd.f32 -1.0, %v3745_v25  ;;  %4182 = vperm.xlu0 %6068, %v5614_v58  }
 0xbe5   : > { %v5569_v5 = vadd.f32 -1.0, %v3750_v24  ;;  %v3751_v4 = vadd.f32 %v6244_v51, %v3719_v52  ;;  %v3781_v32 = vmul.f32 %v5568_v34, %v3771_v28  ;;  %v3804_v21 = vadd.f32 %v3791_v27, %v3780_v53  ;;  %v3888_v52 = vpop.permute.xlu1 %3887 }
 0xbe6   : > { %v6246_v61 = vpop.eup %6245  ;;  %v3777_v35 = vmul.f32 %v5564_v43, %v3763_v2 }
 0xbe7   : > { %v5570_v49 = vadd.f32 -1.0, %v3751_v4  ;;  %v3782_v29 = vmul.f32 %v5569_v5, %v3771_v28  ;;  %v3752_v13 = vadd.f32 %v6246_v61, %v3720_v11  ;;  %v3805_v23 = vadd.f32 %v3795_v7, %v3781_v32  ;;  %v3893_v32 = vpop.permute.xlu0 %3892 }
 0xbe8   : > { %v7674_v54 = vadd.f32 %v3804_v21, %v7508_v56  ;;  %4177 = vperm.xlu0 %6068, %v5613_v6  }
 0xbe9   : > { %v3783_v16 = vmul.f32 %v5570_v49, %v3775_v57  ;;  %v5571_v62 = vadd.f32 -1.0, %v3752_v13  ;;  %v3806_v59 = vadd.f32 %v3795_v7, %v3782_v29  ;;  %v7677_v10 = vadd.f32 %v3805_v23, %v7482_v44  ;;  %v3878_v24 = vpop.permute.xlu1 %3877 }
 0xbea   : > { %v3801_v7 = vadd.f32 %v3787_v26, %v3777_v35 }
 0xbeb   : > { %v3807_v12 = vadd.f32 %v3799_v55, %v3783_v16  ;;  %v3784_v15 = vmul.f32 %v5571_v62, %v3775_v57  ;;  %v7668_v28 = vadd.f32 %v3806_v59, %v7495_v36  ;;  %v7687_v57 = vadd.f32 %v3803_v47, %v7489_v46  ;;  %v6111_v46 = vld [vmem:[%s7919_s4 + $0x80] sm:$0xff]  }
 0xbec   : > { %v7692_v44 = vadd.f32 %v3801_v7, %v7498_v19  ;;  %v6112_v19 = vld [vmem:[%s7919_s4 + $0x88] sm:$0xff]   ;;  %6071 = vset.pattern.permute.xlu0 %v6377_v37 }
 0xbed   : > { %v3808_v33 = vadd.f32 %v3799_v55, %v3784_v15  ;;  %v7665_v60 = vadd.f32 %v3807_v12, %v7486_v22  ;;  %v7680_v55 = vadd.f32 %v3802_v9, %v7516_v50  ;;  %v5615_v50 = vld [vmem:[%s7920_s5 + $0x138] sm:$0xff]  ;;  %v3883_v18 = vpop.permute.xlu1 %3882 }
 0xbee   : > { %v5931_v56 = vpack.c.bf16 %v7687_v57, %v7692_v44  ;;  %4187 = vperm.xlu1 %6069, %v5615_v50   ;;  %4380 = vperm.xlu0 %6071, %v5615_v50  }
 0xbef   : > { %v7671_v31 = vadd.f32 %v3808_v33, %v7505_v63  ;;  %v5933_v36 = vpack.c.bf16 %v7665_v60, %v7677_v10  ;;  %v5932_v63 = vpack.c.bf16 %v7674_v54, %v7680_v55 }
 0xbf1   : > { %v5934_v22 = vpack.c.bf16 %v7671_v31, %v7668_v28  ;;  %v4086_v9 = vpop.permute.xlu1 %4085 }
 0xbf2   : > { %4172 = vperm.xlu1 %6069, %v5612_v41   ;;  %4368 = vperm.xlu0 %6071, %v5612_v41  }
 0xbf3   : > { %3979 = vmatprep.subr.bf16.mxu1 %v5934_v22 }
 0xbf4   : > { %3980 = vmatpush1.bf16.msra.mxu1 %v5933_v36 }
 0xbf5   : > { %3981 = vmatprep.subr.bf16.mxu1 %v5932_v63  ;;  %v4106_v22 = vpop.permute.xlu1 %4105 }
 0xbf6   : > { %6070 = vset.pattern.permute.xlu1 %v6377_v37  ;;  %6074 = vset.pattern.permute.xlu0 %v6378_v38 }
 0xbf7   : > { %4376 = vperm.xlu1 %6070, %v5614_v58   ;;  %4392 = vperm.xlu0 %6074, %v5612_v41  }
 0xbf8   : > { %3982 = vmatpush1.bf16.msra.mxu1 %v5931_v56 }
 0xbf9   : > { %3983 = vmatprep.subr.bf16.mxu1 %v7626_v0  ;;  %v4074_v41 = vpop.permute.xlu1 %4073 }
 0xbfb   : > { %6072 = vset.pattern.permute.xlu1 %v6378_v38  ;;  %6077 = vset.pattern.permute.xlu0 %v6374_v3 }
 0xbfc   : > { %3984 = vmatpush1.bf16.msra.mxu1 %v7630_v17  ;;  %4400 = vperm.xlu1 %6072, %v5614_v58  }
 0xbfd   : > { %3985 = vmatprep.subr.bf16.mxu1 %v7626_v0 }
 0xc00   : > { %3986 = vmatpush1.bf16.msra.mxu1 %v7630_v17  ;;  %4404 = vperm.xlu1 %6072, %v5615_v50  }
 0xc01   : > { %4581 = vmatprep.subr.bf16.mxu1 %v7626_v0 }
 0xc03   : > { %5598 = vmatmul.mubr.msk.bf16.vlgmr.msra.gmra.mxu1 %vm748_vm4, %v6111_v46 }
 0xc04   : > { %4013 = vmatprep.mubr.bf16.mxu1 %v6374_v3  ;;  %4582 = vmatpush1.bf16.msra.mxu1 %v7630_v17 }
 0xc05   : > { %4583 = vmatprep.subr.bf16.mxu1 %v7626_v0  ;;  %6073 = vset.pattern.permute.xlu1 %v6377_v37 }
 0xc06   : > { %4372 = vperm.xlu1 %6073, %v5613_v6  }
 0xc08   : > { %4584 = vmatpush1.bf16.msra.mxu1 %v7630_v17 }
 0xc0a   : > { %6075 = vset.pattern.permute.xlu1 %v6378_v38 }
 0xc0b   : > { %5599 = vmatmul.mubr.msk.bf16.gmra.mxu1 %vm748_vm4, %v6112_v19  ;;  %4396 = vperm.xlu1 %6075, %v5613_v6  }
 0xc0c   : > { %4609 = vmatprep.mubr.bf16.mxu1 %v6374_v3 }
 0xc0f   : > { %6076 = vset.pattern.permute.xlu1 %v6374_v3 }
 0xcc3   : > { %v4005_v14 = vpop.f32.mrf.mxu1 }
 0xcc4   : > { %v7734_v45 = vadd.f32 %v4005_v14, %v3878_v24 }
 0xcc5   : > { %v4007_v51 = vpop.f32.mrf.mxu1 }
 0xcc6   : > { %v4008_v34 = vadd.f32 %v4007_v51, %v3878_v24  ;;  %v4032_v29 = vmin.f32 %v7734_v45, 0.0 }
 0xcc7   : > { %v4009_v5 = vpop.f32.mrf.mxu1 }
 0xcc8   : > { %v4033_v4 = vmin.f32 %v4008_v34, 0.0  ;;  %v4010_v25 = vadd.f32 %v4009_v5, %v3883_v18  ;;  %v4040_v15 = vmul.f32 1.442695, %v4032_v29  ;;  %v4082_v5 = vpop.permute.xlu0 %4081 }
 0xcc9   : > { %v4011_v11 = vpop.f32.mrf.mxu1 }
 0xcca   : > { %v4034_v48 = vmin.f32 %v4010_v25, 0.0  ;;  %v4012_v61 = vadd.f32 %v4011_v11, %v3883_v18  ;;  %v4042_v2 = vmul.f32 1.442695, %v4033_v4  ;;  %v4026_v51 = vmax.f32 %v4010_v25, 0.0 }
 0xccb   : > { %v4015_v49 = vpop.f32.mrf.mxu1 }
 0xccc   : > { %v4016_v30 = vadd.f32 %v4015_v49, %v3888_v52  ;;  %v4035_v13 = vmin.f32 %v4012_v61, 0.0  ;;  %v4044_v62 = vmul.f32 1.442695, %v4034_v48  ;;  %6247 = vpow2.f32 %v4042_v2 }
 0xccd   : > { %v4017_v53 = vpop.f32.mrf.mxu1  ;;  %v4027_v46 = vmax.f32 %v4012_v61, 0.0  ;;  %v4024_v2 = vmax.f32 %v7734_v45, 0.0 }
 0xcce   : > { %v4036_v16 = vmin.f32 %v4016_v30, 0.0  ;;  %v4018_v43 = vadd.f32 %v4017_v53, %v3888_v52  ;;  %v4046_v42 = vmul.f32 1.442695, %v4035_v13  ;;  %v4028_v50 = vmax.f32 %v4016_v30, 0.0 }
 0xccf   : > { %v4019_v12 = vpop.f32.mrf.mxu1  ;;  %v4025_v52 = vmax.f32 %v4008_v34, 0.0 }
 0xcd0   : > { %v4048_v20 = vmul.f32 1.442695, %v4036_v16  ;;  %v4037_v27 = vmin.f32 %v4018_v43, 0.0  ;;  %v4020_v59 = vadd.f32 %v4019_v12, %v3893_v32  ;;  %6249 = vpow2.f32 %v4046_v42 }
 0xcd1   : > { %v4021_v21 = vpop.f32.mrf.mxu1  ;;  %v4029_v58 = vmax.f32 %v4018_v43, 0.0 }
 0xcd2   : > { %6251 = vpow2.f32 %v4048_v20  ;;  %v4050_v23 = vmul.f32 1.442695, %v4037_v27  ;;  %v4038_v35 = vmin.f32 %v4020_v59, 0.0  ;;  %v4022_v26 = vadd.f32 %v4021_v21, %v3893_v32  ;;  %v4110_v20 = vpop.permute.xlu0 %4109 }
 0xcd3   : > { %6253 = vpow2.f32 %v4044_v62  ;;  %v4030_v18 = vmax.f32 %v4020_v59, 0.0  ;;  %v4078_v62 = vpop.permute.xlu1 %4077 }
 0xcd4   : > { %6255 = vpow2.f32 %v4050_v23  ;;  %v4052_v33 = vmul.f32 1.442695, %v4038_v35  ;;  %v4039_v47 = vmin.f32 %v4022_v26, 0.0  ;;  %v4031_v61 = vmax.f32 %v4022_v26, 0.0 }
 0xcd5   : > { %6257 = vpow2.f32 %v4040_v15 }
 0xcd6   : > { %6259 = vpow2.f32 %v4052_v33  ;;  %v4054_v7 = vmul.f32 1.442695, %v4039_v47 }
 0xcd8   : > { %6261 = vpow2.f32 %v4054_v7  ;;  %v4102_v7 = vpop.permute.xlu1 %4101 }
 0xcd9   : > { %v6248_v36 = vpop.eup %6247 }
 0xcda   : > { %v4057_v49 = vadd.f32 %v6248_v36, %v4025_v52 }
 0xcdc   : > { %v5601_v25 = vadd.f32 -1.0, %v4057_v49 }
 0xcdd   : > { %v6250_v63 = vpop.eup %6249 }
 0xcde   : > { %v4059_v24 = vadd.f32 %v6250_v63, %v4027_v46  ;;  %v4089_v35 = vmul.f32 %v5601_v25, %v4074_v41 }
 0xcdf   : > { %v6252_v56 = vpop.eup %6251 }
 0xce0   : > { %v6254_v19 = vpop.eup %6253  ;;  %v4060_v4 = vadd.f32 %v6252_v56, %v4028_v50  ;;  %v5603_v30 = vadd.f32 -1.0, %v4059_v24  ;;  %v4098_v50 = vpop.permute.xlu0 %4097 }
 0xce1   : > { %v6256_v6 = vpop.eup %6255  ;;  %v4058_v13 = vadd.f32 %v6254_v19, %v4026_v51 }
 0xce2   : > { %v6258_v14 = vpop.eup %6257  ;;  %v4061_v11 = vadd.f32 %v6256_v6, %v4029_v58  ;;  %v5604_v43 = vadd.f32 -1.0, %v4060_v4  ;;  %v4091_v21 = vmul.f32 %v5603_v30, %v4078_v62  ;;  %v4113_v6 = vadd.f32 %v4098_v50, %v4089_v35  ;;  %v5648_v4 = vld [vmem:[%s7920_s5 + $0x140] sm:$0xff] }
 0xce3   : > { %v6260_v48 = vpop.eup %6259  ;;  %v4056_v34 = vadd.f32 %v6258_v14, %v4024_v2  ;;  %v5602_v27 = vadd.f32 -1.0, %v4058_v13 }
 0xce4   : > { %v4062_v29 = vadd.f32 %v6260_v48, %v4030_v18  ;;  %v5605_v53 = vadd.f32 -1.0, %v4061_v11  ;;  %v4092_v23 = vmul.f32 %v5604_v43, %v4082_v5  ;;  %v4115_v56 = vadd.f32 %v4102_v7, %v4091_v21  ;;  %v5649_v11 = vld [vmem:[%s7920_s5 + $0x148] sm:$0xff]  ;;  %v4188_v48 = vpop.permute.xlu1 %4187  ;;  %v4183_v49 = vpop.permute.xlu0 %4182 }
 0xce5   : > { %v6262_v32 = vpop.eup %6261  ;;  %v5600_v45 = vadd.f32 -1.0, %v4056_v34  ;;  %v4090_v47 = vmul.f32 %v5602_v27, %v4078_v62 }
 0xce6   : > { %v5606_v16 = vadd.f32 -1.0, %v4062_v29  ;;  %v4063_v42 = vadd.f32 %v6262_v32, %v4031_v61  ;;  %v4093_v15 = vmul.f32 %v5605_v53, %v4082_v5  ;;  %v4116_v46 = vadd.f32 %v4106_v22, %v4092_v23  ;;  %v5651_v5 = vld [vmem:[%s7920_s5 + $0x158] sm:$0xff] }
 0xce7   : > { %v4088_v19 = vmul.f32 %v5600_v45, %v4074_v41  ;;  %v4114_v24 = vadd.f32 %v4102_v7, %v4090_v47  ;;  %v5936_v14 = vpack.c.bf16 %v4115_v56, %v4113_v6  ;;  %v5650_v41 = vld [vmem:[%s7920_s5 + $0x150] sm:$0xff]  ;;  %4498 = vperm.xlu0 %6077, %v5651_v5  }
 0xce8   : > { %v4094_v12 = vmul.f32 %v5606_v16, %v4086_v9  ;;  %v5607_v59 = vadd.f32 -1.0, %v4063_v42  ;;  %v4117_v36 = vadd.f32 %v4106_v22, %v4093_v15  ;;  %v6114_v22 = vld [vmem:[%s7919_s4 + $0x98] sm:$0xff]   ;;  %4493 = vperm.xlu1 %6076, %v5650_v41   ;;  %v4173_v29 = vpop.permute.xlu1 %4172  ;;  %v4178_v61 = vpop.permute.xlu0 %4177 }
 0xce9   : > { %v4112_v51 = vadd.f32 %v4098_v50, %v4088_v19 }
 0xcea   : > { %v4095_v33 = vmul.f32 %v5607_v59, %v4086_v9  ;;  %v4118_v26 = vadd.f32 %v4110_v20, %v4094_v12  ;;  %v6113_v9 = vld [vmem:[%s7919_s4 + $0x90] sm:$0xff]  }
 0xceb   : > { %v5935_v18 = vpack.c.bf16 %v4114_v24, %v4112_v51  ;;  %6078 = vset.pattern.permute.xlu0 %v6377_v37 }
 0xcec   : > { %v4119_v63 = vadd.f32 %v4110_v20, %v4095_v33  ;;  %v5937_v52 = vpack.c.bf16 %v4118_v26, %v4116_v46  ;;  %4483 = vperm.xlu1 %6076, %v5648_v4   ;;  %4687 = vperm.xlu0 %6078, %v5650_v41   ;;  %v4377_v19 = vpop.permute.xlu1 %4376 }
 0xcee   : > { %v5938_v58 = vpack.c.bf16 %v4119_v63, %v4117_v36 }
 0xcf0   : > { %4274 = vmatprep.subr.bf16.mxu0 %v5938_v58  ;;  %4488 = vperm.xlu1 %6076, %v5649_v11   ;;  %v4401_v24 = vpop.permute.xlu1 %4400 }
 0xcf1   : > { %4275 = vmatpush1.bf16.msra.mxu0 %v5937_v52  ;;  %6081 = vset.pattern.permute.xlu0 %v6378_v38 }
 0xcf2   : > { %4276 = vmatprep.subr.bf16.mxu0 %v5936_v14  ;;  %4715 = vperm.xlu0 %6081, %v5651_v5  }
 0xcf4   : > { %6079 = vset.pattern.permute.xlu1 %v6377_v37 }
 0xcf5   : > { %4277 = vmatpush1.bf16.msra.mxu0 %v5935_v18  ;;  %4691 = vperm.xlu1 %6079, %v5651_v5  }
 0xcf6   : > { %4278 = vmatprep.subr.bf16.mxu0 %v7626_v0  ;;  %4703 = vperm.xlu0 %6081, %v5648_v4  }
 0xcf9   : > { %4279 = vmatpush1.bf16.msra.mxu0 %v7630_v17  ;;  %6080 = vset.pattern.permute.xlu1 %v6378_v38 }
 0xcfa   : > { %4280 = vmatprep.subr.bf16.mxu0 %v7626_v0  ;;  %4711 = vperm.xlu1 %6080, %v5650_v41   ;;  %v4405_v41 = vpop.permute.xlu1 %4404 }
 0xcfb   : > { %6084 = vset.pattern.permute.xlu0 %v6374_v3 }
 0xcfd   : > { %4281 = vmatpush1.bf16.msra.mxu0 %v7630_v17 }
 0xcfe   : > { %4876 = vmatprep.subr.bf16.mxu0 %v7626_v0  ;;  %6082 = vset.pattern.permute.xlu1 %v6377_v37 }
 0xcff   : > { %4679 = vperm.xlu1 %6082, %v5648_v4  }
 0xd00   : > { %5634 = vmatmul.mubr.msk.bf16.vlgmr.msra.gmra.mxu0 %vm748_vm4, %v6113_v9 }
 0xd01   : > { %4308 = vmatprep.mubr.bf16.mxu0 %v6374_v3  ;;  %4877 = vmatpush1.bf16.msra.mxu0 %v7630_v17 }
 0xd02   : > { %4878 = vmatprep.subr.bf16.mxu0 %v7626_v0 }
 0xd03   : > { %4683 = vperm.xlu1 %6082, %v5649_v11  }
 0xd05   : > { %4879 = vmatpush1.bf16.msra.mxu0 %v7630_v17 }
 0xd07   : > { %6083 = vset.pattern.permute.xlu1 %v6378_v38 }
 0xd08   : > { %5635 = vmatmul.mubr.msk.bf16.gmra.mxu0 %vm748_vm4, %v6114_v22  ;;  %4707 = vperm.xlu1 %6083, %v5649_v11  }
 0xd09   : > { %4904 = vmatprep.mubr.bf16.mxu0 %v6374_v3 }
 0xd0c   : > { %6085 = vset.pattern.permute.xlu1 %v6374_v3 }
 0xdc0   : > { %v4300_v2 = vpop.f32.mrf.mxu0 }
 0xdc1   : > { %v7776_v30 = vadd.f32 %v4300_v2, %v4173_v29 }
 0xdc2   : > { %v4302_v13 = vpop.f32.mrf.mxu0 }
 0xdc3   : > { %v4303_v53 = vadd.f32 %v4302_v13, %v4173_v29  ;;  %v4327_v42 = vmin.f32 %v7776_v30, 0.0  ;;  %v4381_v13 = vpop.permute.xlu0 %4380 }
 0xdc4   : > { %v4304_v32 = vpop.f32.mrf.mxu0 }
 0xdc5   : > { %v4328_v16 = vmin.f32 %v4303_v53, 0.0  ;;  %v4305_v43 = vadd.f32 %v4304_v32, %v4178_v61  ;;  %v4335_v35 = vmul.f32 1.442695, %v4327_v42  ;;  %v4320_v4 = vmax.f32 %v4303_v53, 0.0  ;;  %v4373_v53 = vpop.permute.xlu1 %4372 }
 0xdc6   : > { %v4306_v34 = vpop.f32.mrf.mxu0 }
 0xdc7   : > { %v4329_v62 = vmin.f32 %v4305_v43, 0.0  ;;  %v4337_v25 = vmul.f32 1.442695, %v4328_v16  ;;  %v4307_v12 = vadd.f32 %v4306_v34, %v4178_v61  ;;  %v4321_v2 = vmax.f32 %v4305_v43, 0.0 }
 0xdc8   : > { %v4310_v20 = vpop.f32.mrf.mxu0  ;;  %v4319_v16 = vmax.f32 %v7776_v30, 0.0 }
 0xdc9   : > { %v4339_v27 = vmul.f32 1.442695, %v4329_v62  ;;  %v4311_v59 = vadd.f32 %v4310_v20, %v4183_v49  ;;  %v4330_v15 = vmin.f32 %v4307_v12, 0.0  ;;  %6263 = vpow2.f32 %v4337_v25 }
 0xdca   : > { %v4312_v21 = vpop.f32.mrf.mxu0  ;;  %v4322_v18 = vmax.f32 %v4307_v12, 0.0 }
 0xdcb   : > { %v4331_v23 = vmin.f32 %v4311_v59, 0.0  ;;  %v4313_v45 = vadd.f32 %v4312_v21, %v4183_v49  ;;  %v4341_v33 = vmul.f32 1.442695, %v4330_v15  ;;  %6265 = vpow2.f32 %v4339_v27 }
 0xdcc   : > { %v4314_v26 = vpop.f32.mrf.mxu0  ;;  %v4323_v22 = vmax.f32 %v4311_v59, 0.0 }
 0xdcd   : > { %v4343_v47 = vmul.f32 1.442695, %v4331_v23  ;;  %v4332_v7 = vmin.f32 %v4313_v45, 0.0  ;;  %v4315_v36 = vadd.f32 %v4314_v26, %v4188_v48  ;;  %6267 = vpow2.f32 %v4341_v33 }
 0xdce   : > { %v4316_v63 = vpop.f32.mrf.mxu0  ;;  %v4324_v29 = vmax.f32 %v4313_v45, 0.0 }
 0xdcf   : > { %6269 = vpow2.f32 %v4343_v47  ;;  %v4345_v56 = vmul.f32 1.442695, %v4332_v7  ;;  %v4333_v46 = vmin.f32 %v4315_v36, 0.0  ;;  %v4317_v50 = vadd.f32 %v4316_v63, %v4188_v48 }
 0xdd0   : > { %6271 = vpow2.f32 %v4335_v35  ;;  %v4325_v34 = vmax.f32 %v4315_v36, 0.0  ;;  %v4369_v35 = vpop.permute.xlu0 %4368 }
 0xdd1   : > { %6273 = vpow2.f32 %v4345_v56  ;;  %v4347_v58 = vmul.f32 1.442695, %v4333_v46  ;;  %v4334_v6 = vmin.f32 %v4317_v50, 0.0  ;;  %v4326_v21 = vmax.f32 %v4317_v50, 0.0 }
 0xdd3   : > { %6275 = vpow2.f32 %v4347_v58  ;;  %v4349_v52 = vmul.f32 1.442695, %v4334_v6 }
 0xdd5   : > { %6277 = vpow2.f32 %v4349_v52  ;;  %v4397_v52 = vpop.permute.xlu1 %4396 }
 0xdd6   : > { %v6264_v14 = vpop.eup %6263 }
 0xdd7   : > { %v4352_v32 = vadd.f32 %v6264_v14, %v4320_v4 }
 0xdd8   : > { %v6266_v51 = vpop.eup %6265 }
 0xdd9   : > { %v4353_v42 = vadd.f32 %v6266_v51, %v4321_v2  ;;  %v5637_v23 = vadd.f32 -1.0, %v4352_v32  ;;  %v5684_v32 = vld [vmem:[%s7920_s5 + $0x160] sm:$0xff] }
 0xdda   : > { %v6268_v9 = vpop.eup %6267 }
 0xddb   : > { %v4354_v11 = vadd.f32 %v6268_v9, %v4322_v18  ;;  %v5638_v33 = vadd.f32 -1.0, %v4353_v42  ;;  %v4384_v46 = vmul.f32 %v5637_v23, %v4369_v35 }
 0xddc   : > { %v6270_v5 = vpop.eup %6269 }
 0xddd   : > { %v6272_v49 = vpop.eup %6271  ;;  %v4355_v48 = vadd.f32 %v6270_v5, %v4323_v22  ;;  %v5639_v12 = vadd.f32 -1.0, %v4354_v11  ;;  %v4385_v6 = vmul.f32 %v5638_v33, %v4373_v53  ;;  %v4393_v22 = vpop.permute.xlu0 %4392 }
 0xdde   : > { %v6274_v61 = vpop.eup %6273  ;;  %v4351_v15 = vadd.f32 %v6272_v49, %v4319_v16  ;;  %v4408_v4 = vadd.f32 %v4393_v22, %v4384_v46  ;;  %v5685_v16 = vld [vmem:[%s7920_s5 + $0x168] sm:$0xff] }
 0xddf   : > { %v4356_v62 = vadd.f32 %v6274_v61, %v4324_v29  ;;  %v5640_v20 = vadd.f32 -1.0, %v4355_v48  ;;  %v4386_v7 = vmul.f32 %v5639_v12, %v4373_v53  ;;  %v4409_v49 = vadd.f32 %v4397_v52, %v4385_v6  ;;  %v5686_v61 = vld [vmem:[%s7920_s5 + $0x170] sm:$0xff] }
 0xde0   : > { %v6276_v25 = vpop.eup %6275  ;;  %v5636_v63 = vadd.f32 -1.0, %v4351_v15  ;;  %4788 = vperm.xlu1 %6085, %v5686_v61  }
 0xde1   : > { %v5641_v27 = vadd.f32 -1.0, %v4356_v62  ;;  %v4357_v59 = vadd.f32 %v6276_v25, %v4325_v34  ;;  %v4387_v30 = vmul.f32 %v5640_v20, %v4377_v19  ;;  %v4410_v18 = vadd.f32 %v4397_v52, %v4386_v7 }
 0xde2   : > { %v6278_v43 = vpop.eup %6277  ;;  %v4383_v9 = vmul.f32 %v5636_v63, %v4369_v35 }
 0xde3   : > { %v5642_v45 = vadd.f32 -1.0, %v4357_v59  ;;  %v4388_v26 = vmul.f32 %v5641_v27, %v4377_v19  ;;  %v4358_v47 = vadd.f32 %v6278_v43, %v4326_v21  ;;  %v4411_v50 = vadd.f32 %v4401_v24, %v4387_v30 }
 0xde4   : > { %v7790_v29 = vadd.f32 %v4410_v18, %v7674_v54  ;;  %4783 = vperm.xlu1 %6085, %v5685_v16  }
 0xde5   : > { %v4389_v36 = vmul.f32 %v5642_v45, %v4381_v13  ;;  %v5643_v56 = vadd.f32 -1.0, %v4358_v47  ;;  %v4412_v14 = vadd.f32 %v4401_v24, %v4388_v26  ;;  %v7793_v48 = vadd.f32 %v4411_v50, %v7677_v10  ;;  %v4499_v26 = vpop.permute.xlu0 %4498 }
 0xde6   : > { %v4407_v24 = vadd.f32 %v4393_v22, %v4383_v9 }
 0xde7   : > { %v4413_v58 = vadd.f32 %v4405_v41, %v4389_v36  ;;  %v4390_v51 = vmul.f32 %v5643_v56, %v4381_v13  ;;  %v7784_v19 = vadd.f32 %v4412_v14, %v7668_v28  ;;  %v7803_v13 = vadd.f32 %v4409_v49, %v7687_v57  ;;  %v6116_v57 = vld [vmem:[%s7919_s4 + $0xa8] sm:$0xff]  }
 0xde8   : > { %v7808_v54 = vadd.f32 %v4407_v24, %v7692_v44  ;;  %v5687_v44 = vld [vmem:[%s7920_s5 + $0x178] sm:$0xff]  ;;  %6086 = vset.pattern.permute.xlu1 %v6377_v37 }
 0xde9   : > { %v4414_v5 = vadd.f32 %v4405_v41, %v4390_v51  ;;  %v7781_v11 = vadd.f32 %v4413_v58, %v7665_v60  ;;  %v7796_v41 = vadd.f32 %v4408_v4, %v7680_v55  ;;  %v6115_v55 = vld [vmem:[%s7919_s4 + $0xa0] sm:$0xff]   ;;  %4793 = vperm.xlu0 %6084, %v5687_v44   ;;  %4986 = vperm.xlu1 %6086, %v5687_v44  }
 0xdea   : > { %v5939_v10 = vpack.c.bf16 %v7803_v13, %v7808_v54 }
 0xdeb   : > { %v7787_v2 = vadd.f32 %v4414_v5, %v7671_v31  ;;  %v5941_v28 = vpack.c.bf16 %v7781_v11, %v7793_v48  ;;  %v5940_v31 = vpack.c.bf16 %v7790_v29, %v7796_v41 }
 0xded   : > { %v5942_v60 = vpack.c.bf16 %v7787_v2, %v7784_v19  ;;  %4778 = vperm.xlu0 %6084, %v5684_v32   ;;  %6088 = vset.pattern.permute.xlu1 %v6378_v38 }
 0xdee   : > { %5010 = vperm.xlu1 %6088, %v5687_v44  }
 0xdef   : > { %4585 = vmatprep.subr.bf16.mxu1 %v5942_v60 }
 0xdf0   : > { %4586 = vmatpush1.bf16.msra.mxu1 %v5941_v28 }
 0xdf1   : > { %4587 = vmatprep.subr.bf16.mxu1 %v5940_v31  ;;  %6087 = vset.pattern.permute.xlu0 %v6377_v37 }
 0xdf2   : > { %4982 = vperm.xlu0 %6087, %v5686_v61   ;;  %6089 = vset.pattern.permute.xlu1 %v6377_v37 }
 0xdf3   : > { %4978 = vperm.xlu1 %6089, %v5685_v16  }
 0xdf4   : > { %4588 = vmatpush1.bf16.msra.mxu1 %v5939_v10 }
 0xdf5   : > { %4589 = vmatprep.subr.bf16.mxu1 %v7626_v0 }
 0xdf6   : > { %6090 = vset.pattern.permute.xlu0 %v6378_v38 }
 0xdf7   : > { %5006 = vperm.xlu0 %6090, %v5686_v61   ;;  %4974 = vperm.xlu1 %6089, %v5684_v32  }
 0xdf8   : > { %4590 = vmatpush1.bf16.msra.mxu1 %v7630_v17 }
 0xdf9   : > { %4591 = vmatprep.subr.bf16.mxu1 %v7626_v0 }
 0xdfb   : > { %4998 = vperm.xlu0 %6090, %v5684_v32   ;;  %6091 = vset.pattern.permute.xlu1 %v6378_v38 }
 0xdfc   : > { %4592 = vmatpush1.bf16.msra.mxu1 %v7630_v17  ;;  %5002 = vperm.xlu1 %6091, %v5685_v16  }
 0xdff   : > { %5670 = vmatmul.mubr.msk.bf16.vlgmr.msra.gmra.mxu1 %vm748_vm4, %v6115_v55  ;;  %6093 = vset.pattern.permute.xlu0 %v6374_v3 }
 0xe00   : > { %4619 = vmatprep.mubr.bf16.mxu1 %v6374_v3  ;;  %6092 = vset.pattern.permute.xlu1 %v6374_v3 }
 0xe07   : > { %5671 = vmatmul.mubr.msk.bf16.gmra.mxu1 %vm748_vm4, %v6116_v57 }
 0xe08   : > { %5108 = vmatprep.mubr.f32.mxu1 %v6373_v1  ;;  %v4494_v1 = vpop.permute.xlu1 %4493 }
 0xe0c   : > { %v4484_v34 = vpop.permute.xlu1 %4483 }
 0xe10   : > { %v4489_v25 = vpop.permute.xlu1 %4488 }
 0xe14   : > { %v4692_v9 = vpop.permute.xlu1 %4691 }
 0xe18   : > { %v4712_v4 = vpop.permute.xlu1 %4711 }
 0xe1c   : > { %v4680_v57 = vpop.permute.xlu1 %4679 }
 0xebf   : > { %v4611_v62 = vpop.f32.mrf.mxu1 }
 0xec0   : > { %v7846_v37 = vadd.f32 %v4611_v62, %v4484_v34  ;;  %v4688_v62 = vpop.permute.xlu0 %4687 }
 0xec1   : > { %v4613_v42 = vpop.f32.mrf.mxu1 }
 0xec2   : > { %v4614_v12 = vadd.f32 %v4613_v42, %v4484_v34  ;;  %v4638_v45 = vmin.f32 %v7846_v37, 0.0 }
 0xec3   : > { %v4615_v20 = vpop.f32.mrf.mxu1 }
 0xec4   : > { %v4639_v27 = vmin.f32 %v4614_v12, 0.0  ;;  %v4616_v59 = vadd.f32 %v4615_v20, %v4489_v25  ;;  %v4646_v6 = vmul.f32 1.442695, %v4638_v45  ;;  %v4631_v61 = vmax.f32 %v4614_v12, 0.0 }
 0xec5   : > { %v4617_v15 = vpop.f32.mrf.mxu1 }
 0xec6   : > { %v4640_v53 = vmin.f32 %v4616_v59, 0.0  ;;  %v4618_v21 = vadd.f32 %v4617_v15, %v4489_v25  ;;  %v4648_v43 = vmul.f32 1.442695, %v4639_v27  ;;  %v4630_v15 = vmax.f32 %v7846_v37, 0.0 }
 0xec7   : > { %v4621_v23 = vpop.f32.mrf.mxu1 }
 0xec8   : > { %v4622_v38 = vadd.f32 %v4621_v23, %v4494_v1  ;;  %v4641_v35 = vmin.f32 %v4618_v21, 0.0  ;;  %v4650_v30 = vmul.f32 1.442695, %v4640_v53  ;;  %6279 = vpow2.f32 %v4648_v43 }
 0xec9   : > { %v4623_v33 = vpop.f32.mrf.mxu1  ;;  %v4633_v28 = vmax.f32 %v4618_v21, 0.0 }
 0xeca   : > { %v4642_v47 = vmin.f32 %v4622_v38, 0.0  ;;  %v4624_v7 = vadd.f32 %v4623_v33, %v4494_v1  ;;  %v4652_v36 = vmul.f32 1.442695, %v4641_v35  ;;  %v4634_v10 = vmax.f32 %v4622_v38, 0.0 }
 0xecb   : > { %v4625_v63 = vpop.f32.mrf.mxu1  ;;  %v4632_v1 = vmax.f32 %v4616_v59, 0.0 }
 0xecc   : > { %v4654_v56 = vmul.f32 1.442695, %v4642_v47  ;;  %v4643_v46 = vmin.f32 %v4624_v7, 0.0  ;;  %v4626_v58 = vadd.f32 %v4625_v63, %v4499_v26  ;;  %6281 = vpow2.f32 %v4652_v36 }
 0xecd   : > { %v4627_v52 = vpop.f32.mrf.mxu1  ;;  %v4635_v55 = vmax.f32 %v4624_v7, 0.0 }
 0xece   : > { %6283 = vpow2.f32 %v4654_v56  ;;  %v4656_v14 = vmul.f32 1.442695, %v4643_v46  ;;  %v4644_v51 = vmin.f32 %v4626_v58, 0.0  ;;  %v4628_v18 = vadd.f32 %v4627_v52, %v4499_v26  ;;  %v4684_v26 = vpop.permute.xlu1 %4683 }
 0xecf   : > { %6285 = vpow2.f32 %v4650_v30  ;;  %v4636_v34 = vmax.f32 %v4626_v58, 0.0  ;;  %v4716_v30 = vpop.permute.xlu0 %4715 }
 0xed0   : > { %6287 = vpow2.f32 %v4656_v14  ;;  %v4658_v50 = vmul.f32 1.442695, %v4644_v51  ;;  %v4645_v22 = vmin.f32 %v4628_v18, 0.0  ;;  %v4637_v21 = vmax.f32 %v4628_v18, 0.0 }
 0xed1   : > { %6289 = vpow2.f32 %v4646_v6 }
 0xed2   : > { %6291 = vpow2.f32 %v4658_v50  ;;  %v4660_v5 = vmul.f32 1.442695, %v4645_v22  ;;  %v4708_v18 = vpop.permute.xlu1 %4707 }
 0xed4   : > { %6293 = vpow2.f32 %v4660_v5 }
 0xed5   : > { %v6280_v49 = vpop.eup %6279 }
 0xed6   : > { %v4663_v27 = vadd.f32 %v6280_v49, %v4631_v61 }
 0xed8   : > { %v5673_v59 = vadd.f32 -1.0, %v4663_v27 }
 0xed9   : > { %v6282_v24 = vpop.eup %6281 }
 0xeda   : > { %v4665_v32 = vadd.f32 %v6282_v24, %v4633_v28  ;;  %v4695_v6 = vmul.f32 %v5673_v59, %v4680_v57 }
 0xedb   : > { %v6284_v60 = vpop.eup %6283 }
 0xedc   : > { %v6286_v31 = vpop.eup %6285  ;;  %v4666_v42 = vadd.f32 %v6284_v60, %v4634_v10  ;;  %v5675_v38 = vadd.f32 -1.0, %v4665_v32  ;;  %v4704_v60 = vpop.permute.xlu0 %4703 }
 0xedd   : > { %v6288_v44 = vpop.eup %6287  ;;  %v4664_v23 = vadd.f32 %v6286_v31, %v4632_v1  ;;  %v4719_v31 = vadd.f32 %v4704_v60, %v4695_v6 }
 0xede   : > { %v6290_v16 = vpop.eup %6289  ;;  %v4667_v25 = vadd.f32 %v6288_v44, %v4635_v55  ;;  %v5676_v33 = vadd.f32 -1.0, %v4666_v42  ;;  %v4697_v46 = vmul.f32 %v5675_v38, %v4684_v26 }
 0xedf   : > { %v6292_v20 = vpop.eup %6291  ;;  %v4662_v12 = vadd.f32 %v6290_v16, %v4630_v15  ;;  %v5674_v36 = vadd.f32 -1.0, %v4664_v23 }
 0xee0   : > { %v4668_v53 = vadd.f32 %v6292_v20, %v4636_v34  ;;  %v5677_v43 = vadd.f32 -1.0, %v4667_v25  ;;  %v4698_v58 = vmul.f32 %v5676_v33, %v4688_v62  ;;  %v4721_v5 = vadd.f32 %v4708_v18, %v4697_v46  ;;  %v4794_v16 = vpop.permute.xlu0 %4793 }
 0xee1   : > { %v6294_v45 = vpop.eup %6293  ;;  %v5672_v37 = vadd.f32 -1.0, %v4662_v12  ;;  %v4696_v51 = vmul.f32 %v5674_v36, %v4684_v26 }
 0xee2   : > { %v5678_v35 = vadd.f32 -1.0, %v4668_v53  ;;  %v4669_v47 = vadd.f32 %v6294_v45, %v4637_v21  ;;  %v4699_v56 = vmul.f32 %v5677_v43, %v4688_v62  ;;  %v4722_v49 = vadd.f32 %v4712_v4, %v4698_v58 }
 0xee3   : > { %v4694_v24 = vmul.f32 %v5672_v37, %v4680_v57  ;;  %v4720_v55 = vadd.f32 %v4708_v18, %v4696_v51  ;;  %v5944_v44 = vpack.c.bf16 %v4721_v5, %v4719_v31  ;;  %v5030_v57 = vld [vmem:[#allocation3] sm:$0x1] }
 0xee4   : > { %v4700_v7 = vmul.f32 %v5678_v35, %v4692_v9  ;;  %v5679_v63 = vadd.f32 -1.0, %v4669_v47  ;;  %v4723_v50 = vadd.f32 %v4712_v4, %v4699_v56  ;;  %v6118_v4 = vld [vmem:[%s7919_s4 + $0xb8] sm:$0xff]   ;;  %5033 = vperm.xlu1 %6092, %v5030_v57   ;;  %v4779_v1 = vpop.permute.xlu0 %4778 }
 0xee5   : > { %v4718_v61 = vadd.f32 %v4704_v60, %v4694_v24 }
 0xee6   : > { %v4701_v52 = vmul.f32 %v5679_v63, %v4692_v9  ;;  %v4724_v14 = vadd.f32 %v4716_v30, %v4700_v7  ;;  %v6117_v9 = vld [vmem:[%s7919_s4 + $0xb0] sm:$0xff]  }
 0xee7   : > { %v5943_v32 = vpack.c.bf16 %v4720_v55, %v4718_v61 }
 0xee8   : > { %v4725_v22 = vadd.f32 %v4716_v30, %v4701_v52  ;;  %v5945_v10 = vpack.c.bf16 %v4724_v14, %v4722_v49 }
 0xeea   : > { %v5946_v28 = vpack.c.bf16 %v4725_v22, %v4723_v50 }
 0xeec   : > { %4880 = vmatprep.subr.bf16.mxu0 %v5946_v28 }
 0xeed   : > { %4881 = vmatpush1.bf16.msra.mxu0 %v5945_v10 }
 0xeee   : > { %4882 = vmatprep.subr.bf16.mxu0 %v5944_v44 }
 0xef1   : > { %4883 = vmatpush1.bf16.msra.mxu0 %v5943_v32 }
 0xef2   : > { %4884 = vmatprep.subr.bf16.mxu0 %v7626_v0 }
 0xef5   : > { %4885 = vmatpush1.bf16.msra.mxu0 %v7630_v17 }
 0xef6   : > { %4886 = vmatprep.subr.bf16.mxu0 %v7626_v0  ;;  %v4789_v0 = vpop.permute.xlu1 %4788 }
 0xef9   : > { %4887 = vmatpush1.bf16.msra.mxu0 %v7630_v17 }
 0xefa   : > { %v4784_v17 = vpop.permute.xlu1 %4783 }
 0xefc   : > { %5706 = vmatmul.mubr.msk.bf16.vlgmr.msra.gmra.mxu0 %vm748_vm4, %v6117_v9 }
 0xefd   : > { %4914 = vmatprep.mubr.bf16.mxu0 %v6374_v3 }
 0xefe   : > { %v4987_v51 = vpop.permute.xlu1 %4986 }
 0xf02   : > { %v5011_v22 = vpop.permute.xlu1 %5010 }
 0xf04   : > { %5707 = vmatmul.mubr.msk.bf16.gmra.mxu0 %vm748_vm4, %v6118_v4 }
 0xfbc   : > { %v4906_v34 = vpop.f32.mrf.mxu0 }
 0xfbd   : > { %v7863_v62 = vadd.f32 %v4906_v34, %v4779_v1 }
 0xfbe   : > { %v4908_v42 = vpop.f32.mrf.mxu0 }
 0xfbf   : > { %v4933_v20 = vmin.f32 %v7863_v62, 0.0  ;;  %v4909_v27 = vadd.f32 %v4908_v42, %v4779_v1  ;;  %v4925_v34 = vmax.f32 %v7863_v62, 0.0 }
 0xfc0   : > { %v4910_v25 = vpop.f32.mrf.mxu0 }
 0xfc1   : > { %v4911_v3 = vadd.f32 %v4910_v25, %v4784_v17  ;;  %v4941_v43 = vmul.f32 1.442695, %v4933_v20  ;;  %v4934_v45 = vmin.f32 %v4909_v27, 0.0  ;;  %v4926_v57 = vmax.f32 %v4909_v27, 0.0 }
 0xfc2   : > { %v4912_v15 = vpop.f32.mrf.mxu0 }
 0xfc3   : > { %v4935_v53 = vmin.f32 %v4911_v3, 0.0  ;;  %v4913_v23 = vadd.f32 %v4912_v15, %v4784_v17  ;;  %6295 = vpow2.f32 %v4941_v43  ;;  %v4943_v56 = vmul.f32 1.442695, %v4934_v45 }
 0xfc4   : > { %v4916_v21 = vpop.f32.mrf.mxu0  ;;  %v4927_v44 = vmax.f32 %v4911_v3, 0.0 }
 0xfc5   : > { %v4917_v38 = vadd.f32 %v4916_v21, %v4789_v0  ;;  %v4945_v35 = vmul.f32 1.442695, %v4935_v53  ;;  %v4936_v33 = vmin.f32 %v4913_v23, 0.0  ;;  %v4928_v10 = vmax.f32 %v4913_v23, 0.0 }
 0xfc6   : > { %v4918_v12 = vpop.f32.mrf.mxu0 }
 0xfc7   : > { %v4937_v26 = vmin.f32 %v4917_v38, 0.0  ;;  %v4919_v47 = vadd.f32 %v4918_v12, %v4789_v0  ;;  %v4947_v59 = vmul.f32 1.442695, %v4936_v33  ;;  %6297 = vpow2.f32 %v4945_v35  ;;  %v4979_v0 = vpop.permute.xlu1 %4978 }
 0xfc8   : > { %v4920_v7 = vpop.f32.mrf.mxu0  ;;  %v4929_v60 = vmax.f32 %v4917_v38, 0.0 }
 0xfc9   : > { %v4949_v30 = vmul.f32 1.442695, %v4937_v26  ;;  %v4938_v36 = vmin.f32 %v4919_v47, 0.0  ;;  %v4921_v63 = vadd.f32 %v4920_v7, %v4794_v16  ;;  %v4930_v28 = vmax.f32 %v4919_v47, 0.0 }
 0xfca   : > { %v4922_v46 = vpop.f32.mrf.mxu0 }
 0xfcb   : > { %6299 = vpow2.f32 %v4949_v30  ;;  %v4951_v58 = vmul.f32 1.442695, %v4938_v36  ;;  %v4939_v37 = vmin.f32 %v4921_v63, 0.0  ;;  %v4923_v6 = vadd.f32 %v4922_v46, %v4794_v16  ;;  %v4983_v16 = vpop.permute.xlu0 %4982  ;;  %v4975_v26 = vpop.permute.xlu1 %4974 }
 0xfcc   : > { %6301 = vpow2.f32 %v4947_v59  ;;  %v4931_v61 = vmax.f32 %v4921_v63, 0.0 }
 0xfcd   : > { %6303 = vpow2.f32 %v4951_v58  ;;  %v4953_v52 = vmul.f32 1.442695, %v4939_v37  ;;  %v4940_v14 = vmin.f32 %v4923_v6, 0.0  ;;  %v4932_v25 = vmax.f32 %v4923_v6, 0.0 }
 0xfce   : > { %6305 = vpow2.f32 %v4943_v56 }
 0xfcf   : > { %6307 = vpow2.f32 %v4953_v52  ;;  %v4955_v18 = vmul.f32 1.442695, %v4940_v14  ;;  %v5007_v12 = vpop.permute.xlu0 %5006  ;;  %v5003_v37 = vpop.permute.xlu1 %5002 }
 0xfd0   : > { %v6296_v50 = vpop.eup %6295 }
 0xfd1   : > { %6309 = vpow2.f32 %v4955_v18  ;;  %v4957_v43 = vadd.f32 %v6296_v50, %v4925_v34 }
 0xfd3   : > { %v5708_v62 = vadd.f32 -1.0, %v4957_v43  ;;  %v4999_v18 = vpop.permute.xlu0 %4998 }
 0xfd4   : > { %v6298_v5 = vpop.eup %6297 }
 0xfd5   : > { %v4959_v17 = vadd.f32 %v6298_v5, %v4927_v44  ;;  %v4989_v52 = vmul.f32 %v5708_v62, %v4975_v26 }
 0xfd7   : > { %v5710_v35 = vadd.f32 -1.0, %v4959_v17 }
 0xfd8   : > { %v6300_v49 = vpop.eup %6299 }
 0xfd9   : > { %v6302_v24 = vpop.eup %6301  ;;  %v4961_v32 = vadd.f32 %v6300_v49, %v4929_v60  ;;  %v4991_v63 = vmul.f32 %v5710_v35, %v4979_v0 }
 0xfda   : > { %v6304_v31 = vpop.eup %6303  ;;  %v4960_v1 = vadd.f32 %v6302_v24, %v4928_v10  ;;  %v5034_v10 = vpop.permute.xlu1 %5033 }
 0xfdb   : > { %v6306_v55 = vpop.eup %6305  ;;  %v4962_v9 = vadd.f32 %v6304_v31, %v4930_v28  ;;  %v5712_v23 = vadd.f32 -1.0, %v4961_v32  ;;  %v5015_v49 = vadd.f32 %v5003_v37, %v4991_v63  ;;  %v5013_v28 = vadd.f32 %v4999_v18, %v4989_v52 }
 0xfdc   : > { %v6308_v4 = vpop.eup %6307  ;;  %v4958_v15 = vadd.f32 %v6306_v55, %v4926_v57  ;;  %v5711_v38 = vadd.f32 -1.0, %v4960_v1 }
 0xfdd   : > { %v4963_v42 = vadd.f32 %v6308_v4, %v4931_v61  ;;  %v5713_v20 = vadd.f32 -1.0, %v4962_v9  ;;  %v4993_v59 = vmul.f32 %v5712_v23, %v4983_v16  ;;  %v5023_v31 = vadd.f32 %v5015_v49, %v7803_v13 }
 0xfde   : > { %v6310_v53 = vpop.eup %6309  ;;  %v5709_v47 = vadd.f32 -1.0, %v4958_v15  ;;  %v4992_v30 = vmul.f32 %v5711_v38, %v4979_v0  ;;  %v5039_v13 = vrot.slane %v5034_v10, %v6625_v8 }
 0xfdf   : > { %v5714_v21 = vadd.f32 -1.0, %v4963_v42  ;;  %v4964_v3 = vadd.f32 %v6310_v53, %v4932_v25  ;;  %v4994_v27 = vmul.f32 %v5713_v20, %v4983_v16  ;;  %v5017_v6 = vadd.f32 %v5007_v12, %v4993_v59 }
 0xfe0   : > { %v4990_v58 = vmul.f32 %v5709_v47, %v4975_v26  ;;  %v5016_v50 = vadd.f32 %v5003_v37, %v4992_v30 }
 0xfe1   : > { %v4995_v45 = vmul.f32 %v5714_v21, %v4987_v51  ;;  %v5715_v33 = vadd.f32 -1.0, %v4964_v3  ;;  %v5018_v46 = vadd.f32 %v5007_v12, %v4994_v27 }
 0xfe2   : > { %v5014_v60 = vadd.f32 %v4999_v18, %v4990_v58 }
 0xfe3   : > { %v4996_v7 = vmul.f32 %v5715_v33, %v4987_v51  ;;  %v5019_v36 = vadd.f32 %v5011_v22, %v4995_v45  ;;  %v5026_v24 = vadd.f32 %v5018_v46, %v7784_v19  ;;  %v5025_v51 = vadd.f32 %v5017_v6, %v7793_v48  ;;  %v5029_v19 = vld [vmem:[%s7921_s6] sm:$0x1] }
 0xfe5   : > { %v5020_v56 = vadd.f32 %v5011_v22, %v4996_v7  ;;  %v5027_v5 = vadd.f32 %v5019_v36, %v7781_v11  ;;  %v5024_v22 = vadd.f32 %v5016_v50, %v7790_v29  ;;  %v5021_v11 = vadd.f32 %v5013_v28, %v7808_v54 }
 0xfe6   : > { %v6382_v29 = vmov 1966171168  }
 0xfe7   : > { %v5028_v14 = vadd.f32 %v5020_v56, %v7787_v2  ;;  %v5022_v2 = vadd.f32 %v5014_v60, %v7796_v41  ;;  %v5119_v48 = vunpack.c.l.s4 %v6382_v29 }
 0xfe9   : > { %5068 = vmatprep.subr.mxu1 %v5028_v14  ;;  %v5120_v41 = vunpack.c.0.s8 %v5119_v48 }
 0xfea   : > { %5069 = vmatpush1.msra.mxu1 %v5027_v5 }
 0xfeb   : > { %5070 = vmatprep.subr.mxu1 %v5026_v24  ;;  %v5123_v32 = vsub.s32 %v5120_v41, %v6585_v40 }
 0xfec   : > { %5071 = vmatpush1.msra.mxu1 %v5025_v51 }
 0xfed   : > { %5072 = vmatprep.subr.mxu1 %v5024_v22 }
 0xfee   : > { %5073 = vmatpush1.msra.mxu1 %v5023_v31 }
 0xfef   : > { %5074 = vmatprep.subr.mxu1 %v5022_v2 }
 0xff0   : > { %5075 = vmatpush1.msra.mxu1 %v5021_v11 }
 0xff1   : > { %5716 = vmatmul.mubr.msk.f32.vlgmr.msra.gmra.mxu1 %vm5040_vm8, %v5029_v19 }
0x10b1   : > { %v5110_v55 = vpop.f32.mrf.mxu1 }
0x10b2   : > { %v5111_v44 = vadd.f32 %v5110_v55, %v5039_v13 }
0x10b3   : > { %v5112_v54 = vpop.f32.mrf.mxu1 }
0x10b4   : > { %v5113_v61 = vadd.f32 %v5112_v54, %v5039_v13 }
0x10b6   : > { %v5117_v9 = vcombine.low %v5111_v44, %v5113_v61 }
0x10b8   : > { %v5124_v4 = vrot.slane %v5117_v9, %v5123_v32 }
0x10ba   : > { %v5131_v57 = vrot.slane %v5124_v4, %v5123_v32 }
0x10bc   : > { %5137 = vst.msk [vmem:[%s301_s26] sm:$0x3] %vm5135_vm9, %v5131_v57 }
0x10bd   : > { %6324 = shalt.err (!%p6321_p3)
}
0x10be   : > { %s6325_s14 = scalar_lea.hbm %s5151_s23, 32  ;;  %s6329_s21 = scalar_lea.hbm %s7923_s8, 64 }
0x10bf   : > { %p6326_p4 = scmp.ne.s32.totalorder %s5151_s23, %s6325_s14  ;;  %p6330_p9 = scmp.lt.s32.totalorder %s5151_s23, %s7923_s8 }
0x10c0   : > { %p6331_p10 = scmp.lt.s32.totalorder %s6329_s21, %s6325_s14 }
0x10c1   : > { %p6327_p7 = pnand %p6326_p4, %p6470_p5 }
0x10c2   : > { %p6332_p11 = por %p6331_p10, %p6330_p9 }
0x10c3   : > { %p6328_p8 = pneg %p6327_p7 }
0x10c5   : > { %p6333_p12 = pnand %p6332_p11, %p6328_p8 }
0x10c7   : > { %6336 = shalt.err (!%p6333_p12)
}
0x10c8   : > { %5947 = dma.vmem_to_hbm [thread:$0]  (%p6470_p5), %s5154_s25, 32, %s5151_s23, %s5139_s24  }
0x10c9 PF: > { %p5953_p13 = scmp.ge.s32.totalorder %s6371_s10, 2  ;;  %s5165_s28 = sand.u32 1, %s6359_s29  }
0x10ca   : > { %s5166_s22 = scalar_lea.sflag [#allocation5], %s5165_s28 }
0x10cb   : > { %p5950_p0 = pnand %p5953_p13, %p6474_p6 }
0x10cd   : > { %p5951_p1 = pneg %p5950_p0 }
0x10cf   : > { %6354 = dma.done.wait (%p5951_p1), %s5166_s22, 32  }
0x10d0   : > { %6356 = vsyncadd (%p5951_p1), %s5166_s22, 4294967264  ;;  %p20_p2 = scmp.ge.s32.totalorder %s6457_s12, 4   ;;  %s7926_s29 = smov %s6363_s30 }
0x10d1   : > { %s7927_s30 = smov %s6367_s9  ;;  %s7928_s9 = smov %s6468_s15 }
0x10d2   : > { %s7929_s10 = smov %s6457_s12  ;;  %22 = sbr.rel (!%p20_p2) target bundleno = 6 (0x6), region = 112 }
0x10d7   :  { %5171 = vsyncpa [#allocation5], 1 }
0x10d8   :  { %5173 = vsyncpa [#allocation5 + $0x1], 1 }

</bundles_post_ra>
